<compile_context>
chip_gen: v7x
topology: tpu7x:2x2x1
jax: 0.10.0
libtpu: 0.0.40
codegen_flags: <defaults>
</compile_context>

<pallas_src>
import jax
import jax.numpy as jnp
from jax import lax
from jax.experimental import pallas as pl
from jax.experimental.pallas import tpu as pltpu

D_MODEL = 1024  # fixed by MolGen-large encoder hidden size


def _round_up(x, m):
    return ((x + m - 1) // m) * m


def _vmem_capacity_bytes():
    try:
        info = pltpu.get_tpu_info()
        cap = getattr(info, "vmem_capacity_bytes", None)
        if cap:
            return int(cap)
    except Exception:
        pass
    return 64 << 20  # conservative fallback (v7x per-core VMEM)


def _make_kernel(*, seq_len, ts, group, needs_seq_mask):
    n_groups = ts // group

    def kernel(enc_ref, invd_ref, w_ref, b_ref, out_ref, acc_ref):
        # enc_ref:  [tb, ts, D]      streamed tile (native dtype)
        # invd_ref: [tb, 1]          1 / attnmask row sum
        # w_ref:    [D, H]           resident weight
        # b_ref:    [1, H]           resident bias
        # out_ref:  [tb, H]          resident across the seq axis
        # acc_ref:  [tb, group, D]   f32 per-sublane partial sums
        k = pl.program_id(1)

        @pl.when(k == 0)
        def _init():
            acc_ref[...] = jnp.zeros_like(acc_ref)

        def accumulate(masked, rem):
            if masked:
                pos = lax.broadcasted_iota(jnp.int32, (1, group, D_MODEL), 1)

            @pl.loop(0, n_groups)
            def _(g):
                off = pl.multiple_of(g * group, group)
                chunk = enc_ref[:, pl.ds(off, group), :].astype(jnp.float32)
                if masked:
                    # Out-of-bounds block reads are NOT zeroed by Pallas: mask them.
                    chunk = jnp.where((pos + off) < rem, chunk, 0.0)
                acc_ref[...] += chunk  # pure vreg adds; no per-step sublane reduce

        if needs_seq_mask:
            rem = seq_len - k * ts  # valid rows in this sequence tile

            @pl.when(rem >= ts)
            def _full_tile():
                accumulate(False, rem)

            @pl.when(rem < ts)
            def _ragged_tail():
                accumulate(True, rem)
        else:
            accumulate(False, ts)

        @pl.when(k == pl.num_programs(1) - 1)
        def _finalize():
            pooled = jnp.sum(acc_ref[...], axis=1)          # [tb, D] one sublane reduce
            pooled = pooled * invd_ref[...]                  # / attnmask.sum(1) (torch order)
            y = jnp.dot(pooled.astype(w_ref.dtype), w_ref[...],
                        preferred_element_type=jnp.float32)  # [tb, H] MXU
            out_ref[...] = jnp.maximum(y + b_ref[...], 0.0)  # ReLU; Dropout = identity

    return kernel


def selfies_molgen_head(encoded, attnmask, w, b, *, tb=None, ts=None, weight_dtype=None):
    """pooled = ReLU((encoded.sum(1) / attnmask.sum(1)[:, None]) @ w + b)

    encoded:  [B, S, 1024] encoder last_hidden_state, streamed at its OWN dtype
              (pass bf16 straight from the encoder to halve HBM traffic; no cast here).
    attnmask: [B, S] attention mask (every row sum must be > 0, as in the torch module).
    w:        [1024, H] torch Linear weight stored transposed.
    b:        [H]
    returns (embeddings=None, attnmask, pooled[B, H])
    """
    B, S, D = encoded.shape
    assert D == D_MODEL, f"expected hidden={D_MODEL}, got {D}"
    assert attnmask.shape == (B, S)
    H = w.shape[1]

    enc_bytes = jnp.dtype(encoded.dtype).itemsize
    # One sublane pack: 8 rows for 4-byte dtypes, 16 for 2-byte (bf16) dtypes.
    seq_align = max(8, 32 // max(enc_bytes, 1))
    group = seq_align

    # ---- per-generation tile sizing -------------------------------------------------
    vmem_cap = _vmem_capacity_bytes()
    # Double-buffered streamed-tile budget: ~42 MiB on v5e/v6e (128 MiB VMEM),
    # ~21 MiB on v7x (64 MiB VMEM).
    tile_budget = min(48 << 20, vmem_cap // 3)

    if tb is None:
        tb = min(_round_up(B, 8), 64)
        if B >= 16:  # guarantee >= 2 batch tiles so v7x's 2 cores both get work
            tb = min(tb, max(8, _round_up((B + 1) // 2, 8)))
    tb = max(8, _round_up(int(tb), 8))

    if ts is None:
        ts = tile_budget // (2 * tb * D_MODEL * enc_bytes)
        ts = max(seq_align, (ts // seq_align) * seq_align)
        ts = min(ts, _round_up(S, seq_align))  # never more than one pass over S per step
    ts = max(seq_align, _round_up(int(ts), seq_align))

    needs_seq_mask = (S % ts) != 0

    # ---- small operands (no pad of `encoded`!) ---------------------------------------
    # Tiny XLA-side precompute: per-row reciprocal of the mask sum.
    inv_denom = (1.0 / attnmask.astype(jnp.float32).sum(axis=1)).reshape(B, 1)

    # Only the tiny batch-axis operands are padded; `encoded`'s ragged batch/seq tails
    # are handled as partial blocks (seq tail masked in-kernel, batch tail rows dropped).
    Bp = _round_up(B, tb)
    if Bp != B:
        inv_denom = jnp.pad(inv_denom, ((0, Bp - B), (0, 0)))

    if weight_dtype is None:
        # f32 weight unless the (double-buffered) resident weight would eat a big slice
        # of v7x's 64 MiB VMEM; bf16 is MXU-native and halves that footprint.
        weight_dtype = jnp.float32 if 2 * D_MODEL * H * 4 <= (16 << 20) else jnp.bfloat16
    w_k = w.astype(weight_dtype)
    b2 = b.reshape(1, H).astype(jnp.float32)
    w_bytes = jnp.dtype(weight_dtype).itemsize

    grid = (Bp // tb, pl.cdiv(S, ts))

    # ---- VMEM plan --------------------------------------------------------------------
    working = (2 * tb * ts * D_MODEL * enc_bytes        # streamed encoded tile (x2 buffers)
               + 2 * D_MODEL * H * w_bytes              # resident weight
               + 2 * 8 * _round_up(H, 128) * 4          # bias
               + 2 * tb * _round_up(H, 128) * 4         # output tile
               + 2 * tb * 128 * 4                       # inv_denom tile (lane-padded)
               + 2 * tb * group * D_MODEL * 4)          # accumulator + in-flight f32 chunk
    vmem_limit = int(min(max(working + (4 << 20), 16 << 20), vmem_cap - (8 << 20)))

    cost = pl.CostEstimate(
        flops=B * S * D_MODEL + 2 * B * D_MODEL * H,
        transcendentals=0,
        bytes_accessed=(B * S * D_MODEL * enc_bytes + D_MODEL * H * w_bytes
                        + Bp * H * 4 + Bp * 4 + H * 4),
    )

    kernel = _make_kernel(seq_len=S, ts=ts, group=group, needs_seq_mask=needs_seq_mask)

    pooled = pl.pallas_call(
        kernel,
        out_shape=jax.ShapeDtypeStruct((Bp, H), jnp.float32),
        grid_spec=pltpu.PrefetchScalarGridSpec(
            num_scalar_prefetch=0,
            grid=grid,
            in_specs=[
                pl.BlockSpec((tb, ts, D_MODEL), lambda i, k: (i, k, 0)),  # streamed enc
                pl.BlockSpec((tb, 1), lambda i, k: (i, 0)),               # 1 / mask_sum
                pl.BlockSpec((D_MODEL, H), lambda i, k: (0, 0)),          # weight (resident)
                pl.BlockSpec((1, H), lambda i, k: (0, 0)),                # bias (resident)
            ],
            out_specs=pl.BlockSpec((tb, H), lambda i, k: (i, 0)),
            scratch_shapes=[pltpu.VMEM((tb, group, D_MODEL), jnp.float32)],
        ),
        compiler_params=pltpu.CompilerParams(
            dimension_semantics=("parallel", "arbitrary"),
            vmem_limit_bytes=vmem_limit,
        ),
        cost_estimate=cost,
    )(encoded, inv_denom, w_k, b2)

    pooled = pooled[:B]  # drop padded batch rows (if any)
    embeddings = None
    return embeddings, attnmask, pooled


def _reference(encoded, attnmask, w, b):
    enc = encoded.astype(jnp.float32)
    pooled = enc.sum(1) / attnmask.astype(jnp.float32).sum(1)[:, None]
    return jnp.maximum(pooled @ w + b, 0.0)


if __name__ == "__main__":
    key = jax.random.PRNGKey(0)
    # Small shapes; D fixed at 1024 by MolGen-large. B=10, S=20 deliberately NOT
    # tile-aligned so the partial batch tile and the masked ragged seq tail are exercised.
    B, S, H = 10, 20, 128

    k_enc, k_w, k_b = jax.random.split(key, 3)
    # Synthetic stand-in for the pretrained encoder's last_hidden_state.
    encoded = jax.random.normal(k_enc, (B, S, D_MODEL), dtype=jnp.float32)
    # Synthetic attention mask: first (b % S) + 1 tokens are real, rest padding.
    lengths = (jnp.arange(B) % S) + 1
    attnmask = (jnp.arange(S)[None, :] < lengths[:, None]).astype(jnp.int32)
    # Deterministic Linear(1024, H) parameters (stored transposed: [D, H]).
    w = jax.random.normal(k_w, (D_MODEL, H), dtype=jnp.float32) * 0.02
    b = jax.random.normal(k_b, (H,), dtype=jnp.float32) * 0.02

    ref = _reference(encoded, attnmask, w, b)

    # 1) Explicit small tiles -> grid (2, 3): partial batch tile (10 % 8) and masked
    #    ragged seq tail (20 % 8) both exercised, multi-step reduction path used.
    emb, mask_out, pooled = selfies_molgen_head(encoded, attnmask, w, b, tb=8, ts=8)
    pooled = jax.block_until_ready(pooled)
    assert emb is None
    assert pooled.shape == (B, H)
    assert jnp.allclose(pooled, ref, atol=5e-3, rtol=5e-3), "explicit-tile mismatch"

    # 2) Auto tiles: single large seq tile per step, ragged tail masked in-kernel,
    #    no padding of `encoded` anywhere.
    _, _, pooled_auto = selfies_molgen_head(encoded, attnmask, w, b)
    pooled_auto = jax.block_until_ready(pooled_auto)
    assert jnp.allclose(pooled_auto, ref, atol=5e-3, rtol=5e-3), "auto-tile mismatch"

    # 3) bf16 activations as produced by a bf16 encoder (NO wrapper cast inside the
    #    kernel path): streamed at 2 B/elem, accumulated in f32 in-kernel.
    enc_bf16 = encoded.astype(jnp.bfloat16)  # stands in for a bf16 encoder output
    _, _, pooled_bf16 = selfies_molgen_head(enc_bf16, attnmask, w, b)
    pooled_bf16 = jax.block_until_ready(pooled_bf16)
    ref_bf16 = _reference(enc_bf16, attnmask, w, b)
    assert jnp.allclose(pooled_bf16, ref_bf16, atol=1e-2, rtol=1e-2), "bf16 mismatch"

    print("KERNEL_OK")
</pallas_src>

<mosaic_0001>
module attributes {stable_mosaic.version = 11 : i64} {
  func.func @kernel(%arg0: i32, %arg1: i32, %arg2: memref<8x8x1024xf32, #tpu.memory_space<vmem>>, %arg3: memref<8x1xf32, #tpu.memory_space<vmem>>, %arg4: memref<1024x128xf32, #tpu.memory_space<vmem>>, %arg5: memref<1x128xf32, #tpu.memory_space<vmem>>, %arg6: memref<8x128xf32, #tpu.memory_space<vmem>>, %arg7: memref<8x8x1024xf32, #tpu.memory_space<vmem>>) attributes {dimension_semantics = [#tpu.dimension_semantics<parallel>, #tpu.dimension_semantics<arbitrary>], iteration_bounds = array<i64: 2, 3>, scalar_prefetch = 0 : i64, scratch_operands = 1 : i64, tpu.core_type = #tpu.core_type<tc>, window_params = [{transform_indices = @transform_0, window_bounds = array<i64: 8, 8, 1024>}, {transform_indices = @transform_1, window_bounds = array<i64: 8, 1>}, {pipeline_mode = #tpu.pipeline_mode<synchronous>, transform_indices = @transform_2, window_bounds = array<i64: 1024, 128>}, {pipeline_mode = #tpu.pipeline_mode<synchronous>, transform_indices = @transform_3, window_bounds = array<i64: 1, 128>}, {transform_indices = @transform_4, window_bounds = array<i64: 8, 128>}]} {
    %c0_i32 = arith.constant 0 : i32
    %0 = arith.cmpi eq, %arg1, %c0_i32 : i32
    %1 = arith.extui %0 : i1 to i32
    %c0_i32_0 = arith.constant 0 : i32
    %2 = arith.cmpi ne, %1, %c0_i32_0 : i32
    scf.if %2 {
      %cst = arith.constant 0.000000e+00 : f32
      %14 = vector.broadcast %cst : f32 to vector<8x8x1024xf32>
      %c0 = arith.constant 0 : index
      %c0_6 = arith.constant 0 : index
      %c0_7 = arith.constant 0 : index
      %15 = vector.load %arg7[%c0, %c0_6, %c0_7] : memref<8x8x1024xf32, #tpu.memory_space<vmem>>, vector<8x8x1024xf32>
      tpu.vector_store %arg7[%c0, %c0_6, %c0_7], %14 {strides = array<i32>} : memref<8x8x1024xf32, #tpu.memory_space<vmem>>, vector<8x8x1024xf32>,
    } else {
    }
    %c8_i32 = arith.constant 8 : i32
    %3 = arith.muli %arg1, %c8_i32 : i32
    %c20_i32 = arith.constant 20 : i32
    %4 = arith.subi %c20_i32, %3 : i32
    %c8_i32_1 = arith.constant 8 : i32
    %5 = arith.cmpi sge, %4, %c8_i32_1 : i32
    %6 = arith.extui %5 : i1 to i32
    %c0_i32_2 = arith.constant 0 : i32
    %7 = arith.cmpi ne, %6, %c0_i32_2 : i32
    scf.if %7 {
      %c0_i32_6 = arith.constant 0 : i32
      %c1_i32 = arith.constant 1 : i32
      %14 = arith.muli %c0_i32_6, %c1_i32 : i32
      %c0_i32_7 = arith.constant 0 : i32
      %15 = arith.addi %c0_i32_7, %14 : i32
      %c8_i32_8 = arith.constant 8 : i32
      %16 = arith.muli %15, %c8_i32_8 : i32
      %17 = tpu.assume_multiple %16, 8 : i32
      %c0 = arith.constant 0 : index
      %18 = arith.index_cast %17 : i32 to index
      %c0_9 = arith.constant 0 : index
      %19 = vector.load %arg2[%c0, %18, %c0_9] : memref<8x8x1024xf32, #tpu.memory_space<vmem>>, vector<8x8x1024xf32>
      %c0_10 = arith.constant 0 : index
      %c0_11 = arith.constant 0 : index
      %c0_12 = arith.constant 0 : index
      %20 = vector.load %arg7[%c0_10, %c0_11, %c0_12] : memref<8x8x1024xf32, #tpu.memory_space<vmem>>, vector<8x8x1024xf32>
      %21 = arith.addf %20, %19 : vector<8x8x1024xf32>
      %c0_13 = arith.constant 0 : index
      %c0_14 = arith.constant 0 : index
      %c0_15 = arith.constant 0 : index
      %22 = vector.load %arg7[%c0_13, %c0_14, %c0_15] : memref<8x8x1024xf32, #tpu.memory_space<vmem>>, vector<8x8x1024xf32>
      tpu.vector_store %arg7[%c0_13, %c0_14, %c0_15], %21 {strides = array<i32>} : memref<8x8x1024xf32, #tpu.memory_space<vmem>>, vector<8x8x1024xf32>,
      %c1_i32_16 = arith.constant 1 : i32
    } else {
    }
    %c8_i32_3 = arith.constant 8 : i32
    %8 = arith.cmpi slt, %4, %c8_i32_3 : i32
    %9 = arith.extui %8 : i1 to i32
    %c0_i32_4 = arith.constant 0 : i32
    %10 = arith.cmpi ne, %9, %c0_i32_4 : i32
    scf.if %10 {
      %14 = tpu.iota {dimensions = array<i32: 1>} : vector<1x8x1024xi32>
      %c0_i32_6 = arith.constant 0 : i32
      %c1_i32 = arith.constant 1 : i32
      %15 = arith.muli %c0_i32_6, %c1_i32 : i32
      %c0_i32_7 = arith.constant 0 : i32
      %16 = arith.addi %c0_i32_7, %15 : i32
      %c8_i32_8 = arith.constant 8 : i32
      %17 = arith.muli %16, %c8_i32_8 : i32
      %18 = tpu.assume_multiple %17, 8 : i32
      %c0 = arith.constant 0 : index
      %19 = arith.index_cast %18 : i32 to index
      %c0_9 = arith.constant 0 : index
      %20 = vector.load %arg2[%c0, %19, %c0_9] : memref<8x8x1024xf32, #tpu.memory_space<vmem>>, vector<8x8x1024xf32>
      %21 = vector.broadcast %18 : i32 to vector<1x8x1024xi32>
      %22 = arith.addi %14, %21 : vector<1x8x1024xi32>
      %23 = vector.broadcast %4 : i32 to vector<1x8x1024xi32>
      %24 = arith.cmpi slt, %22, %23 : vector<1x8x1024xi32>
      %cst = arith.constant 0.000000e+00 : f32
      %25 = vector.shape_cast %24 : vector<1x8x1024xi1> to vector<1x8x1024xi1>
      %26 = vector.broadcast %25 : vector<1x8x1024xi1> to vector<8x8x1024xi1>
      %27 = vector.broadcast %cst : f32 to vector<8x8x1024xf32>
      %28 = arith.select %26, %20, %27 : vector<8x8x1024xi1>, vector<8x8x1024xf32>
      %c0_10 = arith.constant 0 : index
      %c0_11 = arith.constant 0 : index
      %c0_12 = arith.constant 0 : index
      %29 = vector.load %arg7[%c0_10, %c0_11, %c0_12] : memref<8x8x1024xf32, #tpu.memory_space<vmem>>, vector<8x8x1024xf32>
      %30 = arith.addf %29, %28 : vector<8x8x1024xf32>
      %c0_13 = arith.constant 0 : index
      %c0_14 = arith.constant 0 : index
      %c0_15 = arith.constant 0 : index
      %31 = vector.load %arg7[%c0_13, %c0_14, %c0_15] : memref<8x8x1024xf32, #tpu.memory_space<vmem>>, vector<8x8x1024xf32>
      tpu.vector_store %arg7[%c0_13, %c0_14, %c0_15], %30 {strides = array<i32>} : memref<8x8x1024xf32, #tpu.memory_space<vmem>>, vector<8x8x1024xf32>,
      %c1_i32_16 = arith.constant 1 : i32
    } else {
    }
    %c2_i32 = arith.constant 2 : i32
    %11 = arith.cmpi eq, %arg1, %c2_i32 : i32
    %12 = arith.extui %11 : i1 to i32
    %c0_i32_5 = arith.constant 0 : i32
    %13 = arith.cmpi ne, %12, %c0_i32_5 : i32
    scf.if %13 {
      %c0 = arith.constant 0 : index
      %c0_6 = arith.constant 0 : index
      %c0_7 = arith.constant 0 : index
      %14 = vector.load %arg7[%c0, %c0_6, %c0_7] : memref<8x8x1024xf32, #tpu.memory_space<vmem>>, vector<8x8x1024xf32>
      %cst = arith.constant dense<0.000000e+00> : vector<8x1024xf32>
      %15 = vector.multi_reduction <add>, %14, %cst [1] : vector<8x8x1024xf32> to vector<8x1024xf32>
      %c0_8 = arith.constant 0 : index
      %c0_9 = arith.constant 0 : index
      %16 = vector.load %arg3[%c0_8, %c0_9] : memref<8x1xf32, #tpu.memory_space<vmem>>, vector<8x1xf32>
      %17 = vector.broadcast %16 : vector<8x1xf32> to vector<8x1024xf32>
      %18 = arith.mulf %15, %17 : vector<8x1024xf32>
      %c0_10 = arith.constant 0 : index
      %c0_11 = arith.constant 0 : index
      %19 = vector.load %arg4[%c0_10, %c0_11] : memref<1024x128xf32, #tpu.memory_space<vmem>>, vector<1024x128xf32>
      %cst_12 = arith.constant dense<0.000000e+00> : vector<8x128xf32>
      %20 = tpu.matmul %18, %19, %cst_12 {dimension_numbers = #tpu.dot_dimension_numbers<[1], [0], [0], [1], [0, 0, 1, 1], [], []>} : vector<8x1024xf32>, vector<1024x128xf32>, vector<8x128xf32> -> vector<8x128xf32>
      %c0_13 = arith.constant 0 : index
      %c0_14 = arith.constant 0 : index
      %21 = vector.load %arg5[%c0_13, %c0_14] : memref<1x128xf32, #tpu.memory_space<vmem>>, vector<1x128xf32>
      %22 = vector.broadcast %21 : vector<1x128xf32> to vector<8x128xf32>
      %23 = arith.addf %20, %22 : vector<8x128xf32>
      %cst_15 = arith.constant 0.000000e+00 : f32
      %24 = vector.broadcast %cst_15 : f32 to vector<8x128xf32>
      %25 = arith.maximumf %23, %24 : vector<8x128xf32>
      %c0_16 = arith.constant 0 : index
      %c0_17 = arith.constant 0 : index
      %26 = vector.load %arg6[%c0_16, %c0_17] : memref<8x128xf32, #tpu.memory_space<vmem>>, vector<8x128xf32>
      tpu.vector_store %arg6[%c0_16, %c0_17], %25 {strides = array<i32>} : memref<8x128xf32, #tpu.memory_space<vmem>>, vector<8x128xf32>,
    } else {
    }
    return
  }
  func.func @transform_0(%arg0: i32, %arg1: i32) -> (i32, i32, i32) {
    %c0_i32 = arith.constant 0 : i32
    %c0_i32_0 = arith.constant 0 : i32
    return %arg0, %arg1, %c0_i32 : i32, i32, i32
  }
  func.func @transform_1(%arg0: i32, %arg1: i32) -> (i32, i32) {
    %c0_i32 = arith.constant 0 : i32
    %c0_i32_0 = arith.constant 0 : i32
    return %arg0, %c0_i32 : i32, i32
  }
  func.func @transform_2(%arg0: i32, %arg1: i32) -> (i32, i32) {
    %c0_i32 = arith.constant 0 : i32
    %c0_i32_0 = arith.constant 0 : i32
    %c0_i32_1 = arith.constant 0 : i32
    return %c0_i32, %c0_i32_0 : i32, i32
  }
  func.func @transform_3(%arg0: i32, %arg1: i32) -> (i32, i32) {
    %c0_i32 = arith.constant 0 : i32
    %c0_i32_0 = arith.constant 0 : i32
    %c0_i32_1 = arith.constant 0 : i32
    return %c0_i32, %c0_i32_0 : i32, i32
  }
  func.func @transform_4(%arg0: i32, %arg1: i32) -> (i32, i32) {
    %c0_i32 = arith.constant 0 : i32
    %c0_i32_0 = arith.constant 0 : i32
    return %arg0, %c0_i32 : i32, i32
  }
}

</mosaic_0001>

<bundles_post_ra>
// kernel: tpu_custom_call.1
= control target key start
LH: loop header
LB: loop body
LE: loop exit
PB: predicated region body
PF: predicated region fallthrough
CT: control target
= control target key end

     0   :  { %s4014_s0 = inlined_call_operand.hbm [shape: f32[10,20,1024], index: 0, kind: input, shape index: {}]   ;;  %s4015_s1 = inlined_call_operand.vmem [shape: f32[16,1], index: 1, kind: input, shape index: {}]   ;;  %s4016_s2 = inlined_call_operand.hbm [shape: f32[1024,128], index: 2, kind: input, shape index: {}]   ;;  %s4017_s3 = inlined_call_operand.vmem [shape: f32[1,128], index: 3, kind: input, shape index: {}]   ;;  %s4018_s4 = inlined_call_operand.hbm [shape: f32[16,128], index: 4, kind: output, shape index: {}]  }
   0x1   :  { %4072 = sst [smem:[#allocation92_spill]] %s4016_s2 }
   0x2   :  { %9 = vsyncpa [#allocation4], 0 }
   0x3   :  { %11 = vsyncpa [#allocation4 + $0x1], 0 }
   0x4   :  { %12 = vsyncpa [#allocation7], 0 }
   0x5   :  { %13 = vsyncpa [#allocation5], 0 }
   0x6   :  { %15 = vsyncpa [#allocation5 + $0x1], 0  ;;  %s2844_s15 = smov 0   ;;  %s2846_s16 = smov 0  }
   0x7   :  { %s2848_s17 = smov 0   ;;  %s2850_s18 = smov 0  }
   0x8   :  { %s2852_s19 = smov 0   ;;  %s2854_s20 = smov 0  }
   0x9   :  { %s2856_s21 = smov 0   ;;  %s2858_s22 = smov 0  }
   0xa   :  { %s2860_s23 = smov 0   ;;  %s2862_s24 = smov 0  }
   0xb   :  { %s2864_s25 = smov 0  }
   0xc LB: > { %4073 = sst [smem:[#allocation12_spill]] %s2775_s17  ;;  %s2210_s26 = sadd.s32 4294967295, %s2807_s25   ;;  %s2807_s25 = sphi %s2864_s25, %s21_s25   ;;  %s2803_s24 = sphi %s2862_s24, %s4278_s24   ;;  %s2799_s23 = sphi %s2860_s23, %s4277_s23   ;;  %s2795_s22 = sphi %s2858_s22, %s4268_s22   ;;  %s2791_s21 = sphi %s2856_s21, %s4276_s21   ;;  %s2787_s20 = sphi %s2854_s20, %s4275_s20   ;;  %s2783_s19 = sphi %s2852_s19, %s4274_s19   ;;  %s2779_s18 = sphi %s2850_s18, %s4273_s18   ;;  %s2775_s17 = sphi %s2848_s17, %s4266_s17   ;;  %s2771_s16 = sphi %s2846_s16, %s4272_s16   ;;  %s2767_s15 = sphi %s2844_s15, %s4271_s15  }
   0xd   : > { %4074 = sst [smem:[#allocation13_spill]] %s2803_s24  ;;  %s2211_s27 = sadd.s32 4294967294, %s2807_s25  }
   0xe   : > { %s30_s28 = sadd.s32 1, %s2799_s23  ;;  %s33_s29 = sadd.s32 1, %s2803_s24 }
   0xf   : > { %p31_p0 = scmp.ge.s32.totalorder %s30_s28, 3  ;;  %s42_s30 = sadd.s32 1, %s2787_s20 }
  0x10   : > { %p49_p1 = scmp.ne.s32.totalorder %s2787_s20, %s2783_s19  ;;  %p50_p2 = scmp.eq.s32.totalorder %s2807_s25, 0 }
  0x11   : > { %s4280_s28 = smov (%p31_p0, %s30_s28), 0  ;;  %s4282_s29 = smov (!%p31_p0, %s33_s29), %s2803_s24 }
  0x12   : > { %4075 = sst [smem:[#allocation14_spill]] %s4280_s28  ;;  %s38_s5 = ssub.s32 %s2799_s23, %s4280_s28 }
  0x13   : > { %p2910_p3 = por %p50_p2, %p49_p1  ;;  %p35_p4 = scmp.ge.s32.totalorder %s4282_s29, 2 }
  0x14   : > { %p55_p5 = scmp.ne.s32.totalorder %s2783_s19, %s2779_s18  ;;  %p2915_p6 = scmp.eq.s32.totalorder %s2210_s26, 0 }
  0x15   : > { %s4076_s6 = scalar_select %p2910_p3, 1, 0 }
  0x16   : > { %s4077_s7 = scalar_select %p2915_p6, 1, 0 }
  0x17   : > { %s136_s8 = sadd.s32 1, %s2775_s17  ;;  %s4284_s29 = smov (%p35_p4, %s4282_s29), 0 }
  0x18   : > { %4078 = sst [smem:[#allocation15_spill]] %s4284_s29  ;;  %p2924_p7 = por %p2915_p6, %p55_p5 }
  0x19   : > { %p146_p8 = scmp.ne.s32.totalorder %s2775_s17, %s2771_s16  ;;  %s37_s10 = ssub.s32 %s2803_s24, %s4284_s29 }
  0x1a   : > { %s4079_s9 = scalar_select %p2924_p7, 1, 0 }
  0x1b   : > { %p147_p9 = scmp.eq.s32.totalorder %s2210_s26, 5  ;;  %s39_s11 = sor.u32 %s38_s5, %s37_s10 }
  0x1c   : > { %p134_p10 = scmp.eq.s32.totalorder %s37_s10, 0  ;;  %p40_p11 = scmp.eq.s32.totalorder %s39_s11, 0 }
  0x1d   : > { %p2932_p12 = por %p147_p9, %p146_p8  ;;  %p152_p13 = scmp.ne.s32.totalorder %s2771_s16, %s2767_s15 }
  0x1e   : > { %s2937_s13 = scalar_select %p134_p10, %s2775_s17, %s136_s8  }
  0x1f   : > { %s4080_s12 = scalar_select %p2932_p12, 1, 0 }
  0x20   : > { %4081 = sst [smem:[#allocation16_spill]] %s2937_s13  ;;  %p153_p0 = scmp.eq.s32.totalorder %s2211_s27, 5 }
  0x21   : > { %s2940_s14 = scalar_select %p40_p11, %s2787_s20, %s42_s30  }
  0x22   : > { %p2212_p1 = scmp.ge.s32.totalorder %s2807_s25, 1  ;;  %p160_p2 = scmp.lt.s32.totalorder %s2807_s25, 7 }
  0x23   : > { %4082 = sst [smem:[#allocation17_spill]] %s2940_s14  ;;  %p2946_p4 = por %p153_p0, %p152_p13 }
  0x24   : > { %p2950_p5 = pnand %p2212_p1, %p160_p2  ;;  %s2809_s5 = smov [#allocation6]  }
  0x25   : > { %s4083_s18 = scalar_select %p2946_p4, 1, 0 }
  0x26   : > { %s4084_s26 = scalar_select %p2950_p5, 1, 0 }
  0x27   : > { %s172_s10 = sshll.u32 %s2809_s5, 4  ;;  %p2517_p8 = pneg %p2950_p5  ;;  %s173_s10 = int_to_ptr.vmem [resolvable:$true] %s172_s10 }
  0x28   : > { %s4086_s2 = sld [smem:[#allocation92_spill]] }
  0x29   : > { %p2958_p9 = pnand %p2517_p8, %p2915_p6 }
  0x2b   : > { %p2627_p11 = pneg %p2958_p9 }
  0x2e   : > { %s2625_s11 = scalar_lea.hbm %s4086_s2, 16384 }
  0x2f   : > { %p2626_p10 = scmp.ne.s32.totalorder %s4086_s2, %s2625_s11  ;;  %p2632_p1 = scmp.lt.u32.totalorder %s2625_s11, %s4086_s2 }
  0x31   : > { %p2628_p13 = pnand %p2627_p11, %p2626_p10 }
  0x33   : > { %p2629_p0 = pneg %p2628_p13 }
  0x35   : > { %p2634_p2 = pnand %p2632_p1, %p2629_p0 }
  0x37   : > { %2637 = shalt.err (!%p2634_p2)
}
  0x38   : > { %s2638_s13 = scalar_lea.vmem %s173_s10, 16384  ;;  %p2646_p6 = scmp.lt.s32.totalorder %s173_s10, %s173_s10 }
  0x39   : > { %p2639_p8 = scmp.ne.s32.totalorder %s173_s10, %s2638_s13  ;;  %p2647_p7 = scmp.lt.s32.totalorder %s2638_s13, %s2638_s13 }
  0x3b   : > { %p2641_p4 = pnand %p2639_p8, %p2627_p11  ;;  %p2648_p5 = por %p2647_p7, %p2646_p6 }
  0x3d   : > { %p2642_p12 = pneg %p2641_p4 }
  0x3f   : > { %p2649_p3 = pnand %p2648_p5, %p2642_p12 }
  0x41   : > { %2652 = shalt.err (!%p2649_p3)
}
  0x42   : > { %s2810_s28 = smov 128   ;;  %s2811_s29 = smov 8  }
  0x43   : > { %2520 = dma.hbm_to_vmem [thread:$0]  (!%p2958_p9), %s4086_s2, 16384, %s173_s10, [#allocation7], %s2810_s28, %s2810_s28, %s2811_s29  }
  0x44   : > { %p2214_p10 = scmp.ge.s32.totalorder %s2807_s25, 6 }
  0x45   : > { %p4087_p13 = scmp.ne.s32.totalorder (!%p2214_p10), %s4076_s6, 0 }
  0x46   : > { %185 = sbr.rel (%p2214_p10) target bundleno = 116 (0x74), region = 24 }
  0x4d   : > { %188 = sbr.rel (!%p4087_p13) target bundleno = 116 (0x74), region = 28  ;;  %s189_s13 = sand.u32 (%p4087_p13), 1, %s2787_s20  }
  0x4e   : > { %s2216_s14 = sshll.u32 (%p4087_p13), %s2803_s24, 3  ;;  %s2215_s11 = sshll.u32 (%p4087_p13), %s189_s13, 9 }
  0x4f   : > { %s195_s5 = ssub.s32 (%p4087_p13), 10, %s2216_s14  ;;  %s2986_s27 = scalar_lea.sflag (%p4087_p13), [#allocation4], %s189_s13 }
  0x50   : > { %p196_p3 = scmp.lt.s32.totalorder (%p4087_p13), %s195_s5, 8  ;;  %s193_s10 = scalar_lea.vmem (%p4087_p13), [#allocation3], %s2215_s11 }
  0x54   : > { %s4286_s5 = smov (!%p196_p3, %s195_s5), 8 }
  0x55   : > { %s2983_s17 = sshll.u32 %s4286_s5, 10 }
  0x56   : > { %s201_s30 = ssub.s32 8192, %s2983_s17 }
  0x57   : > { %202 = vsyncadd %s2986_s27, %s201_s30  ;;  %p2219_p6 = scmp.ne.s32.totalorder %s2983_s17, 0  ;;  %s2220_s6 = sshll.u32 %s2799_s23, 3 }
  0x58   : > { %s2509_s28 = smul.u32 192, %s2803_s24  ;;  %s210_s29 = sshll.u32 %s193_s10, 4  ;;  %s2992_s29 = int_to_ptr.vmem [resolvable:$true] %s210_s29 }
  0x59   : > { %s2657_s24 = scalar_lea.hbm %s4014_s0, 30720 }
  0x5a   : > { %s206_s8 = sadd.s32 %s2509_s28, %s2220_s6 }
  0x5b   : > { %s2222_s14 = sshll.u32 %s206_s8, 7 }
  0x5c   : > { %s2997_s13 = scalar_lea.hbm %s4014_s0, %s2222_s14 }
  0x5d   : > { %s2653_s11 = scalar_lea.hbm %s2997_s13, %s2983_s17  ;;  %p2658_p5 = scmp.lt.u32.totalorder %s2997_s13, %s4014_s0 }
  0x5e   : > { %p2654_p7 = scmp.ne.s32.totalorder %s2997_s13, %s2653_s11  ;;  %p2659_p9 = scmp.lt.u32.totalorder %s2657_s24, %s2653_s11 }
  0x5f   : > { %p2661_p0 = scmp.lt.u32.totalorder %s2653_s11, %s2997_s13 }
  0x60   : > { %p2655_p12 = pnand %p2654_p7, %p2219_p6  ;;  %p2660_p11 = por %p2659_p9, %p2658_p5 }
  0x62   : > { %p2656_p4 = pneg %p2655_p12  ;;  %p2662_p1 = por %p2661_p0, %p2660_p11 }
  0x64   : > { %p2663_p2 = pnand %p2662_p1, %p2656_p4 }
  0x66   : > { %2666 = shalt.err (!%p2663_p2)
}
  0x67   : > { %s2667_s2 = scalar_lea.vmem %s2992_s29, %s2983_s17  ;;  %s2812_s8 = smov [#allocation3]  }
  0x68   : > { %p2668_p8 = scmp.ne.s32.totalorder %s2992_s29, %s2667_s2  ;;  %s2671_s14 = sshll.u32 %s2812_s8, 4  ;;  %s2672_s14 = int_to_ptr.vmem [resolvable:$false] %s2671_s14 }
  0x69   : > { %s2673_s5 = scalar_lea.vmem %s2672_s14, 16384  ;;  %p2674_p3 = scmp.lt.s32.totalorder %s2992_s29, %s2672_s14 }
  0x6a   : > { %p2669_p10 = pnand %p2668_p8, %p2219_p6  ;;  %p2675_p7 = scmp.lt.s32.totalorder %s2673_s5, %s2667_s2 }
  0x6c   : > { %p2670_p13 = pneg %p2669_p10  ;;  %p2676_p12 = por %p2675_p7, %p2674_p3 }
  0x6e   : > { %p2677_p5 = pnand %p2676_p12, %p2670_p13 }
  0x70   : > { %2680 = shalt.err (!%p2677_p5)
}
  0x71   : > { %s2813_s24 = smov 3072   ;;  %s2814_s11 = smov 1024  }
  0x72   : > { %s2815_s30 = smov 64  }
  0x73   : > { %216 = dma.hbm_to_vmem [thread:$0]  (%p2219_p6), %s2997_s13, %s2983_s17, %s2992_s29, %s2986_s27, %s2813_s24, %s2814_s11, %s2815_s30  }
  0x74 PF: > { %p4088_p4 = scmp.ne.s32.totalorder %s4084_s26, 0 }
  0x75   : > { %s231_s10 = sand.u32 (!%p4088_p4), 1, %s2783_s19   ;;  %p4089_p9 = scmp.ne.s32.totalorder (!%p4088_p4), %s4079_s9, 0 }
  0x76   : > { %229 = sbr.rel (%p4088_p4) target bundleno = 727 (0x2d7), region = 36  ;;  %s2226_s6 = sshll.u32 (!%p4088_p4), %s231_s10, 9 }
  0x77   : > { %s232_s28 = scalar_lea.sflag (!%p4088_p4), [#allocation4], %s231_s10  ;;  %s3027_s2 = scalar_lea.vmem (!%p4088_p4), [#allocation3], %s2226_s6 }
  0x7d   : > { %2754 = dma.done.wait (%p4089_p9), %s232_s28, 8192  }
  0x7e   : > { %2756 = vsyncadd (%p4089_p9), %s232_s28, 4294959104  ;;  %p4090_p11 = scmp.ne.s32.totalorder %s4077_s7, 0 }
  0x80   : > { %2758 = dma.done.wait (%p4090_p11), [#allocation7], 16384  }
  0x81   : > { %2760 = vsyncadd (%p4090_p11), [#allocation7], 4294950912  ;;  %s265_s17 = sand.u32 1, %s2771_s16   ;;  %p274_p6 = scmp.lt.s32.totalorder %s2795_s22, 1 }
  0x82   : > { %s3041_s26 = sshll.u32 %s265_s17, 3  ;;  %p2230_p0 = scmp.ne.s32.totalorder %s2791_s21, 0 }
  0x83   : > { %s275_s27 = scalar_select %p274_p6, %s2795_s22, 1 }
  0x84   : > { %s267_s14 = scalar_lea.vmem [#allocation8], %s3041_s26  ;;  %281 = sbr.rel (%p2230_p0) target bundleno = 165 (0xa5), region = 48  ;;  %v2816_v0 = vmov (!%p2230_p0), 0.0  }
  0x85   : > { %s2229_s29 = sshll.u32 %s275_s27, 3  ;;  %282 = vst [vmem:[#allocation2] sm:$0xff] (!%p2230_p0), %v2816_v0  ;;  %283 = vst [vmem:[#allocation2 + $0x8] sm:$0xff] (!%p2230_p0), %v2816_v0 }
  0x86   : > { %s3047_s8 = scalar_lea.vmem %s4015_s1, %s2229_s29  ;;  %284 = vst [vmem:[#allocation2 + $0x10] sm:$0xff] (!%p2230_p0), %v2816_v0  ;;  %285 = vst [vmem:[#allocation2 + $0x18] sm:$0xff] (!%p2230_p0), %v2816_v0 }
  0x87   : > { %286 = vst [vmem:[#allocation2 + $0x20] sm:$0xff] (!%p2230_p0), %v2816_v0  ;;  %287 = vst [vmem:[#allocation2 + $0x28] sm:$0xff] (!%p2230_p0), %v2816_v0 }
  0x88   : > { %288 = vst [vmem:[#allocation2 + $0x30] sm:$0xff] (!%p2230_p0), %v2816_v0  ;;  %289 = vst [vmem:[#allocation2 + $0x38] sm:$0xff] (!%p2230_p0), %v2816_v0 }
  0x89   : > { %290 = vst [vmem:[#allocation2 + $0x40] sm:$0xff] (!%p2230_p0), %v2816_v0  ;;  %291 = vst [vmem:[#allocation2 + $0x48] sm:$0xff] (!%p2230_p0), %v2816_v0 }
  0x8a   : > { %292 = vst [vmem:[#allocation2 + $0x50] sm:$0xff] (!%p2230_p0), %v2816_v0  ;;  %293 = vst [vmem:[#allocation2 + $0x58] sm:$0xff] (!%p2230_p0), %v2816_v0 }
  0x8b   : > { %294 = vst [vmem:[#allocation2 + $0x60] sm:$0xff] %v2816_v0  ;;  %295 = vst [vmem:[#allocation2 + $0x68] sm:$0xff] %v2816_v0 }
  0x8c   : > { %296 = vst [vmem:[#allocation2 + $0x70] sm:$0xff] %v2816_v0  ;;  %297 = vst [vmem:[#allocation2 + $0x78] sm:$0xff] %v2816_v0 }
  0x8d   : > { %298 = vst [vmem:[#allocation2 + $0x80] sm:$0xff] %v2816_v0  ;;  %299 = vst [vmem:[#allocation2 + $0x88] sm:$0xff] %v2816_v0 }
  0x8e   : > { %300 = vst [vmem:[#allocation2 + $0x90] sm:$0xff] %v2816_v0  ;;  %301 = vst [vmem:[#allocation2 + $0x98] sm:$0xff] %v2816_v0 }
  0x8f   : > { %302 = vst [vmem:[#allocation2 + $0xa0] sm:$0xff] %v2816_v0  ;;  %303 = vst [vmem:[#allocation2 + $0xa8] sm:$0xff] %v2816_v0 }
  0x90   : > { %304 = vst [vmem:[#allocation2 + $0xb0] sm:$0xff] %v2816_v0  ;;  %305 = vst [vmem:[#allocation2 + $0xb8] sm:$0xff] %v2816_v0 }
  0x91   : > { %306 = vst [vmem:[#allocation2 + $0xc0] sm:$0xff] %v2816_v0  ;;  %307 = vst [vmem:[#allocation2 + $0xc8] sm:$0xff] %v2816_v0 }
  0x92   : > { %308 = vst [vmem:[#allocation2 + $0xd0] sm:$0xff] %v2816_v0  ;;  %309 = vst [vmem:[#allocation2 + $0xd8] sm:$0xff] %v2816_v0 }
  0x93   : > { %310 = vst [vmem:[#allocation2 + $0xe0] sm:$0xff] %v2816_v0  ;;  %311 = vst [vmem:[#allocation2 + $0xe8] sm:$0xff] %v2816_v0 }
  0x94   : > { %312 = vst [vmem:[#allocation2 + $0xf0] sm:$0xff] %v2816_v0  ;;  %313 = vst [vmem:[#allocation2 + $0xf8] sm:$0xff] %v2816_v0 }
  0x95   : > { %314 = vst [vmem:[#allocation2 + $0x100] sm:$0xff] %v2816_v0  ;;  %315 = vst [vmem:[#allocation2 + $0x108] sm:$0xff] %v2816_v0 }
  0x96   : > { %316 = vst [vmem:[#allocation2 + $0x110] sm:$0xff] %v2816_v0  ;;  %317 = vst [vmem:[#allocation2 + $0x118] sm:$0xff] %v2816_v0 }
  0x97   : > { %318 = vst [vmem:[#allocation2 + $0x120] sm:$0xff] %v2816_v0  ;;  %319 = vst [vmem:[#allocation2 + $0x128] sm:$0xff] %v2816_v0 }
  0x98   : > { %320 = vst [vmem:[#allocation2 + $0x130] sm:$0xff] %v2816_v0  ;;  %321 = vst [vmem:[#allocation2 + $0x138] sm:$0xff] %v2816_v0 }
  0x99   : > { %322 = vst [vmem:[#allocation2 + $0x140] sm:$0xff] %v2816_v0  ;;  %323 = vst [vmem:[#allocation2 + $0x148] sm:$0xff] %v2816_v0 }
  0x9a   : > { %324 = vst [vmem:[#allocation2 + $0x150] sm:$0xff] %v2816_v0  ;;  %325 = vst [vmem:[#allocation2 + $0x158] sm:$0xff] %v2816_v0 }
  0x9b   : > { %326 = vst [vmem:[#allocation2 + $0x160] sm:$0xff] %v2816_v0  ;;  %327 = vst [vmem:[#allocation2 + $0x168] sm:$0xff] %v2816_v0 }
  0x9c   : > { %328 = vst [vmem:[#allocation2 + $0x170] sm:$0xff] %v2816_v0  ;;  %329 = vst [vmem:[#allocation2 + $0x178] sm:$0xff] %v2816_v0 }
  0x9d   : > { %330 = vst [vmem:[#allocation2 + $0x180] sm:$0xff] %v2816_v0  ;;  %331 = vst [vmem:[#allocation2 + $0x188] sm:$0xff] %v2816_v0 }
  0x9e   : > { %332 = vst [vmem:[#allocation2 + $0x190] sm:$0xff] %v2816_v0  ;;  %333 = vst [vmem:[#allocation2 + $0x198] sm:$0xff] %v2816_v0 }
  0x9f   : > { %334 = vst [vmem:[#allocation2 + $0x1a0] sm:$0xff] %v2816_v0  ;;  %335 = vst [vmem:[#allocation2 + $0x1a8] sm:$0xff] %v2816_v0 }
  0xa0   : > { %336 = vst [vmem:[#allocation2 + $0x1b0] sm:$0xff] %v2816_v0  ;;  %337 = vst [vmem:[#allocation2 + $0x1b8] sm:$0xff] %v2816_v0 }
  0xa1   : > { %338 = vst [vmem:[#allocation2 + $0x1c0] sm:$0xff] %v2816_v0  ;;  %339 = vst [vmem:[#allocation2 + $0x1c8] sm:$0xff] %v2816_v0 }
  0xa2   : > { %340 = vst [vmem:[#allocation2 + $0x1d0] sm:$0xff] %v2816_v0  ;;  %341 = vst [vmem:[#allocation2 + $0x1d8] sm:$0xff] %v2816_v0 }
  0xa3   : > { %342 = vst [vmem:[#allocation2 + $0x1e0] sm:$0xff] %v2816_v0  ;;  %343 = vst [vmem:[#allocation2 + $0x1e8] sm:$0xff] %v2816_v0 }
  0xa4   : > { %344 = vst [vmem:[#allocation2 + $0x1f0] sm:$0xff] %v2816_v0  ;;  %345 = vst [vmem:[#allocation2 + $0x1f8] sm:$0xff] %v2816_v0 }
  0xa5 PF: > { %s2231_s7 = sshll.u32 %s2791_s21, 3 }
  0xa6   : > { %s3116_s5 = ssub.s32 20, %s2231_s7 }
  0xa7   : > { %p2232_p1 = scmp.lt.s32.totalorder %s3116_s5, 8 }
  0xa8   : > { %v355_v1 = vld [vmem:[%s3027_s2] sm:$0xff] (!%p2232_p1)  ;;  %v356_v3 = vld [vmem:[%s3027_s2 + $0x8] sm:$0xff] (!%p2232_p1)  ;;  %v357_v6 = vld [vmem:[%s3027_s2 + $0x10] sm:$0xff] (!%p2232_p1) }
  0xa9   : > { %351 = sbr.rel (%p2232_p1) target bundleno = 221 (0xdd), region = 52  ;;  %v419_v2 = vld [vmem:[#allocation2] sm:$0xff] (!%p2232_p1)  ;;  %v420_v5 = vld [vmem:[#allocation2 + $0x8] sm:$0xff] (!%p2232_p1)  ;;  %v421_v7 = vld [vmem:[#allocation2 + $0x10] sm:$0xff] (!%p2232_p1) }
  0xaa   : > { %v483_v4 = vadd.f32 (!%p2232_p1), %v419_v2, %v355_v1  ;;  %v484_v8 = vadd.f32 (!%p2232_p1), %v420_v5, %v356_v3  ;;  %v485_v9 = vadd.f32 (!%p2232_p1), %v421_v7, %v357_v6  ;;  %v358_v10 = vld [vmem:[%s3027_s2 + $0x18] sm:$0xff] (!%p2232_p1)  ;;  %v359_v12 = vld [vmem:[%s3027_s2 + $0x20] sm:$0xff] (!%p2232_p1)  ;;  %v360_v15 = vld [vmem:[%s3027_s2 + $0x28] sm:$0xff] (!%p2232_p1) }
  0xab   : > { %v422_v11 = vld [vmem:[#allocation2 + $0x18] sm:$0xff] (!%p2232_p1)  ;;  %v423_v14 = vld [vmem:[#allocation2 + $0x20] sm:$0xff] (!%p2232_p1)  ;;  %v424_v16 = vld [vmem:[#allocation2 + $0x28] sm:$0xff] (!%p2232_p1) }
  0xac   : > { %547 = vst [vmem:[#allocation2] sm:$0xff] (!%p2232_p1), %v483_v4  ;;  %v486_v13 = vadd.f32 (!%p2232_p1), %v422_v11, %v358_v10  ;;  %548 = vst [vmem:[#allocation2 + $0x8] sm:$0xff] (!%p2232_p1), %v484_v8  ;;  %v487_v17 = vadd.f32 (!%p2232_p1), %v423_v14, %v359_v12  ;;  %v488_v18 = vadd.f32 (!%p2232_p1), %v424_v16, %v360_v15  ;;  %v361_v19 = vld [vmem:[%s3027_s2 + $0x30] sm:$0xff] (!%p2232_p1)  ;;  %v362_v21 = vld [vmem:[%s3027_s2 + $0x38] sm:$0xff] (!%p2232_p1) }
  0xad   : > { %549 = vst [vmem:[#allocation2 + $0x10] sm:$0xff] (!%p2232_p1), %v485_v9  ;;  %v425_v20 = vld [vmem:[#allocation2 + $0x30] sm:$0xff] (!%p2232_p1)  ;;  %v426_v23 = vld [vmem:[#allocation2 + $0x38] sm:$0xff] (!%p2232_p1)  ;;  %v363_v24 = vld [vmem:[%s3027_s2 + $0x40] sm:$0xff] (!%p2232_p1) }
  0xae   : > { %550 = vst [vmem:[#allocation2 + $0x18] sm:$0xff] (!%p2232_p1), %v486_v13  ;;  %v489_v22 = vadd.f32 (!%p2232_p1), %v425_v20, %v361_v19  ;;  %v427_v25 = vld [vmem:[#allocation2 + $0x40] sm:$0xff] (!%p2232_p1)  ;;  %551 = vst [vmem:[#allocation2 + $0x20] sm:$0xff] (!%p2232_p1), %v487_v17  ;;  %v490_v26 = vadd.f32 (!%p2232_p1), %v426_v23, %v362_v21  ;;  %v364_v28 = vld [vmem:[%s3027_s2 + $0x48] sm:$0xff] (!%p2232_p1) }
  0xaf   : > { %552 = vst [vmem:[#allocation2 + $0x28] sm:$0xff] (!%p2232_p1), %v488_v18  ;;  %v491_v27 = vadd.f32 (!%p2232_p1), %v427_v25, %v363_v24  ;;  %v428_v29 = vld [vmem:[#allocation2 + $0x48] sm:$0xff] (!%p2232_p1)  ;;  %v365_v30 = vld [vmem:[%s3027_s2 + $0x50] sm:$0xff] (!%p2232_p1)  ;;  %v366_v33 = vld [vmem:[%s3027_s2 + $0x58] sm:$0xff] (!%p2232_p1) }
  0xb0   : > { %553 = vst [vmem:[#allocation2 + $0x30] sm:$0xff] %v489_v22  ;;  %v492_v31 = vadd.f32 %v428_v29, %v364_v28  ;;  %v429_v32 = vld [vmem:[#allocation2 + $0x50] sm:$0xff]  ;;  %v430_v34 = vld [vmem:[#allocation2 + $0x58] sm:$0xff]  ;;  %554 = vst [vmem:[#allocation2 + $0x38] sm:$0xff] %v490_v26 }
  0xb1   : > { %555 = vst [vmem:[#allocation2 + $0x40] sm:$0xff] %v491_v27  ;;  %v493_v35 = vadd.f32 %v429_v32, %v365_v30  ;;  %v494_v36 = vadd.f32 %v430_v34, %v366_v33  ;;  %v367_v37 = vld [vmem:[%s3027_s2 + $0x60] sm:$0xff]  ;;  %v368_v39 = vld [vmem:[%s3027_s2 + $0x68] sm:$0xff]  ;;  %v369_v42 = vld [vmem:[%s3027_s2 + $0x70] sm:$0xff] }
  0xb2   : > { %v431_v38 = vld [vmem:[#allocation2 + $0x60] sm:$0xff]  ;;  %556 = vst [vmem:[#allocation2 + $0x48] sm:$0xff] %v492_v31  ;;  %v432_v41 = vld [vmem:[#allocation2 + $0x68] sm:$0xff]  ;;  %v433_v43 = vld [vmem:[#allocation2 + $0x70] sm:$0xff] }
  0xb3   : > { %v495_v40 = vadd.f32 %v431_v38, %v367_v37  ;;  %557 = vst [vmem:[#allocation2 + $0x50] sm:$0xff] %v493_v35  ;;  %558 = vst [vmem:[#allocation2 + $0x58] sm:$0xff] %v494_v36  ;;  %v496_v44 = vadd.f32 %v432_v41, %v368_v39  ;;  %v497_v45 = vadd.f32 %v433_v43, %v369_v42  ;;  %v370_v46 = vld [vmem:[%s3027_s2 + $0x78] sm:$0xff]  ;;  %v371_v48 = vld [vmem:[%s3027_s2 + $0x80] sm:$0xff] }
  0xb4   : > { %v434_v47 = vld [vmem:[#allocation2 + $0x78] sm:$0xff]  ;;  %v435_v50 = vld [vmem:[#allocation2 + $0x80] sm:$0xff]  ;;  %v372_v51 = vld [vmem:[%s3027_s2 + $0x88] sm:$0xff] }
  0xb5   : > { %559 = vst [vmem:[#allocation2 + $0x60] sm:$0xff] %v495_v40  ;;  %v498_v49 = vadd.f32 %v434_v47, %v370_v46  ;;  %v436_v52 = vld [vmem:[#allocation2 + $0x88] sm:$0xff]  ;;  %560 = vst [vmem:[#allocation2 + $0x68] sm:$0xff] %v496_v44  ;;  %v499_v53 = vadd.f32 %v435_v50, %v371_v48  ;;  %v373_v55 = vld [vmem:[%s3027_s2 + $0x90] sm:$0xff] }
  0xb6   : > { %561 = vst [vmem:[#allocation2 + $0x70] sm:$0xff] %v497_v45  ;;  %v500_v54 = vadd.f32 %v436_v52, %v372_v51  ;;  %v437_v56 = vld [vmem:[#allocation2 + $0x90] sm:$0xff]  ;;  %v374_v57 = vld [vmem:[%s3027_s2 + $0x98] sm:$0xff]  ;;  %v375_v60 = vld [vmem:[%s3027_s2 + $0xa0] sm:$0xff] }
  0xb7   : > { %562 = vst [vmem:[#allocation2 + $0x78] sm:$0xff] %v498_v49  ;;  %v501_v58 = vadd.f32 %v437_v56, %v373_v55  ;;  %v438_v59 = vld [vmem:[#allocation2 + $0x98] sm:$0xff]  ;;  %v439_v61 = vld [vmem:[#allocation2 + $0xa0] sm:$0xff]  ;;  %563 = vst [vmem:[#allocation2 + $0x80] sm:$0xff] %v499_v53 }
  0xb8   : > { %564 = vst [vmem:[#allocation2 + $0x88] sm:$0xff] %v500_v54  ;;  %v502_v62 = vadd.f32 %v438_v59, %v374_v57  ;;  %v503_v63 = vadd.f32 %v439_v61, %v375_v60  ;;  %v376_v0 = vld [vmem:[%s3027_s2 + $0xa8] sm:$0xff]  ;;  %v377_v2 = vld [vmem:[%s3027_s2 + $0xb0] sm:$0xff]  ;;  %v378_v5 = vld [vmem:[%s3027_s2 + $0xb8] sm:$0xff] }
  0xb9   : > { %v440_v1 = vld [vmem:[#allocation2 + $0xa8] sm:$0xff]  ;;  %565 = vst [vmem:[#allocation2 + $0x90] sm:$0xff] %v501_v58  ;;  %v441_v4 = vld [vmem:[#allocation2 + $0xb0] sm:$0xff]  ;;  %v442_v6 = vld [vmem:[#allocation2 + $0xb8] sm:$0xff] }
  0xba   : > { %v504_v3 = vadd.f32 %v440_v1, %v376_v0  ;;  %566 = vst [vmem:[#allocation2 + $0x98] sm:$0xff] %v502_v62  ;;  %567 = vst [vmem:[#allocation2 + $0xa0] sm:$0xff] %v503_v63  ;;  %v505_v7 = vadd.f32 %v441_v4, %v377_v2  ;;  %v506_v8 = vadd.f32 %v442_v6, %v378_v5  ;;  %v379_v9 = vld [vmem:[%s3027_s2 + $0xc0] sm:$0xff]  ;;  %v380_v11 = vld [vmem:[%s3027_s2 + $0xc8] sm:$0xff] }
  0xbb   : > { %v443_v10 = vld [vmem:[#allocation2 + $0xc0] sm:$0xff]  ;;  %v444_v13 = vld [vmem:[#allocation2 + $0xc8] sm:$0xff]  ;;  %v381_v14 = vld [vmem:[%s3027_s2 + $0xd0] sm:$0xff] }
  0xbc   : > { %568 = vst [vmem:[#allocation2 + $0xa8] sm:$0xff] %v504_v3  ;;  %v507_v12 = vadd.f32 %v443_v10, %v379_v9  ;;  %v445_v15 = vld [vmem:[#allocation2 + $0xd0] sm:$0xff]  ;;  %569 = vst [vmem:[#allocation2 + $0xb0] sm:$0xff] %v505_v7  ;;  %v508_v16 = vadd.f32 %v444_v13, %v380_v11  ;;  %v382_v18 = vld [vmem:[%s3027_s2 + $0xd8] sm:$0xff] }
  0xbd   : > { %570 = vst [vmem:[#allocation2 + $0xb8] sm:$0xff] %v506_v8  ;;  %v509_v17 = vadd.f32 %v445_v15, %v381_v14  ;;  %v446_v19 = vld [vmem:[#allocation2 + $0xd8] sm:$0xff]  ;;  %v383_v20 = vld [vmem:[%s3027_s2 + $0xe0] sm:$0xff]  ;;  %v384_v23 = vld [vmem:[%s3027_s2 + $0xe8] sm:$0xff] }
  0xbe   : > { %571 = vst [vmem:[#allocation2 + $0xc0] sm:$0xff] %v507_v12  ;;  %v510_v21 = vadd.f32 %v446_v19, %v382_v18  ;;  %v447_v22 = vld [vmem:[#allocation2 + $0xe0] sm:$0xff]  ;;  %v448_v24 = vld [vmem:[#allocation2 + $0xe8] sm:$0xff]  ;;  %572 = vst [vmem:[#allocation2 + $0xc8] sm:$0xff] %v508_v16 }
  0xbf   : > { %573 = vst [vmem:[#allocation2 + $0xd0] sm:$0xff] %v509_v17  ;;  %v511_v25 = vadd.f32 %v447_v22, %v383_v20  ;;  %v512_v26 = vadd.f32 %v448_v24, %v384_v23  ;;  %v385_v27 = vld [vmem:[%s3027_s2 + $0xf0] sm:$0xff]  ;;  %v386_v29 = vld [vmem:[%s3027_s2 + $0xf8] sm:$0xff]  ;;  %v387_v32 = vld [vmem:[%s3027_s2 + $0x100] sm:$0xff] }
  0xc0   : > { %v449_v28 = vld [vmem:[#allocation2 + $0xf0] sm:$0xff]  ;;  %574 = vst [vmem:[#allocation2 + $0xd8] sm:$0xff] %v510_v21  ;;  %v450_v31 = vld [vmem:[#allocation2 + $0xf8] sm:$0xff]  ;;  %v451_v33 = vld [vmem:[#allocation2 + $0x100] sm:$0xff] }
  0xc1   : > { %v513_v30 = vadd.f32 %v449_v28, %v385_v27  ;;  %575 = vst [vmem:[#allocation2 + $0xe0] sm:$0xff] %v511_v25  ;;  %576 = vst [vmem:[#allocation2 + $0xe8] sm:$0xff] %v512_v26  ;;  %v514_v34 = vadd.f32 %v450_v31, %v386_v29  ;;  %v515_v35 = vadd.f32 %v451_v33, %v387_v32  ;;  %v388_v36 = vld [vmem:[%s3027_s2 + $0x108] sm:$0xff]  ;;  %v389_v38 = vld [vmem:[%s3027_s2 + $0x110] sm:$0xff] }
  0xc2   : > { %v452_v37 = vld [vmem:[#allocation2 + $0x108] sm:$0xff]  ;;  %v453_v40 = vld [vmem:[#allocation2 + $0x110] sm:$0xff]  ;;  %v390_v41 = vld [vmem:[%s3027_s2 + $0x118] sm:$0xff] }
  0xc3   : > { %577 = vst [vmem:[#allocation2 + $0xf0] sm:$0xff] %v513_v30  ;;  %v516_v39 = vadd.f32 %v452_v37, %v388_v36  ;;  %v454_v42 = vld [vmem:[#allocation2 + $0x118] sm:$0xff]  ;;  %578 = vst [vmem:[#allocation2 + $0xf8] sm:$0xff] %v514_v34  ;;  %v517_v43 = vadd.f32 %v453_v40, %v389_v38  ;;  %v391_v45 = vld [vmem:[%s3027_s2 + $0x120] sm:$0xff] }
  0xc4   : > { %579 = vst [vmem:[#allocation2 + $0x100] sm:$0xff] %v515_v35  ;;  %v518_v44 = vadd.f32 %v454_v42, %v390_v41  ;;  %v455_v46 = vld [vmem:[#allocation2 + $0x120] sm:$0xff]  ;;  %v392_v47 = vld [vmem:[%s3027_s2 + $0x128] sm:$0xff]  ;;  %v393_v50 = vld [vmem:[%s3027_s2 + $0x130] sm:$0xff] }
  0xc5   : > { %580 = vst [vmem:[#allocation2 + $0x108] sm:$0xff] %v516_v39  ;;  %v519_v48 = vadd.f32 %v455_v46, %v391_v45  ;;  %v456_v49 = vld [vmem:[#allocation2 + $0x128] sm:$0xff]  ;;  %v457_v51 = vld [vmem:[#allocation2 + $0x130] sm:$0xff]  ;;  %581 = vst [vmem:[#allocation2 + $0x110] sm:$0xff] %v517_v43 }
  0xc6   : > { %582 = vst [vmem:[#allocation2 + $0x118] sm:$0xff] %v518_v44  ;;  %v520_v52 = vadd.f32 %v456_v49, %v392_v47  ;;  %v521_v53 = vadd.f32 %v457_v51, %v393_v50  ;;  %v394_v54 = vld [vmem:[%s3027_s2 + $0x138] sm:$0xff]  ;;  %v395_v56 = vld [vmem:[%s3027_s2 + $0x140] sm:$0xff]  ;;  %v396_v59 = vld [vmem:[%s3027_s2 + $0x148] sm:$0xff] }
  0xc7   : > { %v458_v55 = vld [vmem:[#allocation2 + $0x138] sm:$0xff]  ;;  %583 = vst [vmem:[#allocation2 + $0x120] sm:$0xff] %v519_v48  ;;  %v459_v58 = vld [vmem:[#allocation2 + $0x140] sm:$0xff]  ;;  %v460_v60 = vld [vmem:[#allocation2 + $0x148] sm:$0xff] }
  0xc8   : > { %v522_v57 = vadd.f32 %v458_v55, %v394_v54  ;;  %584 = vst [vmem:[#allocation2 + $0x128] sm:$0xff] %v520_v52  ;;  %585 = vst [vmem:[#allocation2 + $0x130] sm:$0xff] %v521_v53  ;;  %v523_v61 = vadd.f32 %v459_v58, %v395_v56  ;;  %v524_v62 = vadd.f32 %v460_v60, %v396_v59  ;;  %v397_v63 = vld [vmem:[%s3027_s2 + $0x150] sm:$0xff]  ;;  %v398_v1 = vld [vmem:[%s3027_s2 + $0x158] sm:$0xff] }
  0xc9   : > { %v461_v0 = vld [vmem:[#allocation2 + $0x150] sm:$0xff]  ;;  %v462_v3 = vld [vmem:[#allocation2 + $0x158] sm:$0xff]  ;;  %v399_v4 = vld [vmem:[%s3027_s2 + $0x160] sm:$0xff] }
  0xca   : > { %586 = vst [vmem:[#allocation2 + $0x138] sm:$0xff] %v522_v57  ;;  %v525_v2 = vadd.f32 %v461_v0, %v397_v63  ;;  %v463_v5 = vld [vmem:[#allocation2 + $0x160] sm:$0xff]  ;;  %587 = vst [vmem:[#allocation2 + $0x140] sm:$0xff] %v523_v61  ;;  %v526_v6 = vadd.f32 %v462_v3, %v398_v1  ;;  %v400_v8 = vld [vmem:[%s3027_s2 + $0x168] sm:$0xff] }
  0xcb   : > { %588 = vst [vmem:[#allocation2 + $0x148] sm:$0xff] %v524_v62  ;;  %v527_v7 = vadd.f32 %v463_v5, %v399_v4  ;;  %v464_v9 = vld [vmem:[#allocation2 + $0x168] sm:$0xff]  ;;  %v401_v10 = vld [vmem:[%s3027_s2 + $0x170] sm:$0xff]  ;;  %v402_v13 = vld [vmem:[%s3027_s2 + $0x178] sm:$0xff] }
  0xcc   : > { %589 = vst [vmem:[#allocation2 + $0x150] sm:$0xff] %v525_v2  ;;  %v528_v11 = vadd.f32 %v464_v9, %v400_v8  ;;  %v465_v12 = vld [vmem:[#allocation2 + $0x170] sm:$0xff]  ;;  %v466_v14 = vld [vmem:[#allocation2 + $0x178] sm:$0xff]  ;;  %590 = vst [vmem:[#allocation2 + $0x158] sm:$0xff] %v526_v6 }
  0xcd   : > { %591 = vst [vmem:[#allocation2 + $0x160] sm:$0xff] %v527_v7  ;;  %v529_v15 = vadd.f32 %v465_v12, %v401_v10  ;;  %v530_v16 = vadd.f32 %v466_v14, %v402_v13  ;;  %v403_v17 = vld [vmem:[%s3027_s2 + $0x180] sm:$0xff]  ;;  %v404_v19 = vld [vmem:[%s3027_s2 + $0x188] sm:$0xff]  ;;  %v405_v22 = vld [vmem:[%s3027_s2 + $0x190] sm:$0xff] }
  0xce   : > { %v467_v18 = vld [vmem:[#allocation2 + $0x180] sm:$0xff]  ;;  %592 = vst [vmem:[#allocation2 + $0x168] sm:$0xff] %v528_v11  ;;  %v468_v21 = vld [vmem:[#allocation2 + $0x188] sm:$0xff]  ;;  %v469_v23 = vld [vmem:[#allocation2 + $0x190] sm:$0xff] }
  0xcf   : > { %v531_v20 = vadd.f32 %v467_v18, %v403_v17  ;;  %593 = vst [vmem:[#allocation2 + $0x170] sm:$0xff] %v529_v15  ;;  %594 = vst [vmem:[#allocation2 + $0x178] sm:$0xff] %v530_v16  ;;  %v532_v24 = vadd.f32 %v468_v21, %v404_v19  ;;  %v533_v25 = vadd.f32 %v469_v23, %v405_v22  ;;  %v406_v26 = vld [vmem:[%s3027_s2 + $0x198] sm:$0xff]  ;;  %v407_v28 = vld [vmem:[%s3027_s2 + $0x1a0] sm:$0xff] }
  0xd0   : > { %v470_v27 = vld [vmem:[#allocation2 + $0x198] sm:$0xff]  ;;  %v471_v30 = vld [vmem:[#allocation2 + $0x1a0] sm:$0xff]  ;;  %v408_v31 = vld [vmem:[%s3027_s2 + $0x1a8] sm:$0xff] }
  0xd1   : > { %595 = vst [vmem:[#allocation2 + $0x180] sm:$0xff] %v531_v20  ;;  %v534_v29 = vadd.f32 %v470_v27, %v406_v26  ;;  %v472_v32 = vld [vmem:[#allocation2 + $0x1a8] sm:$0xff]  ;;  %596 = vst [vmem:[#allocation2 + $0x188] sm:$0xff] %v532_v24  ;;  %v535_v33 = vadd.f32 %v471_v30, %v407_v28  ;;  %v409_v35 = vld [vmem:[%s3027_s2 + $0x1b0] sm:$0xff] }
  0xd2   : > { %597 = vst [vmem:[#allocation2 + $0x190] sm:$0xff] %v533_v25  ;;  %v536_v34 = vadd.f32 %v472_v32, %v408_v31  ;;  %v473_v36 = vld [vmem:[#allocation2 + $0x1b0] sm:$0xff]  ;;  %v410_v37 = vld [vmem:[%s3027_s2 + $0x1b8] sm:$0xff]  ;;  %v411_v40 = vld [vmem:[%s3027_s2 + $0x1c0] sm:$0xff] }
  0xd3   : > { %598 = vst [vmem:[#allocation2 + $0x198] sm:$0xff] %v534_v29  ;;  %v537_v38 = vadd.f32 %v473_v36, %v409_v35  ;;  %v474_v39 = vld [vmem:[#allocation2 + $0x1b8] sm:$0xff]  ;;  %v475_v41 = vld [vmem:[#allocation2 + $0x1c0] sm:$0xff]  ;;  %599 = vst [vmem:[#allocation2 + $0x1a0] sm:$0xff] %v535_v33 }
  0xd4   : > { %600 = vst [vmem:[#allocation2 + $0x1a8] sm:$0xff] %v536_v34  ;;  %v538_v42 = vadd.f32 %v474_v39, %v410_v37  ;;  %v539_v43 = vadd.f32 %v475_v41, %v411_v40  ;;  %v412_v44 = vld [vmem:[%s3027_s2 + $0x1c8] sm:$0xff]  ;;  %v413_v46 = vld [vmem:[%s3027_s2 + $0x1d0] sm:$0xff]  ;;  %v414_v49 = vld [vmem:[%s3027_s2 + $0x1d8] sm:$0xff] }
  0xd5   : > { %v476_v45 = vld [vmem:[#allocation2 + $0x1c8] sm:$0xff]  ;;  %601 = vst [vmem:[#allocation2 + $0x1b0] sm:$0xff] %v537_v38  ;;  %v477_v48 = vld [vmem:[#allocation2 + $0x1d0] sm:$0xff]  ;;  %v478_v50 = vld [vmem:[#allocation2 + $0x1d8] sm:$0xff] }
  0xd6   : > { %v540_v47 = vadd.f32 %v476_v45, %v412_v44  ;;  %602 = vst [vmem:[#allocation2 + $0x1b8] sm:$0xff] %v538_v42  ;;  %603 = vst [vmem:[#allocation2 + $0x1c0] sm:$0xff] %v539_v43  ;;  %v541_v51 = vadd.f32 %v477_v48, %v413_v46  ;;  %v542_v52 = vadd.f32 %v478_v50, %v414_v49  ;;  %v415_v53 = vld [vmem:[%s3027_s2 + $0x1e0] sm:$0xff]  ;;  %v416_v55 = vld [vmem:[%s3027_s2 + $0x1e8] sm:$0xff] }
  0xd7   : > { %v479_v54 = vld [vmem:[#allocation2 + $0x1e0] sm:$0xff]  ;;  %v480_v57 = vld [vmem:[#allocation2 + $0x1e8] sm:$0xff]  ;;  %v417_v58 = vld [vmem:[%s3027_s2 + $0x1f0] sm:$0xff] }
  0xd8   : > { %604 = vst [vmem:[#allocation2 + $0x1c8] sm:$0xff] %v540_v47  ;;  %v543_v56 = vadd.f32 %v479_v54, %v415_v53  ;;  %v481_v59 = vld [vmem:[#allocation2 + $0x1f0] sm:$0xff]  ;;  %605 = vst [vmem:[#allocation2 + $0x1d0] sm:$0xff] %v541_v51  ;;  %v544_v60 = vadd.f32 %v480_v57, %v416_v55  ;;  %v418_v62 = vld [vmem:[%s3027_s2 + $0x1f8] sm:$0xff] }
  0xd9   : > { %606 = vst [vmem:[#allocation2 + $0x1d8] sm:$0xff] %v542_v52  ;;  %v545_v61 = vadd.f32 %v481_v59, %v417_v58  ;;  %v482_v63 = vld [vmem:[#allocation2 + $0x1f8] sm:$0xff] }
  0xda   : > { %607 = vst [vmem:[#allocation2 + $0x1e0] sm:$0xff] %v543_v56  ;;  %v546_v0 = vadd.f32 %v482_v63, %v418_v62  ;;  %608 = vst [vmem:[#allocation2 + $0x1e8] sm:$0xff] %v544_v60 }
  0xdb   : > { %609 = vst [vmem:[#allocation2 + $0x1f0] sm:$0xff] %v545_v61 }
  0xdc   : > { %610 = vst [vmem:[#allocation2 + $0x1f8] sm:$0xff] %v546_v0 }
  0xdd PF: > { %p2233_p2 = scmp.ge.s32.totalorder %s3116_s5, 8 }
  0xde   : > { %v615_v1 = vlaneseq (!%p2233_p2)  ;;  %v620_v2 = vld [vmem:[%s3027_s2] sm:$0xff] (!%p2233_p2)  ;;  %v621_v3 = vld [vmem:[%s3027_s2 + $0x8] sm:$0xff] (!%p2233_p2)  ;;  %v686_v4 = vstv (!%p2233_p2), %s3116_s5  ;;  %v622_v7 = vld [vmem:[%s3027_s2 + $0x10] sm:$0xff] (!%p2233_p2) }
  0xdf   : > { %614 = sbr.rel (%p2233_p2) target bundleno = 277 (0x115), region = 56  ;;  %v623_v10 = vld [vmem:[%s3027_s2 + $0x18] sm:$0xff] (!%p2233_p2)  ;;  %v624_v12 = vld [vmem:[%s3027_s2 + $0x20] sm:$0xff] (!%p2233_p2)  ;;  %v625_v14 = vld [vmem:[%s3027_s2 + $0x28] sm:$0xff] (!%p2233_p2) }
  0xe0   : > { %v754_v5 = vld [vmem:[#allocation2] sm:$0xff] (!%p2233_p2)  ;;  %v755_v6 = vld [vmem:[#allocation2 + $0x8] sm:$0xff] (!%p2233_p2)  ;;  %v616_v9 = vshrl.u32 (!%p2233_p2), %v615_v1, 7  ;;  %v626_v17 = vld [vmem:[%s3027_s2 + $0x30] sm:$0xff] (!%p2233_p2) }
  0xe1   : > { %v756_v8 = vld [vmem:[#allocation2 + $0x10] sm:$0xff] (!%p2233_p2)  ;;  %v627_v19 = vld [vmem:[%s3027_s2 + $0x38] sm:$0xff] (!%p2233_p2)  ;;  %v628_v25 = vld [vmem:[%s3027_s2 + $0x40] sm:$0xff] (!%p2233_p2) }
  0xe2   : > { %v757_v11 = vld [vmem:[#allocation2 + $0x18] sm:$0xff] (!%p2233_p2)  ;;  %v758_v13 = vld [vmem:[#allocation2 + $0x20] sm:$0xff] (!%p2233_p2)  ;;  %vm3191_vm0 = vcmp.lt.s32.totalorder (!%p2233_p2), %v616_v9, %v686_v4  ;;  %v629_v31 = vld [vmem:[%s3027_s2 + $0x48] sm:$0xff] (!%p2233_p2) }
  0xe3   : > { %v759_v15 = vld [vmem:[#allocation2 + $0x28] sm:$0xff] (!%p2233_p2)  ;;  %v690_v20 = vsel (!%p2233_p2), %vm3191_vm0, %v620_v2, 0.0  ;;  %v691_v21 = vsel (!%p2233_p2), %vm3191_vm0, %v621_v3, 0.0  ;;  %v692_v22 = vsel (!%p2233_p2), %vm3191_vm0, %v622_v7, 0.0  ;;  %v693_v23 = vsel (!%p2233_p2), %vm3191_vm0, %v623_v10, 0.0  ;;  %v762_v30 = vld [vmem:[#allocation2 + $0x40] sm:$0xff] (!%p2233_p2) }
  0xe4   : > { %v760_v18 = vld [vmem:[#allocation2 + $0x30] sm:$0xff] (!%p2233_p2)  ;;  %v761_v24 = vld [vmem:[#allocation2 + $0x38] sm:$0xff] (!%p2233_p2)  ;;  %v818_v26 = vadd.f32 (!%p2233_p2), %v754_v5, %v690_v20  ;;  %v819_v27 = vadd.f32 (!%p2233_p2), %v755_v6, %v691_v21  ;;  %v820_v28 = vadd.f32 (!%p2233_p2), %v756_v8, %v692_v22  ;;  %v821_v29 = vadd.f32 (!%p2233_p2), %v757_v11, %v693_v23  ;;  %v763_v32 = vld [vmem:[#allocation2 + $0x48] sm:$0xff] (!%p2233_p2) }
  0xe5   : > { %v694_v33 = vsel (!%p2233_p2), %vm3191_vm0, %v624_v12, 0.0  ;;  %v695_v34 = vsel (!%p2233_p2), %vm3191_vm0, %v625_v14, 0.0  ;;  %v696_v35 = vsel (!%p2233_p2), %vm3191_vm0, %v626_v17, 0.0  ;;  %v697_v36 = vsel (!%p2233_p2), %vm3191_vm0, %v627_v19, 0.0  ;;  %v630_v37 = vld [vmem:[%s3027_s2 + $0x50] sm:$0xff] (!%p2233_p2)  ;;  %v631_v43 = vld [vmem:[%s3027_s2 + $0x58] sm:$0xff] (!%p2233_p2) }
  0xe6   : > { %v764_v38 = vld [vmem:[#allocation2 + $0x50] sm:$0xff]  ;;  %882 = vst [vmem:[#allocation2] sm:$0xff] %v818_v26  ;;  %883 = vst [vmem:[#allocation2 + $0x8] sm:$0xff] %v819_v27  ;;  %v822_v39 = vadd.f32 %v758_v13, %v694_v33  ;;  %v823_v40 = vadd.f32 %v759_v15, %v695_v34  ;;  %v824_v41 = vadd.f32 %v760_v18, %v696_v35  ;;  %v765_v44 = vld [vmem:[#allocation2 + $0x58] sm:$0xff]  ;;  %v698_v46 = vsel %vm3191_vm0, %v628_v25, 0.0 }
  0xe7   : > { %884 = vst [vmem:[#allocation2 + $0x10] sm:$0xff] %v820_v28  ;;  %885 = vst [vmem:[#allocation2 + $0x18] sm:$0xff] %v821_v29  ;;  %v825_v42 = vadd.f32 %v761_v24, %v697_v36  ;;  %v632_v45 = vld [vmem:[%s3027_s2 + $0x60] sm:$0xff]  ;;  %v699_v47 = vsel %vm3191_vm0, %v629_v31, 0.0  ;;  %v700_v48 = vsel %vm3191_vm0, %v630_v37, 0.0  ;;  %v701_v49 = vsel %vm3191_vm0, %v631_v43, 0.0 }
  0xe8   : > { %v766_v50 = vld [vmem:[#allocation2 + $0x60] sm:$0xff]  ;;  %v633_v51 = vld [vmem:[%s3027_s2 + $0x68] sm:$0xff]  ;;  %886 = vst [vmem:[#allocation2 + $0x20] sm:$0xff] %v822_v39  ;;  %887 = vst [vmem:[#allocation2 + $0x28] sm:$0xff] %v823_v40  ;;  %v826_v52 = vadd.f32 %v762_v30, %v698_v46  ;;  %v827_v53 = vadd.f32 %v763_v32, %v699_v47  ;;  %v828_v54 = vadd.f32 %v764_v38, %v700_v48  ;;  %v702_v59 = vsel %vm3191_vm0, %v632_v45, 0.0 }
  0xe9   : > { %888 = vst [vmem:[#allocation2 + $0x30] sm:$0xff] %v824_v41  ;;  %889 = vst [vmem:[#allocation2 + $0x38] sm:$0xff] %v825_v42  ;;  %v829_v55 = vadd.f32 %v765_v44, %v701_v49  ;;  %v767_v56 = vld [vmem:[#allocation2 + $0x68] sm:$0xff]  ;;  %v634_v57 = vld [vmem:[%s3027_s2 + $0x70] sm:$0xff]  ;;  %v703_v60 = vsel %vm3191_vm0, %v633_v51, 0.0  ;;  %v830_v1 = vadd.f32 %v766_v50, %v702_v59 }
  0xea   : > { %v768_v58 = vld [vmem:[#allocation2 + $0x70] sm:$0xff]  ;;  %v704_v61 = vsel %vm3191_vm0, %v634_v57, 0.0  ;;  %v635_v62 = vld [vmem:[%s3027_s2 + $0x78] sm:$0xff]  ;;  %v636_v0 = vld [vmem:[%s3027_s2 + $0x80] sm:$0xff]  ;;  %890 = vst [vmem:[#allocation2 + $0x40] sm:$0xff] %v826_v52  ;;  %v831_v2 = vadd.f32 %v767_v56, %v703_v60 }
  0xeb   : > { %v769_v63 = vld [vmem:[#allocation2 + $0x78] sm:$0xff]  ;;  %891 = vst [vmem:[#allocation2 + $0x48] sm:$0xff] %v827_v53  ;;  %892 = vst [vmem:[#allocation2 + $0x50] sm:$0xff] %v828_v54  ;;  %v832_v3 = vadd.f32 %v768_v58, %v704_v61  ;;  %v705_v4 = vsel %vm3191_vm0, %v635_v62, 0.0  ;;  %v770_v5 = vld [vmem:[#allocation2 + $0x80] sm:$0xff]  ;;  %v706_v9 = vsel %vm3191_vm0, %v636_v0, 0.0 }
  0xec   : > { %893 = vst [vmem:[#allocation2 + $0x58] sm:$0xff] %v829_v55  ;;  %v637_v6 = vld [vmem:[%s3027_s2 + $0x88] sm:$0xff]  ;;  %v833_v8 = vadd.f32 %v769_v63, %v705_v4  ;;  %v638_v11 = vld [vmem:[%s3027_s2 + $0x90] sm:$0xff]  ;;  %v639_v13 = vld [vmem:[%s3027_s2 + $0x98] sm:$0xff]  ;;  %v834_v14 = vadd.f32 %v770_v5, %v706_v9 }
  0xed   : > { %v771_v7 = vld [vmem:[#allocation2 + $0x88] sm:$0xff]  ;;  %v707_v10 = vsel %vm3191_vm0, %v637_v6, 0.0  ;;  %v772_v12 = vld [vmem:[#allocation2 + $0x90] sm:$0xff]  ;;  %894 = vst [vmem:[#allocation2 + $0x60] sm:$0xff] %v830_v1  ;;  %895 = vst [vmem:[#allocation2 + $0x68] sm:$0xff] %v831_v2  ;;  %v708_v17 = vsel %vm3191_vm0, %v638_v11, 0.0 }
  0xee   : > { %896 = vst [vmem:[#allocation2 + $0x70] sm:$0xff] %v832_v3  ;;  %v835_v15 = vadd.f32 %v771_v7, %v707_v10  ;;  %v709_v18 = vsel %vm3191_vm0, %v639_v13, 0.0  ;;  %v773_v19 = vld [vmem:[#allocation2 + $0x98] sm:$0xff]  ;;  %v640_v20 = vld [vmem:[%s3027_s2 + $0xa0] sm:$0xff]  ;;  %897 = vst [vmem:[#allocation2 + $0x78] sm:$0xff] %v833_v8  ;;  %v836_v22 = vadd.f32 %v772_v12, %v708_v17 }
  0xef   : > { %v774_v21 = vld [vmem:[#allocation2 + $0xa0] sm:$0xff]  ;;  %v837_v23 = vadd.f32 %v773_v19, %v709_v18  ;;  %v710_v24 = vsel %vm3191_vm0, %v640_v20, 0.0  ;;  %v641_v25 = vld [vmem:[%s3027_s2 + $0xa8] sm:$0xff]  ;;  %v642_v27 = vld [vmem:[%s3027_s2 + $0xb0] sm:$0xff]  ;;  %898 = vst [vmem:[#allocation2 + $0x80] sm:$0xff] %v834_v14 }
  0xf0   : > { %v775_v26 = vld [vmem:[#allocation2 + $0xa8] sm:$0xff]  ;;  %899 = vst [vmem:[#allocation2 + $0x88] sm:$0xff] %v835_v15  ;;  %v838_v28 = vadd.f32 %v774_v21, %v710_v24  ;;  %v711_v29 = vsel %vm3191_vm0, %v641_v25, 0.0  ;;  %v712_v30 = vsel %vm3191_vm0, %v642_v27, 0.0  ;;  %v776_v31 = vld [vmem:[#allocation2 + $0xb0] sm:$0xff]  ;;  %v643_v32 = vld [vmem:[%s3027_s2 + $0xb8] sm:$0xff] }
  0xf1   : > { %v777_v33 = vld [vmem:[#allocation2 + $0xb8] sm:$0xff]  ;;  %900 = vst [vmem:[#allocation2 + $0x90] sm:$0xff] %v836_v22  ;;  %901 = vst [vmem:[#allocation2 + $0x98] sm:$0xff] %v837_v23  ;;  %v839_v34 = vadd.f32 %v775_v26, %v711_v29  ;;  %v840_v35 = vadd.f32 %v776_v31, %v712_v30  ;;  %v713_v36 = vsel %vm3191_vm0, %v643_v32, 0.0  ;;  %v644_v37 = vld [vmem:[%s3027_s2 + $0xc0] sm:$0xff] }
  0xf2   : > { %v778_v38 = vld [vmem:[#allocation2 + $0xc0] sm:$0xff]  ;;  %v645_v39 = vld [vmem:[%s3027_s2 + $0xc8] sm:$0xff]  ;;  %902 = vst [vmem:[#allocation2 + $0xa0] sm:$0xff] %v838_v28  ;;  %v841_v40 = vadd.f32 %v777_v33, %v713_v36  ;;  %v714_v41 = vsel %vm3191_vm0, %v644_v37, 0.0  ;;  %v646_v44 = vld [vmem:[%s3027_s2 + $0xd0] sm:$0xff] }
  0xf3   : > { %v715_v42 = vsel %vm3191_vm0, %v645_v39, 0.0  ;;  %v779_v43 = vld [vmem:[#allocation2 + $0xc8] sm:$0xff]  ;;  %v780_v45 = vld [vmem:[#allocation2 + $0xd0] sm:$0xff]  ;;  %903 = vst [vmem:[#allocation2 + $0xa8] sm:$0xff] %v839_v34  ;;  %904 = vst [vmem:[#allocation2 + $0xb0] sm:$0xff] %v840_v35  ;;  %v842_v46 = vadd.f32 %v778_v38, %v714_v41  ;;  %v716_v48 = vsel %vm3191_vm0, %v646_v44, 0.0 }
  0xf4   : > { %v843_v47 = vadd.f32 %v779_v43, %v715_v42  ;;  %v647_v49 = vld [vmem:[%s3027_s2 + $0xd8] sm:$0xff]  ;;  %v648_v51 = vld [vmem:[%s3027_s2 + $0xe0] sm:$0xff]  ;;  %905 = vst [vmem:[#allocation2 + $0xb8] sm:$0xff] %v841_v40  ;;  %v844_v52 = vadd.f32 %v780_v45, %v716_v48  ;;  %v649_v56 = vld [vmem:[%s3027_s2 + $0xe8] sm:$0xff] }
  0xf5   : > { %v781_v50 = vld [vmem:[#allocation2 + $0xd8] sm:$0xff]  ;;  %v717_v53 = vsel %vm3191_vm0, %v647_v49, 0.0  ;;  %v718_v54 = vsel %vm3191_vm0, %v648_v51, 0.0  ;;  %v782_v55 = vld [vmem:[#allocation2 + $0xe0] sm:$0xff]  ;;  %v783_v57 = vld [vmem:[#allocation2 + $0xe8] sm:$0xff]  ;;  %906 = vst [vmem:[#allocation2 + $0xc0] sm:$0xff] %v842_v46 }
  0xf6   : > { %907 = vst [vmem:[#allocation2 + $0xc8] sm:$0xff] %v843_v47  ;;  %v845_v58 = vadd.f32 %v781_v50, %v717_v53  ;;  %v846_v59 = vadd.f32 %v782_v55, %v718_v54  ;;  %v719_v60 = vsel %vm3191_vm0, %v649_v56, 0.0  ;;  %v650_v61 = vld [vmem:[%s3027_s2 + $0xf0] sm:$0xff]  ;;  %v651_v63 = vld [vmem:[%s3027_s2 + $0xf8] sm:$0xff]  ;;  %908 = vst [vmem:[#allocation2 + $0xd0] sm:$0xff] %v844_v52 }
  0xf7   : > { %v784_v62 = vld [vmem:[#allocation2 + $0xf0] sm:$0xff]  ;;  %v847_v0 = vadd.f32 %v783_v57, %v719_v60  ;;  %v720_v1 = vsel %vm3191_vm0, %v650_v61, 0.0  ;;  %v721_v2 = vsel %vm3191_vm0, %v651_v63, 0.0  ;;  %v785_v3 = vld [vmem:[#allocation2 + $0xf8] sm:$0xff]  ;;  %v652_v4 = vld [vmem:[%s3027_s2 + $0x100] sm:$0xff] }
  0xf8   : > { %v786_v5 = vld [vmem:[#allocation2 + $0x100] sm:$0xff]  ;;  %909 = vst [vmem:[#allocation2 + $0xd8] sm:$0xff] %v845_v58  ;;  %910 = vst [vmem:[#allocation2 + $0xe0] sm:$0xff] %v846_v59  ;;  %v848_v6 = vadd.f32 %v784_v62, %v720_v1  ;;  %v849_v7 = vadd.f32 %v785_v3, %v721_v2  ;;  %v722_v8 = vsel %vm3191_vm0, %v652_v4, 0.0  ;;  %v653_v9 = vld [vmem:[%s3027_s2 + $0x108] sm:$0xff] }
  0xf9   : > { %v787_v10 = vld [vmem:[#allocation2 + $0x108] sm:$0xff]  ;;  %v654_v11 = vld [vmem:[%s3027_s2 + $0x110] sm:$0xff]  ;;  %911 = vst [vmem:[#allocation2 + $0xe8] sm:$0xff] %v847_v0  ;;  %v850_v12 = vadd.f32 %v786_v5, %v722_v8  ;;  %v723_v13 = vsel %vm3191_vm0, %v653_v9, 0.0  ;;  %v655_v17 = vld [vmem:[%s3027_s2 + $0x118] sm:$0xff] }
  0xfa   : > { %v724_v14 = vsel %vm3191_vm0, %v654_v11, 0.0  ;;  %v788_v15 = vld [vmem:[#allocation2 + $0x110] sm:$0xff]  ;;  %v789_v18 = vld [vmem:[#allocation2 + $0x118] sm:$0xff]  ;;  %912 = vst [vmem:[#allocation2 + $0xf0] sm:$0xff] %v848_v6  ;;  %913 = vst [vmem:[#allocation2 + $0xf8] sm:$0xff] %v849_v7  ;;  %v851_v19 = vadd.f32 %v787_v10, %v723_v13  ;;  %v725_v21 = vsel %vm3191_vm0, %v655_v17, 0.0 }
  0xfb   : > { %v852_v20 = vadd.f32 %v788_v15, %v724_v14  ;;  %v656_v22 = vld [vmem:[%s3027_s2 + $0x120] sm:$0xff]  ;;  %v657_v24 = vld [vmem:[%s3027_s2 + $0x128] sm:$0xff]  ;;  %914 = vst [vmem:[#allocation2 + $0x100] sm:$0xff] %v850_v12  ;;  %v853_v25 = vadd.f32 %v789_v18, %v725_v21  ;;  %v658_v29 = vld [vmem:[%s3027_s2 + $0x130] sm:$0xff] }
  0xfc   : > { %v790_v23 = vld [vmem:[#allocation2 + $0x120] sm:$0xff]  ;;  %v726_v26 = vsel %vm3191_vm0, %v656_v22, 0.0  ;;  %v727_v27 = vsel %vm3191_vm0, %v657_v24, 0.0  ;;  %v791_v28 = vld [vmem:[#allocation2 + $0x128] sm:$0xff]  ;;  %v792_v30 = vld [vmem:[#allocation2 + $0x130] sm:$0xff]  ;;  %915 = vst [vmem:[#allocation2 + $0x108] sm:$0xff] %v851_v19 }
  0xfd   : > { %916 = vst [vmem:[#allocation2 + $0x110] sm:$0xff] %v852_v20  ;;  %v854_v31 = vadd.f32 %v790_v23, %v726_v26  ;;  %v855_v32 = vadd.f32 %v791_v28, %v727_v27  ;;  %v728_v33 = vsel %vm3191_vm0, %v658_v29, 0.0  ;;  %v659_v34 = vld [vmem:[%s3027_s2 + $0x138] sm:$0xff]  ;;  %v660_v36 = vld [vmem:[%s3027_s2 + $0x140] sm:$0xff]  ;;  %917 = vst [vmem:[#allocation2 + $0x118] sm:$0xff] %v853_v25 }
  0xfe   : > { %v793_v35 = vld [vmem:[#allocation2 + $0x138] sm:$0xff]  ;;  %v856_v37 = vadd.f32 %v792_v30, %v728_v33  ;;  %v729_v38 = vsel %vm3191_vm0, %v659_v34, 0.0  ;;  %v730_v39 = vsel %vm3191_vm0, %v660_v36, 0.0  ;;  %v794_v40 = vld [vmem:[#allocation2 + $0x140] sm:$0xff]  ;;  %v661_v41 = vld [vmem:[%s3027_s2 + $0x148] sm:$0xff] }
  0xff   : > { %v795_v42 = vld [vmem:[#allocation2 + $0x148] sm:$0xff]  ;;  %918 = vst [vmem:[#allocation2 + $0x120] sm:$0xff] %v854_v31  ;;  %919 = vst [vmem:[#allocation2 + $0x128] sm:$0xff] %v855_v32  ;;  %v857_v43 = vadd.f32 %v793_v35, %v729_v38  ;;  %v858_v44 = vadd.f32 %v794_v40, %v730_v39  ;;  %v731_v45 = vsel %vm3191_vm0, %v661_v41, 0.0  ;;  %v662_v46 = vld [vmem:[%s3027_s2 + $0x150] sm:$0xff] }
 0x100   : > { %v796_v47 = vld [vmem:[#allocation2 + $0x150] sm:$0xff]  ;;  %v663_v48 = vld [vmem:[%s3027_s2 + $0x158] sm:$0xff]  ;;  %920 = vst [vmem:[#allocation2 + $0x130] sm:$0xff] %v856_v37  ;;  %v859_v49 = vadd.f32 %v795_v42, %v731_v45  ;;  %v732_v50 = vsel %vm3191_vm0, %v662_v46, 0.0  ;;  %v664_v53 = vld [vmem:[%s3027_s2 + $0x160] sm:$0xff] }
 0x101   : > { %v733_v51 = vsel %vm3191_vm0, %v663_v48, 0.0  ;;  %v797_v52 = vld [vmem:[#allocation2 + $0x158] sm:$0xff]  ;;  %v798_v54 = vld [vmem:[#allocation2 + $0x160] sm:$0xff]  ;;  %921 = vst [vmem:[#allocation2 + $0x138] sm:$0xff] %v857_v43  ;;  %922 = vst [vmem:[#allocation2 + $0x140] sm:$0xff] %v858_v44  ;;  %v860_v55 = vadd.f32 %v796_v47, %v732_v50  ;;  %v734_v57 = vsel %vm3191_vm0, %v664_v53, 0.0 }
 0x102   : > { %v861_v56 = vadd.f32 %v797_v52, %v733_v51  ;;  %v665_v58 = vld [vmem:[%s3027_s2 + $0x168] sm:$0xff]  ;;  %v666_v60 = vld [vmem:[%s3027_s2 + $0x170] sm:$0xff]  ;;  %923 = vst [vmem:[#allocation2 + $0x148] sm:$0xff] %v859_v49  ;;  %v862_v61 = vadd.f32 %v798_v54, %v734_v57  ;;  %v667_v1 = vld [vmem:[%s3027_s2 + $0x178] sm:$0xff] }
 0x103   : > { %v799_v59 = vld [vmem:[#allocation2 + $0x168] sm:$0xff]  ;;  %v735_v62 = vsel %vm3191_vm0, %v665_v58, 0.0  ;;  %v736_v63 = vsel %vm3191_vm0, %v666_v60, 0.0  ;;  %v800_v0 = vld [vmem:[#allocation2 + $0x170] sm:$0xff]  ;;  %v801_v2 = vld [vmem:[#allocation2 + $0x178] sm:$0xff]  ;;  %924 = vst [vmem:[#allocation2 + $0x150] sm:$0xff] %v860_v55 }
 0x104   : > { %925 = vst [vmem:[#allocation2 + $0x158] sm:$0xff] %v861_v56  ;;  %v863_v3 = vadd.f32 %v799_v59, %v735_v62  ;;  %v864_v4 = vadd.f32 %v800_v0, %v736_v63  ;;  %v737_v5 = vsel %vm3191_vm0, %v667_v1, 0.0  ;;  %v668_v6 = vld [vmem:[%s3027_s2 + $0x180] sm:$0xff]  ;;  %v669_v8 = vld [vmem:[%s3027_s2 + $0x188] sm:$0xff]  ;;  %926 = vst [vmem:[#allocation2 + $0x160] sm:$0xff] %v862_v61 }
 0x105   : > { %v802_v7 = vld [vmem:[#allocation2 + $0x180] sm:$0xff]  ;;  %v865_v9 = vadd.f32 %v801_v2, %v737_v5  ;;  %v738_v10 = vsel %vm3191_vm0, %v668_v6, 0.0  ;;  %v739_v11 = vsel %vm3191_vm0, %v669_v8, 0.0  ;;  %v803_v12 = vld [vmem:[#allocation2 + $0x188] sm:$0xff]  ;;  %v670_v13 = vld [vmem:[%s3027_s2 + $0x190] sm:$0xff] }
 0x106   : > { %v804_v14 = vld [vmem:[#allocation2 + $0x190] sm:$0xff]  ;;  %927 = vst [vmem:[#allocation2 + $0x168] sm:$0xff] %v863_v3  ;;  %928 = vst [vmem:[#allocation2 + $0x170] sm:$0xff] %v864_v4  ;;  %v866_v15 = vadd.f32 %v802_v7, %v738_v10  ;;  %v867_v17 = vadd.f32 %v803_v12, %v739_v11  ;;  %v740_v18 = vsel %vm3191_vm0, %v670_v13, 0.0  ;;  %v671_v19 = vld [vmem:[%s3027_s2 + $0x198] sm:$0xff] }
 0x107   : > { %v805_v20 = vld [vmem:[#allocation2 + $0x198] sm:$0xff]  ;;  %v672_v21 = vld [vmem:[%s3027_s2 + $0x1a0] sm:$0xff]  ;;  %929 = vst [vmem:[#allocation2 + $0x178] sm:$0xff] %v865_v9  ;;  %v868_v22 = vadd.f32 %v804_v14, %v740_v18  ;;  %v741_v23 = vsel %vm3191_vm0, %v671_v19, 0.0  ;;  %v673_v26 = vld [vmem:[%s3027_s2 + $0x1a8] sm:$0xff] }
 0x108   : > { %v742_v24 = vsel %vm3191_vm0, %v672_v21, 0.0  ;;  %v806_v25 = vld [vmem:[#allocation2 + $0x1a0] sm:$0xff]  ;;  %v807_v27 = vld [vmem:[#allocation2 + $0x1a8] sm:$0xff]  ;;  %930 = vst [vmem:[#allocation2 + $0x180] sm:$0xff] %v866_v15  ;;  %931 = vst [vmem:[#allocation2 + $0x188] sm:$0xff] %v867_v17  ;;  %v869_v28 = vadd.f32 %v805_v20, %v741_v23  ;;  %v743_v30 = vsel %vm3191_vm0, %v673_v26, 0.0 }
 0x109   : > { %v870_v29 = vadd.f32 %v806_v25, %v742_v24  ;;  %v674_v31 = vld [vmem:[%s3027_s2 + $0x1b0] sm:$0xff]  ;;  %v675_v33 = vld [vmem:[%s3027_s2 + $0x1b8] sm:$0xff]  ;;  %932 = vst [vmem:[#allocation2 + $0x190] sm:$0xff] %v868_v22  ;;  %v871_v34 = vadd.f32 %v807_v27, %v743_v30  ;;  %v676_v38 = vld [vmem:[%s3027_s2 + $0x1c0] sm:$0xff] }
 0x10a   : > { %v808_v32 = vld [vmem:[#allocation2 + $0x1b0] sm:$0xff]  ;;  %v744_v35 = vsel %vm3191_vm0, %v674_v31, 0.0  ;;  %v745_v36 = vsel %vm3191_vm0, %v675_v33, 0.0  ;;  %v809_v37 = vld [vmem:[#allocation2 + $0x1b8] sm:$0xff]  ;;  %v810_v39 = vld [vmem:[#allocation2 + $0x1c0] sm:$0xff]  ;;  %933 = vst [vmem:[#allocation2 + $0x198] sm:$0xff] %v869_v28 }
 0x10b   : > { %934 = vst [vmem:[#allocation2 + $0x1a0] sm:$0xff] %v870_v29  ;;  %v872_v40 = vadd.f32 %v808_v32, %v744_v35  ;;  %v873_v41 = vadd.f32 %v809_v37, %v745_v36  ;;  %v746_v42 = vsel %vm3191_vm0, %v676_v38, 0.0  ;;  %v677_v43 = vld [vmem:[%s3027_s2 + $0x1c8] sm:$0xff]  ;;  %v678_v45 = vld [vmem:[%s3027_s2 + $0x1d0] sm:$0xff]  ;;  %935 = vst [vmem:[#allocation2 + $0x1a8] sm:$0xff] %v871_v34 }
 0x10c   : > { %v811_v44 = vld [vmem:[#allocation2 + $0x1c8] sm:$0xff]  ;;  %v874_v46 = vadd.f32 %v810_v39, %v746_v42  ;;  %v747_v47 = vsel %vm3191_vm0, %v677_v43, 0.0  ;;  %v748_v48 = vsel %vm3191_vm0, %v678_v45, 0.0  ;;  %v812_v49 = vld [vmem:[#allocation2 + $0x1d0] sm:$0xff]  ;;  %v679_v50 = vld [vmem:[%s3027_s2 + $0x1d8] sm:$0xff] }
 0x10d   : > { %v813_v51 = vld [vmem:[#allocation2 + $0x1d8] sm:$0xff]  ;;  %936 = vst [vmem:[#allocation2 + $0x1b0] sm:$0xff] %v872_v40  ;;  %937 = vst [vmem:[#allocation2 + $0x1b8] sm:$0xff] %v873_v41  ;;  %v875_v52 = vadd.f32 %v811_v44, %v747_v47  ;;  %v876_v53 = vadd.f32 %v812_v49, %v748_v48  ;;  %v749_v54 = vsel %vm3191_vm0, %v679_v50, 0.0  ;;  %v680_v55 = vld [vmem:[%s3027_s2 + $0x1e0] sm:$0xff] }
 0x10e   : > { %v814_v56 = vld [vmem:[#allocation2 + $0x1e0] sm:$0xff]  ;;  %v681_v57 = vld [vmem:[%s3027_s2 + $0x1e8] sm:$0xff]  ;;  %938 = vst [vmem:[#allocation2 + $0x1c0] sm:$0xff] %v874_v46  ;;  %v877_v58 = vadd.f32 %v813_v51, %v749_v54  ;;  %v750_v59 = vsel %vm3191_vm0, %v680_v55, 0.0  ;;  %v682_v62 = vld [vmem:[%s3027_s2 + $0x1f0] sm:$0xff] }
 0x10f   : > { %v751_v60 = vsel %vm3191_vm0, %v681_v57, 0.0  ;;  %v815_v61 = vld [vmem:[#allocation2 + $0x1e8] sm:$0xff]  ;;  %v816_v63 = vld [vmem:[#allocation2 + $0x1f0] sm:$0xff]  ;;  %939 = vst [vmem:[#allocation2 + $0x1c8] sm:$0xff] %v875_v52  ;;  %940 = vst [vmem:[#allocation2 + $0x1d0] sm:$0xff] %v876_v53  ;;  %v878_v0 = vadd.f32 %v814_v56, %v750_v59  ;;  %v752_v2 = vsel %vm3191_vm0, %v682_v62, 0.0 }
 0x110   : > { %v879_v1 = vadd.f32 %v815_v61, %v751_v60  ;;  %v683_v3 = vld [vmem:[%s3027_s2 + $0x1f8] sm:$0xff]  ;;  %941 = vst [vmem:[#allocation2 + $0x1d8] sm:$0xff] %v877_v58  ;;  %v880_v5 = vadd.f32 %v816_v63, %v752_v2 }
 0x111   : > { %v817_v4 = vld [vmem:[#allocation2 + $0x1f8] sm:$0xff]  ;;  %v753_v6 = vsel %vm3191_vm0, %v683_v3, 0.0  ;;  %942 = vst [vmem:[#allocation2 + $0x1e0] sm:$0xff] %v878_v0 }
 0x112   : > { %943 = vst [vmem:[#allocation2 + $0x1e8] sm:$0xff] %v879_v1  ;;  %v881_v7 = vadd.f32 %v817_v4, %v753_v6  ;;  %944 = vst [vmem:[#allocation2 + $0x1f0] sm:$0xff] %v880_v5 }
 0x114   : > { %945 = vst [vmem:[#allocation2 + $0x1f8] sm:$0xff] %v881_v7 }
 0x115 PF: > { %p2234_p8 = scmp.ne.s32.totalorder %s2791_s21, 2 }
 0x117   : > { %949 = sbr.rel (%p2234_p8) target bundleno = 702 (0x2be), region = 60 }
 0x11e   : > { %v1398_v8 = vld [vmem:[%s3047_s8] sm:$0xff]  ;;  %v1499_v10 = vld [vmem:[#allocation6 + $0x88] sm:$0xff]  ;;  %v2817_v11 = vmov 0   ;;  %v1500_v22 = vld [vmem:[#allocation6 + $0x90] sm:$0xff]  ;;  %vm1682_vm1 = vcmask 1041409   ;;  %vm1685_vm2 = vcmask 1042434  }
 0x11f   : > { %v1498_v9 = vld [vmem:[#allocation6 + $0x80] sm:$0xff]  ;;  %2624 = vset.pattern.permute.xlu0 %v2817_v11  ;;  %v1531_v14 = vld [vmem:[#allocation6 + $0x188] sm:$0xff]  ;;  %v1501_v23 = vld [vmem:[#allocation6 + $0x98] sm:$0xff]  ;;  %vm1688_vm3 = vcmask 1043459   ;;  %vm1691_vm4 = vcmask 1044484   ;;  %vm1694_vm5 = vcmask 1045509  }
 0x120   : > { %v2381_v12 = vpack.c.bf16 %v1499_v10, %v1498_v9  ;;  %v1530_v13 = vld [vmem:[#allocation6 + $0x180] sm:$0xff]  ;;  %1401 = vperm.xlu0 %2624, %v1398_v8   ;;  %v1483_v17 = vld [vmem:[#allocation6 + $0x8] sm:$0xff]  ;;  %v1532_v24 = vld [vmem:[#allocation6 + $0x190] sm:$0xff]  ;;  %v2385_v25 = vpack.c.bf16 %v1501_v23, %v1500_v22  ;;  %vm1697_vm6 = vcmask 1046534   ;;  %vm1700_vm7 = vcmask 1047559  }
 0x121   : > { %v1482_v16 = vld [vmem:[#allocation6] sm:$0xff]  ;;  %v2413_v15 = vpack.c.bf16 %v1531_v14, %v1530_v13  ;;  %v1515_v19 = vld [vmem:[#allocation6 + $0x108] sm:$0xff]  ;;  %v1533_v26 = vld [vmem:[#allocation6 + $0x198] sm:$0xff] }
 0x122   : > { %v1514_v18 = vld [vmem:[#allocation6 + $0x100] sm:$0xff]  ;;  %2382 = vmatprep.subr.bf16.mxu0 %v2381_v12  ;;  %v2383_v20 = vpack.c.bf16 %v1483_v17, %v1482_v16  ;;  %v1484_v27 = vld [vmem:[#allocation6 + $0x10] sm:$0xff]  ;;  %v1485_v28 = vld [vmem:[#allocation6 + $0x18] sm:$0xff]  ;;  %v2417_v29 = vpack.c.bf16 %v1533_v26, %v1532_v24 }
 0x123   : > { %v2415_v21 = vpack.c.bf16 %v1515_v19, %v1514_v18  ;;  %2414 = vmatprep.subr.bf16.mxu1 %v2413_v15  ;;  %v2387_v30 = vpack.c.bf16 %v1485_v28, %v1484_v27  ;;  %v1516_v31 = vld [vmem:[#allocation6 + $0x110] sm:$0xff]  ;;  %v1517_v32 = vld [vmem:[#allocation6 + $0x118] sm:$0xff]  ;;  %v1502_v33 = vld [vmem:[#allocation6 + $0xa0] sm:$0xff] }
 0x124   : > { %2384 = vmatpush3.bf16.msra.mxu0 %v2383_v20  ;;  %v2419_v34 = vpack.c.bf16 %v1517_v32, %v1516_v31  ;;  %v1503_v35 = vld [vmem:[#allocation6 + $0xa8] sm:$0xff]  ;;  %v1534_v36 = vld [vmem:[#allocation6 + $0x1a0] sm:$0xff]  ;;  %v1504_v44 = vld [vmem:[#allocation6 + $0xb0] sm:$0xff] }
 0x125   : > { %2416 = vmatpush3.bf16.msra.mxu1 %v2415_v21  ;;  %2386 = vmatprep.subr.bf16.mxu0 %v2385_v25  ;;  %v1535_v37 = vld [vmem:[#allocation6 + $0x1a8] sm:$0xff]  ;;  %v2389_v38 = vpack.c.bf16 %v1503_v35, %v1502_v33  ;;  %v1486_v40 = vld [vmem:[#allocation6 + $0x20] sm:$0xff]  ;;  %v1505_v45 = vld [vmem:[#allocation6 + $0xb8] sm:$0xff] }
 0x126   : > { %2418 = vmatprep.subr.bf16.mxu1 %v2417_v29  ;;  %v2421_v39 = vpack.c.bf16 %v1535_v37, %v1534_v36  ;;  %v1487_v41 = vld [vmem:[#allocation6 + $0x28] sm:$0xff]  ;;  %v1518_v42 = vld [vmem:[#allocation6 + $0x120] sm:$0xff]  ;;  %v1536_v48 = vld [vmem:[#allocation6 + $0x1b0] sm:$0xff]  ;;  %v2393_v51 = vpack.c.bf16 %v1505_v45, %v1504_v44 }
 0x127   : > { %v1519_v43 = vld [vmem:[#allocation6 + $0x128] sm:$0xff]  ;;  %v2391_v46 = vpack.c.bf16 %v1487_v41, %v1486_v40  ;;  %v1537_v49 = vld [vmem:[#allocation6 + $0x1b8] sm:$0xff]  ;;  %v1488_v50 = vld [vmem:[#allocation6 + $0x30] sm:$0xff] }
 0x128   : > { %2388 = vmatpush3.bf16.msra.mxu0 %v2387_v30  ;;  %v2423_v47 = vpack.c.bf16 %v1519_v43, %v1518_v42  ;;  %v2425_v52 = vpack.c.bf16 %v1537_v49, %v1536_v48  ;;  %v1489_v53 = vld [vmem:[#allocation6 + $0x38] sm:$0xff]  ;;  %v1520_v54 = vld [vmem:[#allocation6 + $0x130] sm:$0xff]  ;;  %v1506_v56 = vld [vmem:[#allocation6 + $0xc0] sm:$0xff] }
 0x129   : > { %2420 = vmatpush3.bf16.msra.mxu1 %v2419_v34  ;;  %2390 = vmatprep.subr.bf16.mxu0 %v2389_v38  ;;  %v1521_v55 = vld [vmem:[#allocation6 + $0x138] sm:$0xff]  ;;  %v1507_v57 = vld [vmem:[#allocation6 + $0xc8] sm:$0xff]  ;;  %v1538_v58 = vld [vmem:[#allocation6 + $0x1c0] sm:$0xff]  ;;  %v2395_v60 = vpack.c.bf16 %v1489_v53, %v1488_v50 }
 0x12a   : > { %2422 = vmatprep.subr.bf16.mxu1 %v2421_v39  ;;  %v1539_v59 = vld [vmem:[#allocation6 + $0x1c8] sm:$0xff]  ;;  %v2427_v61 = vpack.c.bf16 %v1521_v55, %v1520_v54  ;;  %v1490_v62 = vld [vmem:[#allocation6 + $0x40] sm:$0xff]  ;;  %v2397_v0 = vpack.c.bf16 %v1507_v57, %v1506_v56  ;;  %v1508_v4 = vld [vmem:[#allocation6 + $0xd0] sm:$0xff] }
 0x12b   : > { %v1491_v63 = vld [vmem:[#allocation6 + $0x48] sm:$0xff]  ;;  %v2429_v1 = vpack.c.bf16 %v1539_v59, %v1538_v58  ;;  %v1522_v2 = vld [vmem:[#allocation6 + $0x140] sm:$0xff]  ;;  %v1509_v5 = vld [vmem:[#allocation6 + $0xd8] sm:$0xff] }
 0x12c   : > { %2392 = vmatpush3.bf16.msra.mxu0 %v2391_v46  ;;  %v1523_v3 = vld [vmem:[#allocation6 + $0x148] sm:$0xff]  ;;  %v1540_v6 = vld [vmem:[#allocation6 + $0x1d0] sm:$0xff]  ;;  %v1541_v7 = vld [vmem:[#allocation6 + $0x1d8] sm:$0xff]  ;;  %v2399_v8 = vpack.c.bf16 %v1491_v63, %v1490_v62  ;;  %v2401_v12 = vpack.c.bf16 %v1509_v5, %v1508_v4 }
 0x12d   : > { %2424 = vmatpush3.bf16.msra.mxu1 %v2423_v47  ;;  %2394 = vmatprep.subr.bf16.mxu0 %v2393_v51  ;;  %v2431_v9 = vpack.c.bf16 %v1523_v3, %v1522_v2  ;;  %v1492_v10 = vld [vmem:[#allocation6 + $0x50] sm:$0xff]  ;;  %v1493_v11 = vld [vmem:[#allocation6 + $0x58] sm:$0xff]  ;;  %v2433_v13 = vpack.c.bf16 %v1541_v7, %v1540_v6  ;;  %v1510_v15 = vld [vmem:[#allocation6 + $0xe0] sm:$0xff] }
 0x12e   : > { %2426 = vmatprep.subr.bf16.mxu1 %v2425_v52  ;;  %v1524_v14 = vld [vmem:[#allocation6 + $0x150] sm:$0xff]  ;;  %v1525_v16 = vld [vmem:[#allocation6 + $0x158] sm:$0xff]  ;;  %v1511_v17 = vld [vmem:[#allocation6 + $0xe8] sm:$0xff]  ;;  %v2403_v20 = vpack.c.bf16 %v1493_v11, %v1492_v10 }
 0x12f   : > { %v1542_v18 = vld [vmem:[#allocation6 + $0x1e0] sm:$0xff]  ;;  %v1543_v19 = vld [vmem:[#allocation6 + $0x1e8] sm:$0xff]  ;;  %v2435_v21 = vpack.c.bf16 %v1525_v16, %v1524_v14  ;;  %v2405_v24 = vpack.c.bf16 %v1511_v17, %v1510_v15  ;;  %v1512_v28 = vld [vmem:[#allocation6 + $0xf0] sm:$0xff] }
 0x130   : > { %2396 = vmatpush3.bf16.msra.mxu0 %v2395_v60  ;;  %v1494_v22 = vld [vmem:[#allocation6 + $0x60] sm:$0xff]  ;;  %v1495_v23 = vld [vmem:[#allocation6 + $0x68] sm:$0xff]  ;;  %v2437_v25 = vpack.c.bf16 %v1543_v19, %v1542_v18  ;;  %v1513_v29 = vld [vmem:[#allocation6 + $0xf8] sm:$0xff] }
 0x131   : > { %2428 = vmatpush3.bf16.msra.mxu1 %v2427_v61  ;;  %2398 = vmatprep.subr.bf16.mxu0 %v2397_v0  ;;  %v1526_v26 = vld [vmem:[#allocation6 + $0x160] sm:$0xff]  ;;  %v1527_v27 = vld [vmem:[#allocation6 + $0x168] sm:$0xff]  ;;  %v1544_v30 = vld [vmem:[#allocation6 + $0x1f0] sm:$0xff]  ;;  %v2407_v32 = vpack.c.bf16 %v1495_v23, %v1494_v22  ;;  %v2409_v35 = vpack.c.bf16 %v1513_v29, %v1512_v28 }
 0x132   : > { %2430 = vmatprep.subr.bf16.mxu1 %v2429_v1  ;;  %v1545_v31 = vld [vmem:[#allocation6 + $0x1f8] sm:$0xff]  ;;  %v2439_v33 = vpack.c.bf16 %v1527_v27, %v1526_v26  ;;  %v1496_v34 = vld [vmem:[#allocation6 + $0x70] sm:$0xff]  ;;  %v951_v40 = vld [vmem:[#allocation2 + $0x8] sm:$0xff] }
 0x133   : > { %v2441_v36 = vpack.c.bf16 %v1545_v31, %v1544_v30  ;;  %v1497_v37 = vld [vmem:[#allocation6 + $0x78] sm:$0xff]  ;;  %v1528_v38 = vld [vmem:[#allocation6 + $0x170] sm:$0xff]  ;;  %v959_v43 = vld [vmem:[#allocation2 + $0x48] sm:$0xff]  ;;  %v1020_v46 = vrot.slane %v951_v40, 4 }
 0x134   : > { %2400 = vmatpush3.bf16.msra.mxu0 %v2399_v8  ;;  %v1529_v39 = vld [vmem:[#allocation6 + $0x178] sm:$0xff]  ;;  %v2411_v41 = vpack.c.bf16 %v1497_v37, %v1496_v34  ;;  %v967_v44 = vld [vmem:[#allocation2 + $0x88] sm:$0xff]  ;;  %v1068_v50 = vrot.slane %v959_v43, 4 }
 0x135   : > { %2432 = vmatpush3.bf16.msra.mxu1 %v2431_v9  ;;  %2402 = vmatprep.subr.bf16.mxu0 %v2401_v12  ;;  %v2443_v42 = vpack.c.bf16 %v1529_v39, %v1528_v38  ;;  %v975_v45 = vld [vmem:[#allocation2 + $0xc8] sm:$0xff]  ;;  %v953_v52 = vld [vmem:[#allocation2 + $0x18] sm:$0xff]  ;;  %v1116_v54 = vrot.slane %v967_v44, 4  ;;  %v1021_v58 = vadd.f32 %v1020_v46, %v951_v40  ;;  %v1594_v39 = vld [vmem:[#allocation6 + $0x380] sm:$0xff] }
 0x136   : > { %2434 = vmatprep.subr.bf16.mxu1 %v2433_v13  ;;  %v983_v47 = vld [vmem:[#allocation2 + $0x108] sm:$0xff]  ;;  %v961_v53 = vld [vmem:[#allocation2 + $0x58] sm:$0xff]  ;;  %v1164_v59 = vrot.slane %v975_v45, 4  ;;  %v1069_v1 = vadd.f32 %v1068_v50, %v959_v43  ;;  %v1032_v4 = vrot.slane %v953_v52, 4 }
 0x137   : > { %v991_v48 = vld [vmem:[#allocation2 + $0x148] sm:$0xff]  ;;  %v969_v55 = vld [vmem:[#allocation2 + $0x98] sm:$0xff]  ;;  %v1212_v60 = vrot.slane %v983_v47, 4  ;;  %v1080_v5 = vrot.slane %v961_v53, 4  ;;  %v1117_v9 = vadd.f32 %v1116_v54, %v967_v44  ;;  %v1022_v13 = vrot.slane %v1021_v58, 2 }
 0x138   : > { %2404 = vmatpush3.bf16.msra.mxu0 %v2403_v20  ;;  %v999_v49 = vld [vmem:[#allocation2 + $0x188] sm:$0xff]  ;;  %v977_v56 = vld [vmem:[#allocation2 + $0xd8] sm:$0xff]  ;;  %v1260_v61 = vrot.slane %v991_v48, 4  ;;  %v1128_v6 = vrot.slane %v969_v55, 4  ;;  %v1165_v14 = vadd.f32 %v1164_v59, %v975_v45  ;;  %v1070_v17 = vrot.slane %v1069_v1, 2 }
 0x139   : > { %2436 = vmatpush3.bf16.msra.mxu1 %v2435_v21  ;;  %2406 = vmatprep.subr.bf16.mxu0 %v2405_v24  ;;  %v1007_v51 = vld [vmem:[#allocation2 + $0x1c8] sm:$0xff]  ;;  %v985_v57 = vld [vmem:[#allocation2 + $0x118] sm:$0xff]  ;;  %v1308_v2 = vrot.slane %v999_v49, 4  ;;  %v1176_v7 = vrot.slane %v977_v56, 4  ;;  %v1213_v16 = vadd.f32 %v1212_v60, %v983_v47  ;;  %v1033_v20 = vadd.f32 %v1032_v4, %v953_v52 }
 0x13a   : > { %2438 = vmatprep.subr.bf16.mxu1 %v2437_v25  ;;  %v993_v62 = vld [vmem:[#allocation2 + $0x158] sm:$0xff]  ;;  %v1356_v3 = vrot.slane %v1007_v51, 4  ;;  %v1224_v8 = vrot.slane %v985_v57, 4  ;;  %v1261_v15 = vadd.f32 %v1260_v61, %v991_v48  ;;  %v1081_v21 = vadd.f32 %v1080_v5, %v961_v53  ;;  %v1563_v34 = vld [vmem:[#allocation6 + $0x288] sm:$0xff] }
 0x13b   : > { %v1001_v63 = vld [vmem:[#allocation2 + $0x198] sm:$0xff]  ;;  %v1272_v10 = vrot.slane %v993_v62, 4  ;;  %v1309_v18 = vadd.f32 %v1308_v2, %v999_v49  ;;  %v1129_v22 = vadd.f32 %v1128_v6, %v969_v55  ;;  %v1177_v23 = vadd.f32 %v1176_v7, %v977_v56  ;;  %v1595_v40 = vld [vmem:[#allocation6 + $0x388] sm:$0xff] }
 0x13c   : > { %2408 = vmatpush3.bf16.msra.mxu0 %v2407_v32  ;;  %v1009_v0 = vld [vmem:[#allocation2 + $0x1d8] sm:$0xff]  ;;  %v1320_v11 = vrot.slane %v1001_v63, 4  ;;  %v1357_v19 = vadd.f32 %v1356_v3, %v1007_v51  ;;  %v1225_v24 = vadd.f32 %v1224_v8, %v985_v57  ;;  %v1118_v25 = vrot.slane %v1117_v9, 2 }
 0x13d   : > { %2440 = vmatpush3.bf16.msra.mxu1 %v2439_v33  ;;  %2410 = vmatprep.subr.bf16.mxu0 %v2409_v35  ;;  %v1368_v12 = vrot.slane %v1009_v0, 4  ;;  %v1273_v26 = vadd.f32 %v1272_v10, %v993_v62  ;;  %v1023_v29 = vadd.f32 %v1022_v13, %v1021_v58  ;;  %v1166_v30 = vrot.slane %v1165_v14, 2  ;;  %v1562_v33 = vld [vmem:[#allocation6 + $0x280] sm:$0xff] }
 0x13e   : > { %2442 = vmatprep.subr.bf16.mxu1 %v2441_v36  ;;  %v1321_v27 = vadd.f32 %v1320_v11, %v1001_v63  ;;  %v1214_v31 = vrot.slane %v1213_v16, 2  ;;  %v1262_v32 = vrot.slane %v1261_v15, 2  ;;  %v1071_v35 = vadd.f32 %v1070_v17, %v1069_v1  ;;  %v950_v17 = vld [vmem:[#allocation2] sm:$0xff] }
 0x13f   : > { %v1369_v28 = vadd.f32 %v1368_v12, %v1009_v0  ;;  %v1310_v36 = vrot.slane %v1309_v18, 2  ;;  %v1358_v37 = vrot.slane %v1357_v19, 2  ;;  %v1034_v38 = vrot.slane %v1033_v20, 2 }
 0x140   : > { %2412 = vmatpush3.bf16.msra.mxu0 %v2411_v41  ;;  %v1082_v41 = vrot.slane %v1081_v21, 2  ;;  %v1178_v43 = vrot.slane %v1177_v23, 2  ;;  %v1226_v44 = vrot.slane %v1225_v24, 2  ;;  %v1274_v45 = vrot.slane %v1273_v26, 2 }
 0x141   : > { %2444 = vmatpush3.bf16.msra.mxu1 %v2443_v42  ;;  %v1130_v42 = vrot.slane %v1129_v22, 2  ;;  %v1322_v46 = vrot.slane %v1321_v27, 2  ;;  %v1370_v47 = vrot.slane %v1369_v28, 2  ;;  %v2445_v48 = vpack.c.bf16 %v1563_v34, %v1562_v33 }
 0x142   : > { %v1119_v49 = vadd.f32 %v1118_v25, %v1117_v9  ;;  %v1167_v50 = vadd.f32 %v1166_v30, %v1165_v14  ;;  %v1215_v51 = vadd.f32 %v1214_v31, %v1213_v16  ;;  %v2477_v52 = vpack.c.bf16 %v1595_v40, %v1594_v39  ;;  %v982_v25 = vld [vmem:[#allocation2 + $0x100] sm:$0xff]  ;;  %v968_v39 = vld [vmem:[#allocation2 + $0x90] sm:$0xff] }
 0x143   : > { %v1263_v53 = vadd.f32 %v1262_v32, %v1261_v15  ;;  %v1311_v54 = vadd.f32 %v1310_v36, %v1309_v18  ;;  %v1359_v55 = vadd.f32 %v1358_v37, %v1357_v19  ;;  %v1035_v56 = vadd.f32 %v1034_v38, %v1033_v20  ;;  %2446 = vmatprep.subr.bf16.mxu0 %v2445_v48  ;;  %v958_v18 = vld [vmem:[#allocation2 + $0x40] sm:$0xff]  ;;  %v952_v37 = vld [vmem:[#allocation2 + $0x10] sm:$0xff] }
 0x144   : > { %v1083_v57 = vadd.f32 %v1082_v41, %v1081_v21  ;;  %v1131_v58 = vadd.f32 %v1130_v42, %v1129_v22  ;;  %v1179_v59 = vadd.f32 %v1178_v43, %v1177_v23  ;;  %v1227_v60 = vadd.f32 %v1226_v44, %v1225_v24  ;;  %2478 = vmatprep.subr.bf16.mxu1 %v2477_v52  ;;  %v966_v23 = vld [vmem:[#allocation2 + $0x80] sm:$0xff]  ;;  %v960_v38 = vld [vmem:[#allocation2 + $0x50] sm:$0xff] }
 0x145   : > { %v1024_v61 = vrot.slane %v1023_v29, 1  ;;  %v1275_v62 = vadd.f32 %v1274_v45, %v1273_v26  ;;  %v1323_v63 = vadd.f32 %v1322_v46, %v1321_v27  ;;  %v1371_v0 = vadd.f32 %v1370_v47, %v1369_v28  ;;  %v974_v24 = vld [vmem:[#allocation2 + $0xc0] sm:$0xff]  ;;  %v976_v44 = vld [vmem:[#allocation2 + $0xd0] sm:$0xff] }
 0x146   : > { %v1072_v1 = vrot.slane %v1071_v35, 1  ;;  %v1120_v2 = vrot.slane %v1119_v49, 1  ;;  %v1168_v3 = vrot.slane %v1167_v50, 1  ;;  %v1216_v4 = vrot.slane %v1215_v51, 1  ;;  %v990_v30 = vld [vmem:[#allocation2 + $0x140] sm:$0xff]  ;;  %v984_v45 = vld [vmem:[#allocation2 + $0x110] sm:$0xff] }
 0x147   : > { %v1264_v5 = vrot.slane %v1263_v53, 1  ;;  %v1312_v6 = vrot.slane %v1311_v54, 1  ;;  %v1360_v7 = vrot.slane %v1359_v55, 1  ;;  %v1036_v8 = vrot.slane %v1035_v56, 1  ;;  %v998_v31 = vld [vmem:[#allocation2 + $0x180] sm:$0xff]  ;;  %v992_v46 = vld [vmem:[#allocation2 + $0x150] sm:$0xff] }
 0x148   : > { %v1084_v9 = vrot.slane %v1083_v57, 1  ;;  %v1132_v10 = vrot.slane %v1131_v58, 1  ;;  %v1180_v11 = vrot.slane %v1179_v59, 1  ;;  %v1228_v12 = vrot.slane %v1227_v60, 1  ;;  %v1006_v32 = vld [vmem:[#allocation2 + $0x1c0] sm:$0xff]  ;;  %v1008_v52 = vld [vmem:[#allocation2 + $0x1d0] sm:$0xff] }
 0x149   : > { %v3383_v13 = vadd.f32 %v1024_v61, %v1023_v29  ;;  %v1276_v14 = vrot.slane %v1275_v62, 1  ;;  %v1324_v16 = vrot.slane %v1323_v63, 1  ;;  %v1372_v15 = vrot.slane %v1371_v0, 1 }
 0x14a   : > { %v3385_v19 = vadd.f32 %v1072_v1, %v1071_v35  ;;  %v3387_v20 = vadd.f32 %v1120_v2, %v1119_v49  ;;  %v3389_v21 = vadd.f32 %v1168_v3, %v1167_v50  ;;  %v3391_v22 = vadd.f32 %v1216_v4, %v1215_v51  ;;  %v1000_v51 = vld [vmem:[#allocation2 + $0x190] sm:$0xff] }
 0x14b   : > { %v3393_v26 = vadd.f32 %v1264_v5, %v1263_v53  ;;  %v3395_v27 = vadd.f32 %v1312_v6, %v1311_v54  ;;  %v3397_v28 = vadd.f32 %v1360_v7, %v1359_v55  ;;  %v3399_v29 = vadd.f32 %v1036_v8, %v1035_v56 }
 0x14c   : > { %v3401_v33 = vadd.f32 %v1084_v9, %v1083_v57  ;;  %v3403_v34 = vadd.f32 %v1132_v10, %v1131_v58  ;;  %v3405_v35 = vadd.f32 %v1180_v11, %v1179_v59  ;;  %v3407_v36 = vadd.f32 %v1228_v12, %v1227_v60 }
 0x14d   : > { %v3409_v40 = vadd.f32 %v1276_v14, %v1275_v62  ;;  %v3411_v41 = vadd.f32 %v1324_v16, %v1323_v63  ;;  %v3413_v42 = vadd.f32 %v1372_v15, %v1371_v0  ;;  %v1014_v43 = vrot.slane %v950_v17, 4 }
 0x14e   : > { %v1062_v47 = vrot.slane %v958_v18, 4  ;;  %v1110_v48 = vrot.slane %v966_v23, 4  ;;  %v1158_v49 = vrot.slane %v974_v24, 4  ;;  %v1206_v50 = vrot.slane %v982_v25, 4 }
 0x14f   : > { %4093 = vst [vmem:[#allocation18_spill] sm:$0xff] %v3409_v40  ;;  %4094 = vst [vmem:[#allocation19_spill] sm:$0xff] %v3411_v41  ;;  %v1254_v53 = vrot.slane %v990_v30, 4  ;;  %v1302_v54 = vrot.slane %v998_v31, 4  ;;  %v1350_v55 = vrot.slane %v1006_v32, 4  ;;  %v1026_v56 = vrot.slane %v952_v37, 4 }
 0x150   : > { %4095 = vst [vmem:[#allocation20_spill] sm:$0xff] %v3413_v42  ;;  %v1074_v57 = vrot.slane %v960_v38, 4  ;;  %v1122_v58 = vrot.slane %v968_v39, 4  ;;  %v1170_v59 = vrot.slane %v976_v44, 4  ;;  %v1218_v60 = vrot.slane %v984_v45, 4 }
 0x151   : > { %v1015_v61 = vadd.f32 %v1014_v43, %v950_v17  ;;  %v1266_v62 = vrot.slane %v992_v46, 4  ;;  %v1314_v63 = vrot.slane %v1000_v51, 4  ;;  %v1362_v0 = vrot.slane %v1008_v52, 4 }
 0x152   : > { %v1063_v1 = vadd.f32 %v1062_v47, %v958_v18  ;;  %v1111_v2 = vadd.f32 %v1110_v48, %v966_v23  ;;  %v1159_v3 = vadd.f32 %v1158_v49, %v974_v24  ;;  %v1207_v4 = vadd.f32 %v1206_v50, %v982_v25 }
 0x153   : > { %v1255_v5 = vadd.f32 %v1254_v53, %v990_v30  ;;  %v1303_v6 = vadd.f32 %v1302_v54, %v998_v31  ;;  %v1351_v7 = vadd.f32 %v1350_v55, %v1006_v32  ;;  %v1027_v8 = vadd.f32 %v1026_v56, %v952_v37 }
 0x154   : > { %v1075_v9 = vadd.f32 %v1074_v57, %v960_v38  ;;  %v1123_v10 = vadd.f32 %v1122_v58, %v968_v39  ;;  %v1171_v11 = vadd.f32 %v1170_v59, %v976_v44  ;;  %v1219_v12 = vadd.f32 %v1218_v60, %v984_v45 }
 0x155   : > { %v1016_v14 = vrot.slane %v1015_v61, 2  ;;  %v1267_v16 = vadd.f32 %v1266_v62, %v992_v46  ;;  %v1315_v15 = vadd.f32 %v1314_v63, %v1000_v51  ;;  %v1363_v42 = vadd.f32 %v1362_v0, %v1008_v52 }
 0x156   : > { %v1064_v17 = vrot.slane %v1063_v1, 2  ;;  %v1112_v43 = vrot.slane %v1111_v2, 2  ;;  %v1160_v41 = vrot.slane %v1159_v3, 2  ;;  %v1208_v40 = vrot.slane %v1207_v4, 2 }
 0x157   : > { %v1256_v18 = vrot.slane %v1255_v5, 2  ;;  %v1304_v23 = vrot.slane %v1303_v6, 2  ;;  %v1352_v24 = vrot.slane %v1351_v7, 2  ;;  %v1028_v25 = vrot.slane %v1027_v8, 2 }
 0x158   : > { %v1076_v30 = vrot.slane %v1075_v9, 2  ;;  %v1124_v31 = vrot.slane %v1123_v10, 2  ;;  %v1172_v32 = vrot.slane %v1171_v11, 2  ;;  %v1220_v37 = vrot.slane %v1219_v12, 2 }
 0x159   : > { %v1017_v38 = vadd.f32 %v1016_v14, %v1015_v61  ;;  %v1268_v39 = vrot.slane %v1267_v16, 2  ;;  %v1316_v44 = vrot.slane %v1315_v15, 2  ;;  %v1364_v45 = vrot.slane %v1363_v42, 2 }
 0x15a   : > { %v1065_v47 = vadd.f32 %v1064_v17, %v1063_v1  ;;  %v1113_v46 = vadd.f32 %v1112_v43, %v1111_v2  ;;  %v1161_v48 = vadd.f32 %v1160_v41, %v1159_v3  ;;  %v1209_v49 = vadd.f32 %v1208_v40, %v1207_v4  ;;  %v3429_v43 = vld [vmem:[#allocation6 + $0x300] sm:$0xff] }
 0x15b   : > { %v1257_v50 = vadd.f32 %v1256_v18, %v1255_v5  ;;  %v1305_v51 = vadd.f32 %v1304_v23, %v1303_v6  ;;  %v1353_v52 = vadd.f32 %v1352_v24, %v1351_v7  ;;  %v1029_v53 = vadd.f32 %v1028_v25, %v1027_v8  ;;  %4101 = vst [vmem:[#allocation26_spill] sm:$0xff] %v3429_v43  ;;  %v3431_v18 = vld [vmem:[#allocation6 + $0x308] sm:$0xff] }
 0x15c   : > { %v1077_v54 = vadd.f32 %v1076_v30, %v1075_v9  ;;  %v1125_v55 = vadd.f32 %v1124_v31, %v1123_v10  ;;  %v1173_v56 = vadd.f32 %v1172_v32, %v1171_v11  ;;  %v1221_v57 = vadd.f32 %v1220_v37, %v1219_v12  ;;  %v3417_v11 = vld [vmem:[#allocation6 + $0x200] sm:$0xff]  ;;  %4102 = vst [vmem:[#allocation27_spill] sm:$0xff] %v3431_v18  ;;  %v955_v23 = vld [vmem:[#allocation2 + $0x28] sm:$0xff] }
 0x15d   : > { %v1018_v58 = vrot.slane %v1017_v38, 1  ;;  %v1269_v59 = vadd.f32 %v1268_v39, %v1267_v16  ;;  %v1317_v60 = vadd.f32 %v1316_v44, %v1315_v15  ;;  %v1365_v62 = vadd.f32 %v1364_v45, %v1363_v42  ;;  %4097 = vst [vmem:[#allocation22_spill] sm:$0xff] %v3417_v11  ;;  %v3419_v42 = vld [vmem:[#allocation6 + $0x208] sm:$0xff] }
 0x15e   : > { %v1066_v61 = vrot.slane %v1065_v47, 1  ;;  %v1114_v63 = vrot.slane %v1113_v46, 1  ;;  %v1162_v0 = vrot.slane %v1161_v48, 1  ;;  %v1210_v14 = vrot.slane %v1209_v49, 1  ;;  %4098 = vst [vmem:[#allocation23_spill] sm:$0xff] %v3419_v42  ;;  %v963_v24 = vld [vmem:[#allocation2 + $0x68] sm:$0xff] }
 0x15f   : > { %v1258_v1 = vrot.slane %v1257_v50, 1  ;;  %v1306_v2 = vrot.slane %v1305_v51, 1  ;;  %v1354_v41 = vrot.slane %v1353_v52, 1  ;;  %v1030_v40 = vrot.slane %v1029_v53, 1  ;;  %v971_v37 = vld [vmem:[#allocation2 + $0xa8] sm:$0xff] }
 0x160   : > { %v1078_v3 = vrot.slane %v1077_v54, 1  ;;  %v1126_v4 = vrot.slane %v1125_v55, 1  ;;  %v1174_v5 = vrot.slane %v1173_v56, 1  ;;  %v1222_v6 = vrot.slane %v1221_v57, 1  ;;  %v987_v39 = vld [vmem:[#allocation2 + $0x128] sm:$0xff] }
 0x161   : > { %v3415_v7 = vadd.f32 %v1018_v58, %v1017_v38  ;;  %v1270_v8 = vrot.slane %v1269_v59, 1  ;;  %v1318_v9 = vrot.slane %v1317_v60, 1  ;;  %v1366_v10 = vrot.slane %v1365_v62, 1  ;;  %v979_v38 = vld [vmem:[#allocation2 + $0xe8] sm:$0xff] }
 0x162   : > { %v3421_v12 = vadd.f32 %v1066_v61, %v1065_v47  ;;  %v3423_v16 = vadd.f32 %v1114_v63, %v1113_v46  ;;  %v3425_v15 = vadd.f32 %v1162_v0, %v1161_v48  ;;  %v3427_v17 = vadd.f32 %v1210_v14, %v1209_v49  ;;  %v995_v48 = vld [vmem:[#allocation2 + $0x168] sm:$0xff]  ;;  %v957_v61 = vld [vmem:[#allocation2 + $0x38] sm:$0xff] }
 0x163   : > { %4096 = vst [vmem:[#allocation21_spill] sm:$0xff] %v3415_v7  ;;  %v3433_v25 = vadd.f32 %v1258_v1, %v1257_v50  ;;  %v3435_v30 = vadd.f32 %v1306_v2, %v1305_v51  ;;  %v3437_v31 = vadd.f32 %v1354_v41, %v1353_v52  ;;  %v3439_v32 = vadd.f32 %v1030_v40, %v1029_v53  ;;  %v1003_v49 = vld [vmem:[#allocation2 + $0x1a8] sm:$0xff]  ;;  %v965_v63 = vld [vmem:[#allocation2 + $0x78] sm:$0xff] }
 0x164   : > { %4099 = vst [vmem:[#allocation24_spill] sm:$0xff] %v3425_v15  ;;  %4100 = vst [vmem:[#allocation25_spill] sm:$0xff] %v3427_v17  ;;  %v3441_v44 = vadd.f32 %v1078_v3, %v1077_v54  ;;  %v3443_v45 = vadd.f32 %v1126_v4, %v1125_v55  ;;  %v3445_v47 = vadd.f32 %v1174_v5, %v1173_v56  ;;  %v1011_v50 = vld [vmem:[#allocation2 + $0x1e8] sm:$0xff]  ;;  %v1044_v58 = vrot.slane %v955_v23, 4  ;;  %v973_v54 = vld [vmem:[#allocation2 + $0xb8] sm:$0xff] }
 0x165   : > { %4103 = vst [vmem:[#allocation28_spill] sm:$0xff] %v3433_v25  ;;  %4104 = vst [vmem:[#allocation29_spill] sm:$0xff] %v3435_v30  ;;  %v3447_v46 = vadd.f32 %v1222_v6, %v1221_v57  ;;  %v3449_v51 = vadd.f32 %v1270_v8, %v1269_v59  ;;  %v3451_v52 = vadd.f32 %v1318_v9, %v1317_v60  ;;  %v1092_v56 = vrot.slane %v963_v24, 4  ;;  %v981_v14 = vld [vmem:[#allocation2 + $0xf8] sm:$0xff] }
 0x166   : > { %4105 = vst [vmem:[#allocation30_spill] sm:$0xff] %v3437_v31  ;;  %4106 = vst [vmem:[#allocation31_spill] sm:$0xff] %v3439_v32  ;;  %v3453_v53 = vadd.f32 %v1366_v10, %v1365_v62  ;;  %v1140_v0 = vrot.slane %v971_v37, 4  ;;  %v1188_v57 = vrot.slane %v979_v38, 4  ;;  %v989_v1 = vld [vmem:[#allocation2 + $0x138] sm:$0xff]  ;;  %v1236_v60 = vrot.slane %v987_v39, 4 }
 0x167   : > { %4107 = vst [vmem:[#allocation32_spill] sm:$0xff] %v3441_v44  ;;  %4108 = vst [vmem:[#allocation33_spill] sm:$0xff] %v3443_v45  ;;  %v997_v2 = vld [vmem:[#allocation2 + $0x178] sm:$0xff]  ;;  %v1284_v41 = vrot.slane %v995_v48, 4  ;;  %v1332_v62 = vrot.slane %v1003_v49, 4  ;;  %v1380_v3 = vrot.slane %v1011_v50, 4  ;;  %v1045_v9 = vadd.f32 %v1044_v58, %v955_v23 }
 0x168   : > { %4109 = vst [vmem:[#allocation34_spill] sm:$0xff] %v3445_v47  ;;  %4110 = vst [vmem:[#allocation35_spill] sm:$0xff] %v3447_v46  ;;  %v1005_v40 = vld [vmem:[#allocation2 + $0x1b8] sm:$0xff]  ;;  %v1056_v5 = vrot.slane %v957_v61, 4  ;;  %v1104_v6 = vrot.slane %v965_v63, 4  ;;  %v1152_v8 = vrot.slane %v973_v54, 4  ;;  %v1093_v42 = vadd.f32 %v1092_v56, %v963_v24 }
 0x169   : > { %4111 = vst [vmem:[#allocation36_spill] sm:$0xff] %v3449_v51  ;;  %4112 = vst [vmem:[#allocation37_spill] sm:$0xff] %v3451_v52  ;;  %v1013_v4 = vld [vmem:[#allocation2 + $0x1f8] sm:$0xff]  ;;  %v1200_v10 = vrot.slane %v981_v14, 4  ;;  %v1248_v55 = vrot.slane %v989_v1, 4  ;;  %v1296_v11 = vrot.slane %v997_v2, 4  ;;  %v1189_v32 = vadd.f32 %v1188_v57, %v979_v38 }
 0x16a   : > { %4113 = vst [vmem:[#allocation38_spill] sm:$0xff] %v3453_v53  ;;  %v1141_v53 = vadd.f32 %v1140_v0, %v971_v37  ;;  %v1344_v52 = vrot.slane %v1005_v40, 4  ;;  %v1237_v51 = vadd.f32 %v1236_v60, %v987_v39  ;;  %v1285_v46 = vadd.f32 %v1284_v41, %v995_v48 }
 0x16b   : > { %v1333_v59 = vadd.f32 %v1332_v62, %v1003_v49  ;;  %v1392_v43 = vrot.slane %v1013_v4, 4  ;;  %v1381_v18 = vadd.f32 %v1380_v3, %v1011_v50  ;;  %v1057_v47 = vadd.f32 %v1056_v5, %v957_v61 }
 0x16c   : > { %v1105_v45 = vadd.f32 %v1104_v6, %v965_v63  ;;  %v1153_v44 = vadd.f32 %v1152_v8, %v973_v54  ;;  %v1046_v31 = vrot.slane %v1045_v9, 2  ;;  %v1201_v7 = vadd.f32 %v1200_v10, %v981_v14 }
 0x16d   : > { %v1249_v30 = vadd.f32 %v1248_v55, %v989_v1  ;;  %v1297_v25 = vadd.f32 %v1296_v11, %v997_v2  ;;  %v1094_v23 = vrot.slane %v1093_v42, 2  ;;  %v1142_v58 = vrot.slane %v1141_v53, 2 }
 0x16e   : > { %v1190_v17 = vrot.slane %v1189_v32, 2  ;;  %v1345_v15 = vadd.f32 %v1344_v52, %v1005_v40  ;;  %v1238_v24 = vrot.slane %v1237_v51, 2  ;;  %v1286_v37 = vrot.slane %v1285_v46, 2 }
 0x16f   : > { %v1334_v38 = vrot.slane %v1333_v59, 2  ;;  %v1393_v56 = vadd.f32 %v1392_v43, %v1013_v4  ;;  %v1382_v39 = vrot.slane %v1381_v18, 2  ;;  %v1058_v48 = vrot.slane %v1057_v47, 2 }
 0x170   : > { %v1106_v49 = vrot.slane %v1105_v45, 2  ;;  %v1154_v0 = vrot.slane %v1153_v44, 2  ;;  %v1047_v50 = vadd.f32 %v1046_v31, %v1045_v9  ;;  %v1202_v61 = vrot.slane %v1201_v7, 2 }
 0x171   : > { %v1250_v63 = vrot.slane %v1249_v30, 2  ;;  %v1298_v54 = vrot.slane %v1297_v25, 2  ;;  %v1095_v57 = vadd.f32 %v1094_v23, %v1093_v42  ;;  %v1143_v14 = vadd.f32 %v1142_v58, %v1141_v53 }
 0x172   : > { %v1191_v55 = vadd.f32 %v1190_v17, %v1189_v32  ;;  %v1346_v11 = vrot.slane %v1345_v15, 2  ;;  %v1239_v1 = vadd.f32 %v1238_v24, %v1237_v51  ;;  %v1287_v2 = vadd.f32 %v1286_v37, %v1285_v46  ;;  %v3471_v37 = vld [vmem:[#allocation6 + $0x290] sm:$0xff] }
 0x173   : > { %v1335_v60 = vadd.f32 %v1334_v38, %v1333_v59  ;;  %v1394_v52 = vrot.slane %v1393_v56, 2  ;;  %v1383_v41 = vadd.f32 %v1382_v39, %v1381_v18  ;;  %v1059_v62 = vadd.f32 %v1058_v48, %v1057_v47  ;;  %4115 = vst [vmem:[#allocation40_spill] sm:$0xff] %v3471_v37  ;;  %v3473_v38 = vld [vmem:[#allocation6 + $0x298] sm:$0xff] }
 0x174   : > { %v1107_v40 = vadd.f32 %v1106_v49, %v1105_v45  ;;  %v1155_v43 = vadd.f32 %v1154_v0, %v1153_v44  ;;  %v1048_v3 = vrot.slane %v1047_v50, 1  ;;  %v1203_v4 = vadd.f32 %v1202_v61, %v1201_v7  ;;  %v3461_v7 = vld [vmem:[#allocation2 + $0x20] sm:$0xff]  ;;  %4116 = vst [vmem:[#allocation41_spill] sm:$0xff] %v3473_v38  ;;  %v3477_v39 = vld [vmem:[#allocation6 + $0x398] sm:$0xff]  ;;  %v3485_v61 = vld [vmem:[#allocation6 + $0x210] sm:$0xff] }
 0x175   : > { %v1251_v5 = vadd.f32 %v1250_v63, %v1249_v30  ;;  %v1299_v6 = vadd.f32 %v1298_v54, %v1297_v25  ;;  %v1096_v31 = vrot.slane %v1095_v57, 1  ;;  %v1144_v8 = vrot.slane %v1143_v14, 1  ;;  %v3463_v25 = vld [vmem:[#allocation2 + $0x60] sm:$0xff]  ;;  %4118 = vst [vmem:[#allocation43_spill] sm:$0xff] %v3477_v39  ;;  %4122 = vst [vmem:[#allocation47_spill] sm:$0xff] %v3485_v61  ;;  %v3487_v63 = vld [vmem:[#allocation6 + $0x218] sm:$0xff] }
 0x176   : > { %v1192_v9 = vrot.slane %v1191_v55, 1  ;;  %v1347_v10 = vadd.f32 %v1346_v11, %v1345_v15  ;;  %v1240_v42 = vrot.slane %v1239_v1, 1  ;;  %v1288_v53 = vrot.slane %v1287_v2, 1  ;;  %4123 = vst [vmem:[#allocation48_spill] sm:$0xff] %v3487_v63  ;;  %v3489_v54 = vld [vmem:[#allocation6 + $0x310] sm:$0xff]  ;;  %v3497_v11 = vld [vmem:[#allocation6 + $0x3a0] sm:$0xff] }
 0x177   : > { %v1336_v17 = vrot.slane %v1335_v60, 1  ;;  %v1395_v32 = vadd.f32 %v1394_v52, %v1393_v56  ;;  %v1384_v51 = vrot.slane %v1383_v41, 1  ;;  %v1060_v46 = vrot.slane %v1059_v62, 1  ;;  %v3475_v56 = vld [vmem:[#allocation6 + $0x390] sm:$0xff]  ;;  %4124 = vst [vmem:[#allocation49_spill] sm:$0xff] %v3489_v54  ;;  %4128 = vst [vmem:[#allocation53_spill] sm:$0xff] %v3497_v11 }
 0x178   : > { %v1108_v59 = vrot.slane %v1107_v40, 1  ;;  %v1156_v23 = vrot.slane %v1155_v43, 1  ;;  %v3459_v18 = vadd.f32 %v1048_v3, %v1047_v50  ;;  %v1204_v45 = vrot.slane %v1203_v4, 1  ;;  %4117 = vst [vmem:[#allocation42_spill] sm:$0xff] %v3475_v56  ;;  %v3569_v56 = vld [vmem:[#allocation6 + $0x340] sm:$0xff]  ;;  %v3575_v61 = vld [vmem:[#allocation6 + $0x348] sm:$0xff] }
 0x179   : > { %v1252_v44 = vrot.slane %v1251_v5, 1  ;;  %v1300_v47 = vrot.slane %v1299_v6, 1  ;;  %v3465_v30 = vadd.f32 %v1096_v31, %v1095_v57  ;;  %v3467_v15 = vadd.f32 %v1144_v8, %v1143_v14  ;;  %v3491_v57 = vld [vmem:[#allocation6 + $0x318] sm:$0xff]  ;;  %v3493_v14 = vld [vmem:[#allocation6 + $0x2a0] sm:$0xff]  ;;  %4157 = vst [vmem:[#allocation82_spill] sm:$0xff] %v3569_v56  ;;  %4158 = vst [vmem:[#allocation83_spill] sm:$0xff] %v3575_v61 }
 0x17a   : > { %4114 = vst [vmem:[#allocation39_spill] sm:$0xff] %v3459_v18  ;;  %v3469_v58 = vadd.f32 %v1192_v9, %v1191_v55  ;;  %v1348_v24 = vrot.slane %v1347_v10, 1  ;;  %v3479_v48 = vadd.f32 %v1240_v42, %v1239_v1  ;;  %v3481_v49 = vadd.f32 %v1288_v53, %v1287_v2  ;;  %4125 = vst [vmem:[#allocation50_spill] sm:$0xff] %v3491_v57  ;;  %v3495_v55 = vld [vmem:[#allocation6 + $0x2a8] sm:$0xff]  ;;  %v970_v2 = vld [vmem:[#allocation2 + $0xa0] sm:$0xff] }
 0x17b   : > { %v3483_v0 = vadd.f32 %v1336_v17, %v1335_v60  ;;  %v1396_v50 = vrot.slane %v1395_v32, 1  ;;  %4126 = vst [vmem:[#allocation51_spill] sm:$0xff] %v3493_v14  ;;  %4127 = vst [vmem:[#allocation52_spill] sm:$0xff] %v3495_v55  ;;  %v3499_v1 = vld [vmem:[#allocation6 + $0x3a8] sm:$0xff]  ;;  %v978_v60 = vld [vmem:[#allocation2 + $0xe0] sm:$0xff]  ;;  %v3501_v52 = vadd.f32 %v1384_v51, %v1383_v41  ;;  %v3503_v3 = vadd.f32 %v1060_v46, %v1059_v62 }
 0x17c   : > { %4119 = vst [vmem:[#allocation44_spill] sm:$0xff] %v3479_v48  ;;  %4120 = vst [vmem:[#allocation45_spill] sm:$0xff] %v3481_v49  ;;  %v3505_v31 = vadd.f32 %v1108_v59, %v1107_v40  ;;  %v3507_v8 = vadd.f32 %v1156_v23, %v1155_v43  ;;  %v3509_v9 = vld [vmem:[#allocation6 + $0x220] sm:$0xff]  ;;  %v3511_v42 = vld [vmem:[#allocation6 + $0x228] sm:$0xff]  ;;  %v3517_v49 = vadd.f32 %v1252_v44, %v1251_v5  ;;  %v1038_v43 = vrot.slane %v3461_v7, 4 }
 0x17d   : > { %4121 = vst [vmem:[#allocation46_spill] sm:$0xff] %v3483_v0  ;;  %4129 = vst [vmem:[#allocation54_spill] sm:$0xff] %v3499_v1  ;;  %v3513_v53 = vld [vmem:[#allocation6 + $0x320] sm:$0xff]  ;;  %v3515_v0 = vadd.f32 %v1204_v45, %v1203_v4  ;;  %v3519_v18 = vadd.f32 %v1300_v47, %v1299_v6  ;;  %v3521_v41 = vld [vmem:[#allocation6 + $0x328] sm:$0xff]  ;;  %v3528_v51 = vadd.f32 %v1348_v24, %v1347_v10  ;;  %v1086_v44 = vrot.slane %v3463_v25, 4 }
 0x17e   : > { %4130 = vst [vmem:[#allocation55_spill] sm:$0xff] %v3501_v52  ;;  %4131 = vst [vmem:[#allocation56_spill] sm:$0xff] %v3503_v3  ;;  %v986_v17 = vld [vmem:[#allocation2 + $0x120] sm:$0xff]  ;;  %v3523_v62 = vld [vmem:[#allocation6 + $0x2b0] sm:$0xff]  ;;  %v1134_v47 = vrot.slane %v970_v2, 4  ;;  %v1039_v24 = vadd.f32 %v1038_v43, %v3461_v7 }
 0x17f   : > { %4132 = vst [vmem:[#allocation57_spill] sm:$0xff] %v3505_v31  ;;  %4133 = vst [vmem:[#allocation58_spill] sm:$0xff] %v3507_v8  ;;  %v3525_v40 = vld [vmem:[#allocation6 + $0x2b8] sm:$0xff]  ;;  %v3530_v46 = vld [vmem:[#allocation6 + $0x3b0] sm:$0xff]  ;;  %v1230_v31 = vrot.slane %v986_v17, 4 }
 0x180   : > { %4134 = vst [vmem:[#allocation59_spill] sm:$0xff] %v3509_v9  ;;  %4135 = vst [vmem:[#allocation60_spill] sm:$0xff] %v3511_v42  ;;  %v3532_v59 = vld [vmem:[#allocation6 + $0x3b8] sm:$0xff]  ;;  %v3534_v4 = vld [vmem:[#allocation6 + $0x230] sm:$0xff]  ;;  %v1087_v9 = vadd.f32 %v1086_v44, %v3463_v25  ;;  %v1135_v52 = vadd.f32 %v1134_v47, %v970_v2 }
 0x181   : > { %4136 = vst [vmem:[#allocation61_spill] sm:$0xff] %v3513_v53  ;;  %4137 = vst [vmem:[#allocation62_spill] sm:$0xff] %v3515_v0  ;;  %v3536_v5 = vld [vmem:[#allocation6 + $0x238] sm:$0xff]  ;;  %v3538_v6 = vld [vmem:[#allocation6 + $0x330] sm:$0xff] }
 0x182   : > { %4138 = vst [vmem:[#allocation63_spill] sm:$0xff] %v3517_v49  ;;  %4139 = vst [vmem:[#allocation64_spill] sm:$0xff] %v3519_v18  ;;  %v3540_v23 = vld [vmem:[#allocation6 + $0x338] sm:$0xff]  ;;  %v994_v45 = vld [vmem:[#allocation2 + $0x160] sm:$0xff]  ;;  %v1182_v18 = vrot.slane %v978_v60, 4  ;;  %v3543_v49 = vadd.f32 %v1396_v50, %v1395_v32 }
 0x183   : > { %4140 = vst [vmem:[#allocation65_spill] sm:$0xff] %v3521_v41  ;;  %4141 = vst [vmem:[#allocation66_spill] sm:$0xff] %v3523_v62  ;;  %v3551_v3 = vld [vmem:[#allocation6 + $0x2c8] sm:$0xff]  ;;  %v3553_v0 = vld [vmem:[#allocation6 + $0x3c0] sm:$0xff]  ;;  %v1278_v11 = vrot.slane %v994_v45, 4 }
 0x184   : > { %4142 = vst [vmem:[#allocation67_spill] sm:$0xff] %v3525_v40  ;;  %4143 = vst [vmem:[#allocation68_spill] sm:$0xff] %v3528_v51  ;;  %v3549_v51 = vld [vmem:[#allocation6 + $0x2c0] sm:$0xff]  ;;  %v3555_v8 = vld [vmem:[#allocation6 + $0x3c8] sm:$0xff]  ;;  %v1183_v53 = vadd.f32 %v1182_v18, %v978_v60  ;;  %v1231_v40 = vadd.f32 %v1230_v31, %v986_v17  ;;  %v1040_v31 = vrot.slane %v1039_v24, 2 }
 0x185   : > { %4144 = vst [vmem:[#allocation69_spill] sm:$0xff] %v3530_v46  ;;  %4145 = vst [vmem:[#allocation70_spill] sm:$0xff] %v3532_v59  ;;  %v3565_v10 = vld [vmem:[#allocation6 + $0x240] sm:$0xff]  ;;  %v3577_v32 = vld [vmem:[#allocation6 + $0x2d0] sm:$0xff]  ;;  %v1279_v17 = vadd.f32 %v1278_v11, %v994_v45 }
 0x186   : > { %4146 = vst [vmem:[#allocation71_spill] sm:$0xff] %v3534_v4  ;;  %4147 = vst [vmem:[#allocation72_spill] sm:$0xff] %v3536_v5  ;;  %v3579_v50 = vld [vmem:[#allocation6 + $0x2d8] sm:$0xff]  ;;  %v3584_v54 = vld [vmem:[#allocation6 + $0x3d0] sm:$0xff]  ;;  %v1184_v60 = vrot.slane %v1183_v53, 2  ;;  %v1232_v42 = vrot.slane %v1231_v40, 2  ;;  %v1041_v18 = vadd.f32 %v1040_v31, %v1039_v24 }
 0x187   : > { %4148 = vst [vmem:[#allocation73_spill] sm:$0xff] %v3538_v6  ;;  %4149 = vst [vmem:[#allocation74_spill] sm:$0xff] %v3540_v23  ;;  %v3586_v57 = vld [vmem:[#allocation6 + $0x3d8] sm:$0xff]  ;;  %v1002_v39 = vld [vmem:[#allocation2 + $0x1a0] sm:$0xff] }
 0x188   : > { %4150 = vst [vmem:[#allocation75_spill] sm:$0xff] %v3543_v49  ;;  %4151 = vst [vmem:[#allocation76_spill] sm:$0xff] %v3549_v51  ;;  %v3567_v49 = vld [vmem:[#allocation6 + $0x248] sm:$0xff]  ;;  %v3595_v43 = vld [vmem:[#allocation6 + $0x250] sm:$0xff]  ;;  %v1326_v41 = vrot.slane %v1002_v39, 4  ;;  %v1185_v59 = vadd.f32 %v1184_v60, %v1183_v53  ;;  %v1042_v37 = vrot.slane %v1041_v18, 1 }
 0x189   : > { %4152 = vst [vmem:[#allocation77_spill] sm:$0xff] %v3551_v3  ;;  %4153 = vst [vmem:[#allocation78_spill] sm:$0xff] %v3553_v0  ;;  %v3597_v1 = vld [vmem:[#allocation6 + $0x258] sm:$0xff]  ;;  %v3599_v62 = vld [vmem:[#allocation6 + $0x350] sm:$0xff] }
 0x18a   : > { %4154 = vst [vmem:[#allocation79_spill] sm:$0xff] %v3555_v8  ;;  %4155 = vst [vmem:[#allocation80_spill] sm:$0xff] %v3565_v10  ;;  %v3609_v44 = vld [vmem:[#allocation6 + $0x358] sm:$0xff]  ;;  %v956_v47 = vld [vmem:[#allocation2 + $0x30] sm:$0xff]  ;;  %v1088_v10 = vrot.slane %v1087_v9, 2 }
 0x18b   : > { %4156 = vst [vmem:[#allocation81_spill] sm:$0xff] %v3567_v49  ;;  %4159 = vst [vmem:[#allocation84_spill] sm:$0xff] %v3577_v32  ;;  %v964_v7 = vld [vmem:[#allocation2 + $0x70] sm:$0xff]  ;;  %v1010_v2 = vld [vmem:[#allocation2 + $0x1e0] sm:$0xff]  ;;  %v1136_v49 = vrot.slane %v1135_v52, 2  ;;  %v1050_v11 = vrot.slane %v956_v47, 4 }
 0x18c   : > { %4160 = vst [vmem:[#allocation85_spill] sm:$0xff] %v3579_v50  ;;  %4161 = vst [vmem:[#allocation86_spill] sm:$0xff] %v3584_v54  ;;  %v972_v25 = vld [vmem:[#allocation2 + $0xb0] sm:$0xff]  ;;  %v1098_v0 = vrot.slane %v964_v7, 4  ;;  %v1280_v54 = vrot.slane %v1279_v17, 2  ;;  %v1374_v4 = vrot.slane %v1010_v2, 4  ;;  %v1089_v5 = vadd.f32 %v1088_v10, %v1087_v9 }
 0x18d   : > { %4162 = vst [vmem:[#allocation87_spill] sm:$0xff] %v3586_v57  ;;  %4163 = vst [vmem:[#allocation88_spill] sm:$0xff] %v3595_v43  ;;  %v980_v6 = vld [vmem:[#allocation2 + $0xf0] sm:$0xff]  ;;  %v1146_v8 = vrot.slane %v972_v25, 4  ;;  %v1327_v57 = vadd.f32 %v1326_v41, %v1002_v39  ;;  %v1137_v46 = vadd.f32 %v1136_v49, %v1135_v52  ;;  %v1233_v43 = vadd.f32 %v1232_v42, %v1231_v40 }
 0x18e   : > { %4164 = vst [vmem:[#allocation89_spill] sm:$0xff] %v3597_v1  ;;  %4165 = vst [vmem:[#allocation90_spill] sm:$0xff] %v3599_v62  ;;  %v988_v23 = vld [vmem:[#allocation2 + $0x130] sm:$0xff]  ;;  %v1194_v51 = vrot.slane %v980_v6, 4  ;;  %v1051_v1 = vadd.f32 %v1050_v11, %v956_v47  ;;  %v3619_v38 = vadd.f32 %v1280_v54, %v1279_v17  ;;  %v3621_v24 = vadd.f32 %v1374_v4, %v1010_v2 }
 0x18f   : > { %4166 = vst [vmem:[#allocation91_spill] sm:$0xff] %v3609_v44  ;;  %v996_v32 = vld [vmem:[#allocation2 + $0x170] sm:$0xff]  ;;  %v1242_v3 = vrot.slane %v988_v23, 4  ;;  %v1099_v44 = vadd.f32 %v1098_v0, %v964_v7  ;;  %v1147_v14 = vadd.f32 %v1146_v8, %v972_v25  ;;  %v1328_v48 = vrot.slane %v1327_v57, 2 }
 0x190   : > { %v1004_v45 = vld [vmem:[#allocation2 + $0x1b0] sm:$0xff]  ;;  %v1290_v56 = vrot.slane %v996_v32, 4  ;;  %v1195_v55 = vadd.f32 %v1194_v51, %v980_v6  ;;  %v1090_v39 = vrot.slane %v1089_v5, 1  ;;  %v1138_v41 = vrot.slane %v1137_v46, 1 }
 0x191   : > { %v1012_v50 = vld [vmem:[#allocation2 + $0x1f0] sm:$0xff]  ;;  %v1338_v61 = vrot.slane %v1004_v45, 4  ;;  %v1243_v63 = vadd.f32 %v1242_v3, %v988_v23  ;;  %v1186_v9 = vrot.slane %v1185_v59, 1  ;;  %v1234_v52 = vrot.slane %v1233_v43, 1 }
 0x192   : > { %v1386_v62 = vrot.slane %v1012_v50, 4  ;;  %v1291_v49 = vadd.f32 %v1290_v56, %v996_v32  ;;  %v1052_v53 = vrot.slane %v1051_v1, 2  ;;  %v1100_v0 = vrot.slane %v1099_v44, 2 }
 0x193   : > { %v3623_v42 = vadd.f32 %v1338_v61, %v1004_v45  ;;  %v1148_v8 = vrot.slane %v1147_v14, 2  ;;  %v1196_v3 = vrot.slane %v1195_v55, 2  ;;  %v1244_v51 = vrot.slane %v1243_v63, 2 }
 0x194   : > { %v3625_v40 = vadd.f32 %v1386_v62, %v1012_v50  ;;  %v3627_v54 = vadd.f32 %v1042_v37, %v1041_v18  ;;  %v1282_v4 = vrot.slane %v3619_v38, 1  ;;  %v3630_v6 = vadd.f32 %v1328_v48, %v1327_v57 }
 0x195   : > { %v1376_v56 = vrot.slane %v3621_v24, 2  ;;  %v3633_v23 = vadd.f32 %v1090_v39, %v1089_v5  ;;  %v3635_v61 = vadd.f32 %v1138_v41, %v1137_v46  ;;  %v3637_v62 = vadd.f32 %v1186_v9, %v1185_v59 }
 0x196   : > { %v1292_v10 = vrot.slane %v1291_v49, 2  ;;  %v3639_v32 = vadd.f32 %v1234_v52, %v1233_v43  ;;  %v3641_v50 = vadd.f32 %v1052_v53, %v1051_v1  ;;  %v1340_v37 = vrot.slane %v3623_v42, 2 }
 0x197   : > { %v1388_v48 = vrot.slane %v3625_v40, 2  ;;  %v3647_v7 = vadd.f32 %v1100_v0, %v1099_v44  ;;  %v3649_v5 = vadd.f32 %v1148_v8, %v1147_v14  ;;  %v3651_v46 = vadd.f32 %v1196_v3, %v1195_v55  ;;  %v4167_v0 = vld [vmem:[#allocation18_spill] sm:$0xff]  ;;  %v4168_v3 = vld [vmem:[#allocation19_spill] sm:$0xff] }
 0x198   : > { %v3653_v59 = vadd.f32 %v1244_v51, %v1243_v63  ;;  %v3676_v2 = vadd.f32 %v1292_v10, %v1291_v49 }
 0x19f   : > { %v3645_v57 = vpop.permute.xlu0 %1401 }
 0x1a0   : > { %v3656_v43 = vrot.slane %v3645_v57, 1  ;;  %v3659_v1 = vrot.slane %v3645_v57, 2  ;;  %v3662_v25 = vrot.slane %v3645_v57, 3  ;;  %v3665_v18 = vrot.slane %v3645_v57, 4 }
 0x1a1   : > { %v3668_v14 = vrot.slane %v3645_v57, 5  ;;  %v3671_v55 = vrot.slane %v3645_v57, 6  ;;  %v3674_v63 = vrot.slane %v3645_v57, 7  ;;  %v1419_v17 = vmul.f32 %v3645_v57, %v3383_v13 }
 0x1a2   : > { %v1427_v60 = vmul.f32 %v3656_v43, %v3385_v19  ;;  %v1435_v44 = vmul.f32 %v3659_v1, %v3387_v20  ;;  %v1443_v47 = vmul.f32 %v3662_v25, %v3389_v21  ;;  %v1451_v31 = vmul.f32 %v3665_v18, %v3391_v22 }
 0x1a3   : > { %v1459_v11 = vmul.f32 %v3668_v14, %v3393_v26  ;;  %v1467_v45 = vmul.f32 %v3671_v55, %v3395_v27  ;;  %v1102_v19 = vrot.slane %v3647_v7, 1  ;;  %v1475_v20 = vmul.f32 %v3674_v63, %v3397_v28 }
 0x1a4   : > { %v1702_v39 = vrot.slane %v1427_v60, 7  ;;  %v1704_v41 = vrot.slane %v1435_v44, 6  ;;  %v1421_v21 = vmul.f32 %v3645_v57, %v3399_v29  ;;  %v1706_v22 = vrot.slane %v1443_v47, 5 }
 0x1a5   : > { %v1708_v9 = vrot.slane %v1451_v31, 4  ;;  %v1710_v49 = vrot.slane %v1459_v11, 3  ;;  %v1429_v13 = vmul.f32 %v3656_v43, %v3401_v33  ;;  %v1437_v27 = vmul.f32 %v3659_v1, %v3403_v34 }
 0x1a6   : > { %v1703_v26 = vsel %vm1682_vm1, %v1702_v39, %v1419_v17  ;;  %v1445_v52 = vmul.f32 %v3662_v25, %v3405_v35  ;;  %v1453_v28 = vmul.f32 %v3665_v18, %v3407_v36  ;;  %v1712_v29 = vrot.slane %v1467_v45, 2  ;;  %v4169_v35 = vld [vmem:[#allocation20_spill] sm:$0xff] }
 0x1a7   : > { %v1705_v53 = vsel %vm1685_vm2, %v1704_v41, %v1703_v26  ;;  %v1461_v8 = vmul.f32 %v3668_v14, %v4167_v0  ;;  %v1469_v33 = vmul.f32 %v3671_v55, %v4168_v3  ;;  %v1714_v10 = vrot.slane %v1475_v20, 1  ;;  %v4173_v0 = vld [vmem:[#allocation29_spill] sm:$0xff] }
 0x1a8   : > { %v1707_v51 = vsel %vm1688_vm3, %v1706_v22, %v1705_v53  ;;  %v1730_v60 = vrot.slane %v1429_v13, 7  ;;  %v1732_v34 = vrot.slane %v1437_v27, 6  ;;  %v1477_v47 = vmul.f32 %v3674_v63, %v4169_v35  ;;  %v4170_v27 = vld [vmem:[#allocation24_spill] sm:$0xff]  ;;  %v4174_v3 = vld [vmem:[#allocation21_spill] sm:$0xff] }
 0x1a9   : > { %v1709_v44 = vsel %vm1691_vm4, %v1708_v9, %v1707_v51  ;;  %v1734_v36 = vrot.slane %v1445_v52, 5  ;;  %v1736_v31 = vrot.slane %v1453_v28, 4  ;;  %v1738_v45 = vrot.slane %v1461_v8, 3 }
 0x1aa   : > { %v1711_v17 = vsel %vm1694_vm5, %v1710_v49, %v1709_v44  ;;  %v1731_v11 = vsel %vm1682_vm1, %v1730_v60, %v1421_v21  ;;  %v1740_v39 = vrot.slane %v1469_v33, 2  ;;  %v1426_v20 = vmul.f32 %v3656_v43, %v3421_v12  ;;  %v4171_v21 = vld [vmem:[#allocation25_spill] sm:$0xff] }
 0x1ab   : > { %v1713_v41 = vsel %vm1697_vm6, %v1712_v29, %v1711_v17  ;;  %v1733_v22 = vsel %vm1685_vm2, %v1732_v34, %v1731_v11  ;;  %v1434_v9 = vmul.f32 %v3659_v1, %v3423_v16  ;;  %v1442_v49 = vmul.f32 %v3662_v25, %v4170_v27  ;;  %v4172_v29 = vld [vmem:[#allocation28_spill] sm:$0xff]  ;;  %v4175_v34 = vld [vmem:[#allocation30_spill] sm:$0xff]  ;;  %v4179_v27 = vld [vmem:[#allocation35_spill] sm:$0xff] }
 0x1ac   : > { %v1715_v13 = vsel %vm1700_vm7, %v1714_v10, %v1713_v41  ;;  %v1735_v26 = vsel %vm1688_vm3, %v1734_v36, %v1733_v22  ;;  %v1450_v52 = vmul.f32 %v3665_v18, %v4171_v21  ;;  %v1742_v53 = vrot.slane %v1477_v47, 1  ;;  %v4176_v41 = vld [vmem:[#allocation32_spill] sm:$0xff] }
 0x1ad   : > { %1872 = vmatprep.mubr.f32.mxu0 %v1715_v13  ;;  %v1737_v28 = vsel %vm1691_vm4, %v1736_v31, %v1735_v26  ;;  %v1458_v12 = vmul.f32 %v3668_v14, %v4172_v29  ;;  %v1466_v16 = vmul.f32 %v3671_v55, %v4173_v0  ;;  %v1418_v33 = vmul.f32 %v3645_v57, %v4174_v3  ;;  %v4180_v21 = vld [vmem:[#allocation36_spill] sm:$0xff] }
 0x1ae   : > { %v1739_v8 = vsel %vm1694_vm5, %v1738_v45, %v1737_v28  ;;  %v1681_v51 = vrot.slane %v1426_v20, 7  ;;  %v1684_v10 = vrot.slane %v1434_v9, 6  ;;  %v1474_v44 = vmul.f32 %v3674_v63, %v4175_v34  ;;  %v4177_v20 = vld [vmem:[#allocation33_spill] sm:$0xff]  ;;  %v4178_v9 = vld [vmem:[#allocation34_spill] sm:$0xff] }
 0x1af   : > { %v1741_v60 = vsel %vm1697_vm6, %v1740_v39, %v1739_v8  ;;  %v1687_v35 = vrot.slane %v1442_v49, 5  ;;  %v1690_v47 = vrot.slane %v1450_v52, 4  ;;  %v1693_v17 = vrot.slane %v1458_v12, 3  ;;  %v4181_v28 = vld [vmem:[#allocation37_spill] sm:$0xff]  ;;  %v4182_v12 = vld [vmem:[#allocation31_spill] sm:$0xff] }
 0x1b0   : > { %v1743_v36 = vsel %vm1700_vm7, %v1742_v53, %v1741_v60  ;;  %v1683_v31 = vsel %vm1682_vm1, %v1681_v51, %v1418_v33  ;;  %v1696_v11 = vrot.slane %v1466_v16, 2  ;;  %v1428_v22 = vmul.f32 %v3656_v43, %v4176_v41  ;;  %v4183_v51 = vld [vmem:[#allocation38_spill] sm:$0xff] }
 0x1b1   : > { %1942 = vmatprep.mubr.f32.mxu1 %v1743_v36  ;;  %v1686_v45 = vsel %vm1685_vm2, %v1684_v10, %v1683_v31  ;;  %v1436_v39 = vmul.f32 %v3659_v1, %v4177_v20  ;;  %v1444_v13 = vmul.f32 %v3662_v25, %v4178_v9  ;;  %v1452_v49 = vmul.f32 %v3665_v18, %v4179_v27  ;;  %v4184_v20 = vld [vmem:[#allocation44_spill] sm:$0xff]  ;;  %v4186_v27 = vld [vmem:[#allocation22_spill] sm:$0xff] }
 0x1b2   : > { %v1689_v26 = vsel %vm1688_vm3, %v1687_v35, %v1686_v45  ;;  %v1460_v52 = vmul.f32 %v3668_v14, %v4180_v21  ;;  %v1468_v53 = vmul.f32 %v3671_v55, %v4181_v28  ;;  %v1420_v0 = vmul.f32 %v3645_v57, %v4182_v12 }
 0x1b3   : > { %v1692_v29 = vsel %vm1691_vm4, %v1690_v47, %v1689_v26  ;;  %v1716_v16 = vrot.slane %v1428_v22, 7  ;;  %v1718_v8 = vrot.slane %v1436_v39, 6  ;;  %v1699_v33 = vrot.slane %v1474_v44, 1  ;;  %v4185_v26 = vld [vmem:[#allocation23_spill] sm:$0xff] }
 0x1b4   : > { %v1695_v3 = vsel %vm1694_vm5, %v1693_v17, %v1692_v29  ;;  %v1476_v10 = vmul.f32 %v3674_v63, %v4183_v51  ;;  %v1720_v60 = vrot.slane %v1444_v13, 5  ;;  %v1722_v36 = vrot.slane %v1452_v49, 4 }
 0x1b5   : > { %v1698_v34 = vsel %vm1697_vm6, %v1696_v11, %v1695_v3  ;;  %v1717_v35 = vsel %vm1682_vm1, %v1716_v16, %v1420_v0  ;;  %v1724_v31 = vrot.slane %v1460_v52, 3  ;;  %v1726_v41 = vrot.slane %v1468_v53, 2  ;;  %v4189_v52 = vld [vmem:[#allocation45_spill] sm:$0xff]  ;;  %v4190_v53 = vld [vmem:[#allocation46_spill] sm:$0xff]  ;;  %v4192_v16 = vld [vmem:[#allocation40_spill] sm:$0xff] }
 0x1b6   : > { %v1701_v47 = vsel %vm1700_vm7, %v1699_v33, %v1698_v34  ;;  %v1719_v45 = vsel %vm1685_vm2, %v1718_v8, %v1717_v35  ;;  %v1431_v22 = vmul.f32 %v3656_v43, %v3465_v30  ;;  %v1439_v17 = vmul.f32 %v3659_v1, %v3467_v15  ;;  %v4188_v30 = vld [vmem:[#allocation39_spill] sm:$0xff]  ;;  %v4191_v0 = vld [vmem:[#allocation41_spill] sm:$0xff] }
 0x1b7   : > { %1873 = vmatmul.mubr.f32.vlgmr.msra.gmra.mrb[0].mxu0 %v1701_v47  ;;  %v1721_v44 = vsel %vm1688_vm3, %v1720_v60, %v1719_v45  ;;  %v1447_v11 = vmul.f32 %v3662_v25, %v3469_v58  ;;  %v1455_v39 = vmul.f32 %v3665_v18, %v4184_v20  ;;  %v1728_v13 = vrot.slane %v1476_v10, 1  ;;  %v4194_v33 = vld [vmem:[#allocation55_spill] sm:$0xff]  ;;  %v4195_v45 = vld [vmem:[#allocation57_spill] sm:$0xff] }
 0x1b8   : > { %v1723_v9 = vsel %vm1691_vm4, %v1722_v36, %v1721_v44  ;;  %v4187_v49 = vpack.c.bf16 %v4185_v26, %v4186_v27  ;;  %v1423_v21 = vmul.f32 %v3645_v57, %v4188_v30  ;;  %v1463_v28 = vmul.f32 %v3668_v14, %v4189_v52  ;;  %v4196_v44 = vld [vmem:[#allocation58_spill] sm:$0xff]  ;;  %v4198_v20 = vld [vmem:[#allocation27_spill] sm:$0xff]  ;;  %v4201_v27 = vld [vmem:[#allocation56_spill] sm:$0xff] }
 0x1b9   : > { %v1725_v15 = vsel %vm1694_vm5, %v1724_v31, %v1723_v9  ;;  %v1471_v58 = vmul.f32 %v3671_v55, %v4190_v53  ;;  %v1758_v29 = vrot.slane %v1431_v22, 7  ;;  %v1760_v12 = vrot.slane %v1439_v17, 6  ;;  %v4197_v17 = vld [vmem:[#allocation62_spill] sm:$0xff]  ;;  %v4202_v30 = vld [vmem:[#allocation63_spill] sm:$0xff] }
 0x1ba   : > { %2448 = vmatpush3.bf16.msra.mxu0 %v4187_v49  ;;  %v4193_v8 = vpack.c.bf16 %v4191_v0, %v4192_v16  ;;  %v1727_v3 = vsel %vm1697_vm6, %v1726_v41, %v1725_v15  ;;  %v1479_v51 = vmul.f32 %v3674_v63, %v4194_v33  ;;  %v1762_v10 = vrot.slane %v1447_v11, 5  ;;  %v4199_v9 = vld [vmem:[#allocation26_spill] sm:$0xff] }
 0x1bb   : > { %v1150_v60 = vrot.slane %v3649_v5, 1  ;;  %v1729_v34 = vsel %vm1700_vm7, %v1728_v13, %v1727_v3  ;;  %v1759_v35 = vsel %vm1682_vm1, %v1758_v29, %v1423_v21  ;;  %v1764_v36 = vrot.slane %v1455_v39, 4  ;;  %v4205_v0 = vld [vmem:[#allocation42_spill] sm:$0xff]  ;;  %v4208_v3 = vld [vmem:[#allocation47_spill] sm:$0xff] }
 0x1bc   : > { %2450 = vmatprep.subr.bf16.mxu0 %v4193_v8  ;;  %v1766_v31 = vrot.slane %v1463_v28, 3  ;;  %1943 = vmatmul.mubr.f32.vlgmr.msra.gmra.mrb[0].mxu1 %v1729_v34  ;;  %v1761_v47 = vsel %vm1685_vm2, %v1760_v12, %v1759_v35  ;;  %v1433_v22 = vmul.f32 %v3656_v43, %v4195_v45  ;;  %v1441_v41 = vmul.f32 %v3659_v1, %v4196_v44  ;;  %v4203_v28 = vld [vmem:[#allocation64_spill] sm:$0xff]  ;;  %v4204_v12 = vld [vmem:[#allocation43_spill] sm:$0xff] }
 0x1bd   : > { %v1449_v11 = vmul.f32 %v3662_v25, %v4197_v17  ;;  %v4200_v26 = vpack.c.bf16 %v4198_v20, %v4199_v9  ;;  %v1763_v13 = vsel %vm1688_vm3, %v1762_v10, %v1761_v47  ;;  %v1768_v39 = vrot.slane %v1471_v58, 2  ;;  %v4207_v8 = vld [vmem:[#allocation48_spill] sm:$0xff]  ;;  %v4212_v47 = vld [vmem:[#allocation51_spill] sm:$0xff] }
 0x1be   : > { %v1425_v49 = vmul.f32 %v3645_v57, %v4201_v27  ;;  %v1457_v21 = vmul.f32 %v3665_v18, %v4202_v30  ;;  %v1765_v52 = vsel %vm1691_vm4, %v1764_v36, %v1763_v13  ;;  %v1465_v15 = vmul.f32 %v3668_v14, %v4203_v28  ;;  %v4210_v34 = vld [vmem:[#allocation68_spill] sm:$0xff]  ;;  %v4215_v13 = vld [vmem:[#allocation50_spill] sm:$0xff]  ;;  %v4216_v27 = vld [vmem:[#allocation49_spill] sm:$0xff] }
 0x1bf   : > { %2480 = vmatpush3.bf16.msra.mxu1 %v4200_v26  ;;  %v1786_v53 = vrot.slane %v1433_v22, 7  ;;  %v1788_v29 = vrot.slane %v1441_v41, 6  ;;  %v4206_v16 = vpack.c.bf16 %v4204_v12, %v4205_v0  ;;  %v4209_v58 = vpack.c.bf16 %v4207_v8, %v4208_v3  ;;  %v4211_v36 = vld [vmem:[#allocation52_spill] sm:$0xff]  ;;  %v4214_v41 = vld [vmem:[#allocation75_spill] sm:$0xff]  ;;  %v4218_v12 = vld [vmem:[#allocation54_spill] sm:$0xff] }
 0x1c0   : > { %v1767_v33 = vsel %vm1694_vm5, %v1766_v31, %v1765_v52  ;;  %v1770_v10 = vrot.slane %v1479_v51, 1  ;;  %v1473_v35 = vmul.f32 %v3671_v55, %v4210_v34  ;;  %v4213_v45 = vpack.c.bf16 %v4211_v36, %v4212_v47  ;;  %v4219_v0 = vld [vmem:[#allocation53_spill] sm:$0xff]  ;;  %v4222_v8 = vld [vmem:[#allocation59_spill] sm:$0xff] }
 0x1c1   : > { %2482 = vmatprep.subr.bf16.mxu1 %v4206_v16  ;;  %2452 = vmatpush3.bf16.msra.mxu0 %v4209_v58  ;;  %v1198_v22 = vrot.slane %v3651_v46, 1  ;;  %v1769_v44 = vsel %vm1697_vm6, %v1768_v39, %v1767_v33  ;;  %v1481_v17 = vmul.f32 %v3674_v63, %v4214_v41  ;;  %v1787_v20 = vsel %vm1682_vm1, %v1786_v53, %v1425_v49  ;;  %v4221_v16 = vld [vmem:[#allocation60_spill] sm:$0xff] }
 0x1c2   : > { %2454 = vmatprep.subr.bf16.mxu0 %v4213_v45  ;;  %v1790_v9 = vrot.slane %v1449_v11, 5  ;;  %v1771_v31 = vsel %vm1700_vm7, %v1770_v10, %v1769_v44  ;;  %v1789_v51 = vsel %vm1685_vm2, %v1788_v29, %v1787_v20  ;;  %v1792_v26 = vrot.slane %v1457_v21, 4  ;;  %v4224_v10 = vld [vmem:[#allocation67_spill] sm:$0xff]  ;;  %v4227_v45 = vld [vmem:[#allocation65_spill] sm:$0xff] }
 0x1c3   : > { %v4217_v30 = vpack.c.bf16 %v4215_v13, %v4216_v27  ;;  %v1430_v52 = vmul.f32 %v3656_v43, %v3633_v23  ;;  %2012 = vmatprep.mubr.f32.mxu0 %v1771_v31  ;;  %v1794_v28 = vrot.slane %v1465_v15, 3  ;;  %v4220_v49 = vpack.c.bf16 %v4218_v12, %v4219_v0  ;;  %v4228_v44 = vld [vmem:[#allocation61_spill] sm:$0xff]  ;;  %v4239_v0 = vld [vmem:[#allocation74_spill] sm:$0xff] }
 0x1c4   : > { %v1791_v39 = vsel %vm1688_vm3, %v1790_v9, %v1789_v51  ;;  %v1438_v11 = vmul.f32 %v3659_v1, %v3635_v61  ;;  %v1054_v21 = vrot.slane %v3641_v50, 1  ;;  %v1796_v29 = vrot.slane %v1473_v35, 2  ;;  %v4225_v61 = vld [vmem:[#allocation66_spill] sm:$0xff]  ;;  %v4231_v31 = vld [vmem:[#allocation69_spill] sm:$0xff] }
 0x1c5   : > { %2484 = vmatpush3.bf16.msra.mxu1 %v4217_v30  ;;  %v1793_v53 = vsel %vm1691_vm4, %v1792_v26, %v1791_v39  ;;  %v4223_v3 = vpack.c.bf16 %v4221_v16, %v4222_v8  ;;  %v1103_v23 = vadd.f32 %v1102_v19, %v3647_v7  ;;  %v1246_v15 = vrot.slane %v3653_v59, 1  ;;  %v4230_v9 = vld [vmem:[#allocation70_spill] sm:$0xff]  ;;  %v4236_v30 = vld [vmem:[#allocation77_spill] sm:$0xff] }
 0x1c6   : > { %2486 = vmatprep.subr.bf16.mxu1 %v4220_v49  ;;  %v1795_v58 = vsel %vm1694_vm5, %v1794_v28, %v1793_v53  ;;  %v1798_v33 = vrot.slane %v1481_v17, 1  ;;  %v4226_v34 = vpack.c.bf16 %v4224_v10, %v4225_v61  ;;  %v1744_v36 = vrot.slane %v1430_v52, 7  ;;  %v4237_v52 = vld [vmem:[#allocation76_spill] sm:$0xff]  ;;  %v4240_v49 = vld [vmem:[#allocation73_spill] sm:$0xff]  ;;  %v4243_v16 = vld [vmem:[#allocation78_spill] sm:$0xff] }
 0x1c7   : > { %2456 = vmatpush3.bf16.msra.mxu0 %v4223_v3  ;;  %v1151_v35 = vadd.f32 %v1150_v60, %v3649_v5  ;;  %v1797_v47 = vsel %vm1697_vm6, %v1796_v29, %v1795_v58  ;;  %v4229_v41 = vpack.c.bf16 %v4227_v45, %v4228_v44  ;;  %v1422_v7 = vmul.f32 %v3645_v57, %v3627_v54  ;;  %v4233_v54 = vld [vmem:[#allocation72_spill] sm:$0xff]  ;;  %v4242_v29 = vld [vmem:[#allocation79_spill] sm:$0xff]  ;;  %v4248_v61 = vld [vmem:[#allocation85_spill] sm:$0xff] }
 0x1c8   : > { %2458 = vmatprep.subr.bf16.mxu0 %v4226_v34  ;;  %v1199_v19 = vadd.f32 %v1198_v22, %v3651_v46  ;;  %v1341_v17 = vadd.f32 %v1340_v37, %v3623_v42  ;;  %v1799_v20 = vsel %vm1700_vm7, %v1798_v33, %v1797_v47  ;;  %v4232_v5 = vpack.c.bf16 %v4230_v9, %v4231_v31  ;;  %v4234_v46 = vld [vmem:[#allocation71_spill] sm:$0xff]  ;;  %v4249_v34 = vld [vmem:[#allocation84_spill] sm:$0xff]  ;;  %v1559_v47 = vld [vmem:[#allocation6 + $0x268] sm:$0xff] }
 0x1c9   : > { %2488 = vmatpush3.bf16.msra.mxu1 %v4229_v41  ;;  %v1377_v60 = vadd.f32 %v1376_v56, %v3621_v24  ;;  %v1746_v51 = vrot.slane %v1438_v11, 6  ;;  %v1055_v26 = vadd.f32 %v1054_v21, %v3641_v50  ;;  %2082 = vmatprep.mubr.f32.mxu1 %v1799_v20  ;;  %v4235_v22 = vpack.c.bf16 %v4233_v54, %v4234_v46  ;;  %v1574_v56 = vld [vmem:[#allocation6 + $0x2e0] sm:$0xff]  ;;  %v1575_v50 = vld [vmem:[#allocation6 + $0x2e8] sm:$0xff]  ;;  %v1576_v9 = vld [vmem:[#allocation6 + $0x2f0] sm:$0xff] }
 0x1ca   : > { %2490 = vmatprep.subr.bf16.mxu1 %v4232_v5  ;;  %v1446_v42 = vmul.f32 %v3662_v25, %v3637_v62  ;;  %v1745_v37 = vsel %vm1682_vm1, %v1744_v36, %v1422_v7  ;;  %v1294_v13 = vrot.slane %v3676_v2, 1  ;;  %v1432_v27 = vmul.f32 %v3656_v43, %v1103_v23  ;;  %v4245_v23 = vld [vmem:[#allocation81_spill] sm:$0xff]  ;;  %v4251_v7 = vld [vmem:[#allocation83_spill] sm:$0xff] }
 0x1cb   : > { %2460 = vmatpush3.bf16.msra.mxu0 %v4235_v22  ;;  %v4238_v24 = vpack.c.bf16 %v4236_v30, %v4237_v52  ;;  %v1330_v39 = vrot.slane %v3630_v6, 1  ;;  %v1247_v28 = vadd.f32 %v1246_v15, %v3653_v59  ;;  %v1389_v62 = vadd.f32 %v1388_v48, %v3625_v40  ;;  %v4246_v15 = vld [vmem:[#allocation80_spill] sm:$0xff]  ;;  %v1577_v31 = vld [vmem:[#allocation6 + $0x2f8] sm:$0xff] }
 0x1cc   : > { %v1440_v12 = vmul.f32 %v3659_v1, %v1151_v35  ;;  %v4241_v11 = vpack.c.bf16 %v4239_v0, %v4240_v49  ;;  %v1283_v43 = vadd.f32 %v1282_v4, %v3619_v38  ;;  %v1454_v21 = vmul.f32 %v3665_v18, %v3639_v32  ;;  %v1606_v4 = vld [vmem:[#allocation6 + $0x3e0] sm:$0xff]  ;;  %v1607_v32 = vld [vmem:[#allocation6 + $0x3e8] sm:$0xff]  ;;  %v4254_v54 = vld [vmem:[#allocation87_spill] sm:$0xff] }
 0x1cd   : > { %2462 = vmatprep.subr.bf16.mxu0 %v4238_v24  ;;  %v1342_v53 = vrot.slane %v1341_v17, 1  ;;  %v1448_v59 = vmul.f32 %v3662_v25, %v1199_v19  ;;  %v4244_v8 = vpack.c.bf16 %v4242_v29, %v4243_v16  ;;  %v1747_v40 = vsel %vm1685_vm2, %v1746_v51, %v1745_v37  ;;  %v1558_v35 = vld [vmem:[#allocation6 + $0x260] sm:$0xff]  ;;  %v4252_v19 = vld [vmem:[#allocation82_spill] sm:$0xff] }
 0x1ce   : > { %2492 = vmatpush3.bf16.msra.mxu1 %v4241_v11  ;;  %v1424_v48 = vmul.f32 %v3645_v57, %v1055_v26  ;;  %v1772_v1 = vrot.slane %v1432_v27, 7  ;;  %v1774_v3 = vrot.slane %v1440_v12, 6  ;;  %v4247_v58 = vpack.c.bf16 %v4245_v23, %v4246_v15  ;;  %v1590_v22 = vld [vmem:[#allocation6 + $0x360] sm:$0xff]  ;;  %v4257_v27 = vld [vmem:[#allocation89_spill] sm:$0xff]  ;;  %v1560_v49 = vld [vmem:[#allocation6 + $0x270] sm:$0xff] }
 0x1cf   : > { %2494 = vmatprep.subr.bf16.mxu1 %v4244_v8  ;;  %v2469_v38 = vpack.c.bf16 %v1575_v50, %v1574_v56  ;;  %v1378_v33 = vrot.slane %v1377_v60, 1  ;;  %v1748_v10 = vrot.slane %v1446_v42, 5  ;;  %v1295_v25 = vadd.f32 %v1294_v13, %v3676_v2  ;;  %v1591_v42 = vld [vmem:[#allocation6 + $0x368] sm:$0xff]  ;;  %v4258_v30 = vld [vmem:[#allocation88_spill] sm:$0xff]  ;;  %v1608_v56 = vld [vmem:[#allocation6 + $0x3f0] sm:$0xff] }
 0x1d0   : > { %2464 = vmatpush3.bf16.msra.mxu0 %v4247_v58  ;;  %v4250_v36 = vpack.c.bf16 %v4248_v61, %v4249_v34  ;;  %v1331_v57 = vadd.f32 %v1330_v39, %v3630_v6  ;;  %v1390_v45 = vrot.slane %v1389_v62, 1  ;;  %v1456_v44 = vmul.f32 %v3665_v18, %v1247_v28  ;;  %v4255_v6 = vld [vmem:[#allocation86_spill] sm:$0xff]  ;;  %v1609_v50 = vld [vmem:[#allocation6 + $0x3f8] sm:$0xff] }
 0x1d1   : > { %v1773_v41 = vsel %vm1682_vm1, %v1772_v1, %v1424_v48  ;;  %v4253_v20 = vpack.c.bf16 %v4251_v7, %v4252_v19  ;;  %v1462_v2 = vmul.f32 %v3668_v14, %v1283_v43  ;;  %v1749_v5 = vsel %vm1688_vm3, %v1748_v10, %v1747_v40  ;;  %v1561_v11 = vld [vmem:[#allocation6 + $0x278] sm:$0xff]  ;;  %v1592_v40 = vld [vmem:[#allocation6 + $0x370] sm:$0xff] }
 0x1d2   : > { %2466 = vmatprep.subr.bf16.mxu0 %v4250_v36  ;;  %v1775_v51 = vsel %vm1685_vm2, %v1774_v3, %v1773_v41  ;;  %v1776_v26 = vrot.slane %v1448_v59, 5  ;;  %v4256_v46 = vpack.c.bf16 %v4254_v54, %v4255_v6  ;;  %v2501_v18 = vpack.c.bf16 %v1607_v32, %v1606_v4  ;;  %v4261_v59 = vld [vmem:[#allocation90_spill] sm:$0xff]  ;;  %v1593_v48 = vld [vmem:[#allocation6 + $0x378] sm:$0xff] }
 0x1d3   : > { %2496 = vmatpush3.bf16.msra.mxu1 %v4253_v20  ;;  %v1750_v37 = vrot.slane %v1454_v21, 4  ;;  %v1343_v13 = vadd.f32 %v1342_v53, %v1341_v17  ;;  %v4259_v52 = vpack.c.bf16 %v4257_v27, %v4258_v30  ;;  %v2471_v24 = vpack.c.bf16 %v1559_v47, %v1558_v35  ;;  %v4260_v53 = vld [vmem:[#allocation91_spill] sm:$0xff] }
 0x1d4   : > { %2498 = vmatprep.subr.bf16.mxu1 %v4256_v46  ;;  %v1379_v39 = vadd.f32 %v1378_v33, %v1377_v60  ;;  %v1464_v28 = vmul.f32 %v3668_v14, %v1295_v25  ;;  %v1777_v12 = vsel %vm1688_vm3, %v1776_v26, %v1775_v51  ;;  %v2473_v0 = vpack.c.bf16 %v1577_v31, %v1576_v9 }
 0x1d5   : > { %2468 = vmatpush3.bf16.msra.mxu0 %v4259_v52  ;;  %v1470_v43 = vmul.f32 %v3671_v55, %v1331_v57  ;;  %v1751_v17 = vsel %vm1691_vm4, %v1750_v37, %v1749_v5  ;;  %v1778_v21 = vrot.slane %v1456_v44, 4  ;;  %v4262_v29 = vpack.c.bf16 %v4260_v53, %v4261_v59  ;;  %v2235_v57 = vld [vmem:[%s4017_s3] ss:$0 sm:$0xff] }
 0x1d6   : > { %2470 = vmatprep.subr.bf16.mxu0 %v2469_v38  ;;  %v2503_v16 = vpack.c.bf16 %v1591_v42, %v1590_v22  ;;  %v1752_v8 = vrot.slane %v1462_v2, 3  ;;  %v1391_v60 = vadd.f32 %v1390_v45, %v1389_v62  ;;  %v2505_v14 = vpack.c.bf16 %v1609_v50, %v1608_v56 }
 0x1d7   : > { %2500 = vmatpush3.bf16.msra.mxu1 %v4262_v29  ;;  %v1472_v1 = vmul.f32 %v3671_v55, %v1343_v13  ;;  %v1779_v3 = vsel %vm1691_vm4, %v1778_v21, %v1777_v12  ;;  %v2475_v23 = vpack.c.bf16 %v1561_v11, %v1560_v49  ;;  %v1478_v15 = vmul.f32 %v3674_v63, %v1379_v39 }
 0x1d8   : > { %2502 = vmatprep.subr.bf16.mxu1 %v2501_v18  ;;  %v1753_v58 = vsel %vm1694_vm5, %v1752_v8, %v1751_v17  ;;  %v1780_v38 = vrot.slane %v1464_v28, 3  ;;  %v1754_v4 = vrot.slane %v1470_v43, 2  ;;  %v2507_v32 = vpack.c.bf16 %v1593_v48, %v1592_v40 }
 0x1d9   : > { %2472 = vmatpush3.bf16.msra.mxu0 %v2471_v24  ;;  %v1480_v62 = vmul.f32 %v3674_v63, %v1391_v60  ;;  %v1782_v10 = vrot.slane %v1472_v1, 2  ;;  %v1756_v25 = vrot.slane %v1478_v15, 1 }
 0x1da   : > { %2474 = vmatprep.subr.bf16.mxu0 %v2473_v0  ;;  %v1781_v33 = vsel %vm1694_vm5, %v1780_v38, %v1779_v3  ;;  %v1755_v55 = vsel %vm1697_vm6, %v1754_v4, %v1753_v58 }
 0x1db   : > { %2504 = vmatpush3.bf16.msra.mxu1 %v2503_v16  ;;  %v1783_v61 = vsel %vm1697_vm6, %v1782_v10, %v1781_v33  ;;  %v1757_v34 = vsel %vm1700_vm7, %v1756_v25, %v1755_v55  ;;  %v1784_v36 = vrot.slane %v1480_v62, 1 }
 0x1dc   : > { %2506 = vmatprep.subr.bf16.mxu1 %v2505_v14 }
 0x1dd   : > { %2476 = vmatpush3.bf16.msra.mxu0 %v2475_v23  ;;  %v1785_v35 = vsel %vm1700_vm7, %v1784_v36, %v1783_v61 }
 0x1df   : > { %2508 = vmatpush3.bf16.msra.mxu1 %v2507_v32 }
 0x1e0   : > { %2013 = vmatmul.mubr.f32.vlgmr.msra.gmra.mrb[2].mxu0 %v1757_v34 }
 0x1e2   : > { %2083 = vmatmul.mubr.f32.vlgmr.msra.gmra.mrb[2].mxu1 %v1785_v35 }
 0x28a   : > { %v2273_v47 = vpop.f32.mrb[0].mxu0 }
 0x28b   : > { %v2274_v63 = vpop.f32.mrb[1].mxu0 }
 0x28c   : > { %v2275_v45 = vadd.f32 %v2274_v63, %v2273_v47 }
 0x28e   : > { %v1875_v41 = vadd.f32 %v2275_v45, %v2235_v57 }
 0x28f   : > { %v2308_v44 = vpop.f32.mrb[0].mxu1 }
 0x290   : > { %v2309_v7 = vpop.f32.mrb[1].mxu1 }
 0x291   : > { %v2310_v19 = vadd.f32 %v2309_v7, %v2308_v44 }
 0x293   : > { %v1945_v20 = vadd.f32 %v2310_v19, %v1875_v41 }
 0x2b3   : > { %v2343_v9 = vpop.f32.mrb[2].mxu0 }
 0x2b4   : > { %v2344_v31 = vpop.f32.mrb[3].mxu0 }
 0x2b5   : > { %v2378_v2 = vpop.f32.mrb[2].mxu1  ;;  %v2345_v5 = vadd.f32 %v2344_v31, %v2343_v9 }
 0x2b6   : > { %v2379_v51 = vpop.f32.mrb[3].mxu1 }
 0x2b7   : > { %v2015_v26 = vadd.f32 %v2345_v5, %v1945_v20  ;;  %v2380_v54 = vadd.f32 %v2379_v51, %v2378_v2 }
 0x2b9   : > { %v2085_v6 = vadd.f32 %v2380_v54, %v2015_v26 }
 0x2bb   : > { %v2088_v46 = vmax.f32 %v2085_v6, 0.0 }
 0x2bd   : > { %2089 = vst [vmem:[%s267_s14] sm:$0xff] %v2088_v46 }
 0x2be PF: > { %s2237_s11 = sshll.u32 %s2795_s22, 7  ;;  %s2104_s28 = sshll.u32 %s267_s14, 4  ;;  %s2105_s28 = int_to_ptr.vmem [resolvable:$true] %s2104_s28 }
 0x2bf   : > { %s3954_s6 = scalar_lea.hbm %s4018_s4, %s2237_s11  ;;  %s2091_s2 = scalar_lea.sflag [#allocation5], %s265_s17 }
 0x2c0   : > { %s2681_s27 = scalar_lea.vmem %s2105_s28, 128  ;;  %p4263_p13 = scmp.ne.s32.totalorder %s4080_s12, 0 }
 0x2c1   : > { %p2682_p10 = scmp.ne.s32.totalorder %s2105_s28, %s2681_s27  ;;  %s2818_s29 = smov [#allocation8]  }
 0x2c2   : > { %s2685_s9 = sshll.u32 %s2818_s29, 4  ;;  %s2686_s9 = int_to_ptr.vmem [resolvable:$false] %s2685_s9 }
 0x2c3   : > { %p2683_p3 = pnand %p2682_p10, %p4263_p13  ;;  %s2687_s13 = scalar_lea.vmem %s2686_s9, 256 }
 0x2c4   : > { %p2688_p12 = scmp.lt.s32.totalorder %s2105_s28, %s2686_s9  ;;  %p2689_p5 = scmp.lt.s32.totalorder %s2687_s13, %s2681_s27 }
 0x2c5   : > { %p2684_p7 = pneg %p2683_p3 }
 0x2c6   : > { %p2690_p4 = por %p2689_p5, %p2688_p12 }
 0x2c8   : > { %p2691_p9 = pnand %p2690_p4, %p2684_p7 }
 0x2ca   : > { %2694 = shalt.err (!%p2691_p9)
}
 0x2cb   : > { %s2695_s22 = scalar_lea.hbm %s3954_s6, 128  ;;  %s2699_s8 = scalar_lea.hbm %s4018_s4, 256 }
 0x2cc   : > { %p2696_p11 = scmp.ne.s32.totalorder %s3954_s6, %s2695_s22  ;;  %p2700_p1 = scmp.lt.u32.totalorder %s3954_s6, %s4018_s4 }
 0x2cd   : > { %p2701_p2 = scmp.lt.u32.totalorder %s2699_s8, %s2695_s22  ;;  %p2703_p10 = scmp.lt.u32.totalorder %s2695_s22, %s3954_s6 }
 0x2ce   : > { %p2697_p6 = pnand %p2696_p11, %p4263_p13 }
 0x2cf   : > { %p2702_p8 = por %p2701_p2, %p2700_p1 }
 0x2d0   : > { %p2698_p0 = pneg %p2697_p6 }
 0x2d1   : > { %p2704_p3 = por %p2703_p10, %p2702_p8 }
 0x2d3   : > { %p2705_p7 = pnand %p2704_p3, %p2698_p0 }
 0x2d5   : > { %2708 = shalt.err (!%p2705_p7)
}
 0x2d6   : > { %2515 = dma.vmem_to_hbm [thread:$0]  (%p4263_p13), %s2105_s28, 128, %s3954_s6, %s2091_s2  }
 0x2d7 PF: > { %p2527_p12 = scmp.ge.s32.totalorder %s2807_s25, 2  ;;  %s2116_s5 = sand.u32 1, %s2767_s15  }
 0x2d8   : > { %p4264_p5 = scmp.ne.s32.totalorder %s4083_s18, 0  ;;  %s2117_s21 = scalar_lea.sflag [#allocation5], %s2116_s5 }
 0x2da   : > { %p2522_p4 = pnand %p2527_p12, %p4264_p5 }
 0x2dc   : > { %2762 = dma.done.wait (!%p2522_p4), %s2117_s21, 128  }
 0x2dd   : > { %2764 = vsyncadd (!%p2522_p4), %s2117_s21, 4294967168  ;;  %s21_s25 = sadd.s32 1, %s2807_s25   ;;  %s4265_s24 = sld [smem:[#allocation12_spill]] }
 0x2de   : > { %p18_p9 = scmp.ge.s32.totalorder %s21_s25, 8   ;;  %s4266_s17 = sld [smem:[#allocation16_spill]] }
 0x2df   : > { %s4267_s12 = sld [smem:[#allocation17_spill]]  ;;  %s4268_s22 = sld [smem:[#allocation13_spill]] }
 0x2e0   : > { %s4269_s11 = sld [smem:[#allocation14_spill]]  ;;  %s4270_s30 = sld [smem:[#allocation15_spill]] }
 0x2e1   : > { %s4271_s15 = smov %s2771_s16  ;;  %s4273_s18 = smov %s2783_s19 }
 0x2e2   : > { %s4274_s19 = smov %s2787_s20  ;;  %s4276_s21 = smov %s2799_s23 }
 0x2e3   : > { %s4272_s16 = smov %s4265_s24  ;;  %20 = sbr.rel (!%p18_p9) target bundleno = 12 (0xc), region = 106 }
 0x2e5   : > { %s4275_s20 = smov %s4267_s12 }
 0x2e6   : > { %s4277_s23 = smov %s4269_s11  ;;  %s4278_s24 = smov %s4270_s30 }
 0x2ea   :  { %2122 = vsyncpa [#allocation4], 1 }
 0x2eb   :  { %2124 = vsyncpa [#allocation4 + $0x1], 1 }
 0x2ec   :  { %2125 = vsyncpa [#allocation7], 1 }
 0x2ed   :  { %2126 = vsyncpa [#allocation5], 1 }
 0x2ee   :  { %2128 = vsyncpa [#allocation5 + $0x1], 1 }

</bundles_post_ra>
